<compile_context>
chip_gen: v7x
topology: tpu7x:2x2x1
jax: 0.10.0
libtpu: 0.0.40
codegen_flags: <defaults>
</compile_context>

<pallas_src>
import functools
import math

import jax
import jax.numpy as jnp
from jax.experimental import pallas as pl
from jax.experimental.pallas import tpu as pltpu


# ---------------------------------------------------------------------------
# padding helpers
# ---------------------------------------------------------------------------
def _rup(x, m):
    return (x + m - 1) // m * m


def _pad_to(a, shape):
    pads = [(0, t - s) for s, t in zip(a.shape, shape)]
    return jnp.pad(a, pads)


def _pad_gate_cols(w, h, h_pad):
    """(in, 4*h) -> (in, 4*h_pad), padding each PyTorch gate block (i,f,g,o)."""
    n_in = w.shape[0]
    w4 = w.reshape(n_in, 4, h)
    w4 = jnp.pad(w4, ((0, 0), (0, 0), (0, h_pad - h)))
    return w4.reshape(n_in, 4 * h_pad)


# ---------------------------------------------------------------------------
# kernel
# ---------------------------------------------------------------------------
def _decoder_step_kernel(
    # static (bound with functools.partial)
    l_true, v_true, tb, tv, h_pad,
    # scalar prefetch
    word_ref,                                   # (B_pad,) int32 in SMEM
    # inputs
    x_ref,                                      # (TB, L_pad, C_pad) bf16
    xa_ref,                                     # (TB, L_pad, A_pad) f32 (x@Wx+bx, precomputed)
    h_ref, c_ref,                               # (TB, H_pad) f32
    emb_hbm,                                    # (V, E_pad) f32, raw HBM ref
    wh_ref, bh_ref, va_ref,                     # (H_pad, A_pad) bf16, (1, A_pad) f32 x2
    wih_e_ref, wih_z_ref, whh_ref, blstm_ref,   # bf16 weights, (1, 4*H_pad) f32 bias
    wfc_e_ref, wfc_z_ref, wfc_h_ref, bfc_ref,   # per-vocab-block bf16 weights, f32 bias
    # outputs
    h_out_ref, c_out_ref, a_out_ref, logits_out_ref, lse_out_ref,
    # scratch
    ey_sc, z_sc, hn_sc, m_sc, s_sc, dma_sem,
):
    f32 = jnp.float32
    bf16 = jnp.bfloat16
    nb = pl.program_id(0)
    vb = pl.program_id(1)

    # ------------- phase 1 (once per batch block): gather + attention + LSTM
    @pl.when(vb == 0)
    def _():
        # embedding gather: DMA only the TB rows selected by `word`.
        base = nb * tb
        copies = []
        for b in range(tb):
            cp = pltpu.make_async_copy(
                emb_hbm.at[pl.ds(word_ref[base + b], 1)],
                ey_sc.at[pl.ds(b, 1)],
                dma_sem.at[b],
            )
            cp.start()
            copies.append(cp)
        for cp in copies:
            cp.wait()

        h = h_ref[...]
        c = c_ref[...]
        h_bf = h.astype(bf16)

        # additive attention (step-invariant xa supplied, only h-part here)
        ha = jnp.dot(h_bf, wh_ref[...], preferred_element_type=f32) + bh_ref[...]
        t = jnp.tanh(xa_ref[...] + ha[:, None, :])              # (TB, L_pad, A_pad)
        e = jnp.sum(t * va_ref[...][None, :, :], axis=-1)       # (TB, L_pad)
        lpos = jax.lax.broadcasted_iota(jnp.int32, e.shape, 1)
        e = jnp.where(lpos < l_true, e, f32(-1e30))              # mask padded timesteps
        e_max = jnp.max(e, axis=1, keepdims=True)
        p = jnp.exp(e - e_max)
        denom = jnp.sum(p, axis=1, keepdims=True)
        inv = pl.reciprocal(denom, approx=True)                  # EUP
        inv = inv * (2.0 - denom * inv)                          # 1 Newton step -> ~f32 exact
        a = p * inv

        # context vector on the MXU:  z[b, :] = a[b, :] @ x[b, :, :]
        z = jnp.einsum(
            "bql,blc->bqc", a.astype(bf16)[:, None, :], x_ref[...],
            preferred_element_type=f32)[:, 0, :]                 # (TB, C_pad)

        # LSTM cell, concat-free (weights split at the wrapper), gate slices
        # are lane-aligned because H is padded to a multiple of 128.
        ey_bf = ey_sc[...].astype(bf16)
        gates = (jnp.dot(ey_bf, wih_e_ref[...], preferred_element_type=f32)
                 + jnp.dot(z.astype(bf16), wih_z_ref[...], preferred_element_type=f32)
                 + jnp.dot(h_bf, whh_ref[...], preferred_element_type=f32)
                 + blstm_ref[...])                               # (TB, 4*H_pad)
        i_g = jax.nn.sigmoid(gates[:, 0 * h_pad:1 * h_pad])
        f_g = jax.nn.sigmoid(gates[:, 1 * h_pad:2 * h_pad])
        g_g = jnp.tanh(gates[:, 2 * h_pad:3 * h_pad])
        o_g = jax.nn.sigmoid(gates[:, 3 * h_pad:4 * h_pad])
        c_new = f_g * c + i_g * g_g
        h_new = o_g * jnp.tanh(c_new)

        h_out_ref[...] = h_new
        c_out_ref[...] = c_new
        a_out_ref[...] = a
        z_sc[...] = z.astype(bf16)
        hn_sc[...] = h_new.astype(bf16)
        m_sc[...] = jnp.full(m_sc.shape, -1e30, dtype=f32)
        s_sc[...] = jnp.zeros(s_sc.shape, dtype=f32)

    # ------------- phase 2 (every vocab block): fc projection + online LSE
    ey_bf = ey_sc[...].astype(bf16)
    logits = (jnp.dot(ey_bf, wfc_e_ref[...], preferred_element_type=f32)
              + jnp.dot(z_sc[...], wfc_z_ref[...], preferred_element_type=f32)
              + jnp.dot(hn_sc[...], wfc_h_ref[...], preferred_element_type=f32)
              + bfc_ref[...])                                    # (TB, TV)
    col = vb * tv + jax.lax.broadcasted_iota(jnp.int32, logits.shape, 1)
    logits = jnp.where(col < v_true, logits, f32(-1e30))          # mask padded vocab
    logits_out_ref[...] = logits

    blk_max = jnp.max(logits, axis=1, keepdims=True)
    m_new = jnp.maximum(m_sc[...], blk_max)
    s_sc[...] = (s_sc[...] * jnp.exp(m_sc[...] - m_new)
                 + jnp.sum(jnp.exp(logits - m_new), axis=1, keepdims=True))
    m_sc[...] = m_new

    @pl.when(vb == pl.num_programs(1) - 1)
    def _():
        lse_out_ref[...] = m_sc[...] + jnp.log(s_sc[...])


# ---------------------------------------------------------------------------
# wrapper
# ---------------------------------------------------------------------------
def precompute_attention_keys(x_pad_f32, wx_pad, bx_pad):
    """Step-invariant part of additive attention; compute ONCE per sequence."""
    return jnp.einsum("blc,ca->bla", x_pad_f32, wx_pad) + bx_pad


def decoder_forward(x, hidden, word, params, *, tv=128):
    """Pallas-backed Decoder.forward. Returns ((h, c), log_probs, a)."""
    h, c = hidden
    B, L, C = x.shape
    H = h.shape[1]
    V, E = params["emb"].shape
    A = params["attn_wx"].shape[1]

    f32, bf16 = jnp.float32, jnp.bfloat16

    TB = 8
    Bp, Lp = _rup(B, TB), _rup(L, 8)
    Cp, Ep, Hp, Ap = _rup(C, 128), _rup(E, 128), _rup(H, 128), _rup(A, 128)
    Vp = _rup(V, tv)
    NB, NV = Bp // TB, Vp // tv

    # ---- pad activations --------------------------------------------------
    x_p = _pad_to(x.astype(f32), (Bp, Lp, Cp))
    h_p = _pad_to(h.astype(f32), (Bp, Hp))
    c_p = _pad_to(c.astype(f32), (Bp, Hp))
    word_p = _pad_to(word.astype(jnp.int32), (Bp,))

    # ---- pad / split / cast weights (once per model in a real decode loop) -
    wx_p = _pad_to(params["attn_wx"], (Cp, Ap))
    bx_p = _pad_to(params["attn_bx"], (1, Ap))
    wh_p = _pad_to(params["attn_wh"], (Hp, Ap)).astype(bf16)
    bh_p = _pad_to(params["attn_bh"], (1, Ap))
    va_p = _pad_to(params["attn_v"], (1, Ap))

    wih = params["lstm_wih"]                                   # (E+C, 4H)
    wih_e_p = _pad_to(_pad_gate_cols(wih[:E], H, Hp), (Ep, 4 * Hp)).astype(bf16)
    wih_z_p = _pad_to(_pad_gate_cols(wih[E:], H, Hp), (Cp, 4 * Hp)).astype(bf16)
    whh_p = _pad_to(_pad_gate_cols(params["lstm_whh"], H, Hp), (Hp, 4 * Hp)).astype(bf16)
    blstm_p = _pad_gate_cols(params["lstm_bih"] + params["lstm_bhh"], H, Hp)   # (1, 4Hp) f32

    wfc = params["fc_w"]                                       # (E+C+H, V)
    wfc_e_p = _pad_to(wfc[:E], (Ep, Vp)).astype(bf16)
    wfc_z_p = _pad_to(wfc[E:E + C], (Cp, Vp)).astype(bf16)
    wfc_h_p = _pad_to(wfc[E + C:], (Hp, Vp)).astype(bf16)
    bfc_p = _pad_to(params["fc_b"], (1, Vp))

    emb_p = _pad_to(params["emb"], (V, Ep))                    # gathered by DMA, stays in HBM

    # ---- step-invariant attention keys, hoisted out of the per-step kernel -
    xa = precompute_attention_keys(x_p, wx_p, bx_p)            # (Bp, Lp, Ap) f32
    x_bf = x_p.astype(bf16)

    in_specs = [
        pl.BlockSpec((TB, Lp, Cp), lambda nb, vb, w: (nb, 0, 0)),   # x (bf16)
        pl.BlockSpec((TB, Lp, Ap), lambda nb, vb, w: (nb, 0, 0)),   # xa
        pl.BlockSpec((TB, Hp), lambda nb, vb, w: (nb, 0)),          # h
        pl.BlockSpec((TB, Hp), lambda nb, vb, w: (nb, 0)),          # c
        pl.BlockSpec(memory_space=pl.ANY),                          # emb (HBM)
        pl.BlockSpec((Hp, Ap), lambda nb, vb, w: (0, 0)),           # wh
        pl.BlockSpec((1, Ap), lambda nb, vb, w: (0, 0)),            # bh
        pl.BlockSpec((1, Ap), lambda nb, vb, w: (0, 0)),            # va
        pl.BlockSpec((Ep, 4 * Hp), lambda nb, vb, w: (0, 0)),       # wih_e
        pl.BlockSpec((Cp, 4 * Hp), lambda nb, vb, w: (0, 0)),       # wih_z
        pl.BlockSpec((Hp, 4 * Hp), lambda nb, vb, w: (0, 0)),       # whh
        pl.BlockSpec((1, 4 * Hp), lambda nb, vb, w: (0, 0)),        # b_lstm
        pl.BlockSpec((Ep, tv), lambda nb, vb, w: (0, vb)),          # wfc_e (vocab-tiled)
        pl.BlockSpec((Cp, tv), lambda nb, vb, w: (0, vb)),          # wfc_z
        pl.BlockSpec((Hp, tv), lambda nb, vb, w: (0, vb)),          # wfc_h
        pl.BlockSpec((1, tv), lambda nb, vb, w: (0, vb)),           # bfc
    ]
    out_specs = (
        pl.BlockSpec((TB, Hp), lambda nb, vb, w: (nb, 0)),          # h'
        pl.BlockSpec((TB, Hp), lambda nb, vb, w: (nb, 0)),          # c'
        pl.BlockSpec((TB, Lp), lambda nb, vb, w: (nb, 0)),          # attention weights
        pl.BlockSpec((TB, tv), lambda nb, vb, w: (nb, vb)),         # raw logits (tiled)
        pl.BlockSpec((TB, 1), lambda nb, vb, w: (nb, 0)),           # log-sum-exp
    )
    out_shape = (
        jax.ShapeDtypeStruct((Bp, Hp), f32),
        jax.ShapeDtypeStruct((Bp, Hp), f32),
        jax.ShapeDtypeStruct((Bp, Lp), f32),
        jax.ShapeDtypeStruct((Bp, Vp), f32),
        jax.ShapeDtypeStruct((Bp, 1), f32),
    )
    scratch_shapes = [
        pltpu.VMEM((TB, Ep), f32),        # gathered embedding rows
        pltpu.VMEM((TB, Cp), bf16),       # context z (persists across vocab blocks)
        pltpu.VMEM((TB, Hp), bf16),       # h_new (bf16 copy for the fc matmul)
        pltpu.VMEM((TB, 1), f32),         # running max (online LSE)
        pltpu.VMEM((TB, 1), f32),         # running sum (online LSE)
        pltpu.SemaphoreType.DMA((TB,)),
    ]

    kernel = functools.partial(_decoder_step_kernel, L, V, TB, tv, Hp)
    args = (word_p, x_bf, xa, h_p, c_p, emb_p, wh_p, bh_p, va_p,
            wih_e_p, wih_z_p, whh_p, blstm_p,
            wfc_e_p, wfc_z_p, wfc_h_p, bfc_p)

    in_bytes = sum(int(a.size) * a.dtype.itemsize for a in args)
    out_bytes = sum(int(math.prod(s.shape)) * 4 for s in out_shape)
    cost = pl.CostEstimate(
        flops=int(2 * Bp * ((Ep + Cp + Hp) * (4 * Hp + Vp) + Hp * Ap + Lp * Cp + Lp * Ap)),
        transcendentals=int(Bp * (Lp * Ap + Lp + 4 * Hp + 2 * Vp)),
        bytes_accessed=int(in_bytes + out_bytes),
    )

    h_o, c_o, a_o, logits_o, lse_o = pl.pallas_call(
        kernel,
        out_shape=out_shape,
        grid_spec=pltpu.PrefetchScalarGridSpec(
            num_scalar_prefetch=1,
            grid=(NB, NV),
            in_specs=in_specs,
            out_specs=out_specs,
            scratch_shapes=scratch_shapes,
        ),
        compiler_params=pltpu.CompilerParams(
            dimension_semantics=("parallel", "arbitrary"),
            vmem_limit_bytes=32 * 1024 * 1024,
        ),
        cost_estimate=cost,
    )(*args)

    h_new = h_o[:B, :H]
    c_new = c_o[:B, :H]
    attn = a_o[:B, :L]
    logp = logits_o[:B, :V] - lse_o[:B, :]     # log-softmax finalize (cheap, O(B*V))
    return (h_new, c_new), logp, attn


# ---------------------------------------------------------------------------
# params + pure-JAX reference (for correctness checking)
# ---------------------------------------------------------------------------
def init_params(key, input_size, embedding_size, vocab_size, hidden_size, attn_size):
    ks = jax.random.split(key, 16)
    s = 0.1

    def w(k, shape):
        return (s * jax.random.normal(k, shape)).astype(jnp.float32)

    C, E, V, H, A = input_size, embedding_size, vocab_size, hidden_size, attn_size
    return {
        "emb": w(ks[0], (V, E)),
        "attn_wx": w(ks[1], (C, A)), "attn_bx": w(ks[2], (1, A)),
        "attn_wh": w(ks[3], (H, A)), "attn_bh": w(ks[4], (1, A)),
        "attn_v":  w(ks[5], (1, A)),
        "lstm_wih": w(ks[6], (E + C, 4 * H)), "lstm_bih": w(ks[7], (1, 4 * H)),
        "lstm_whh": w(ks[8], (H, 4 * H)),     "lstm_bhh": w(ks[9], (1, 4 * H)),
        "fc_w": w(ks[10], (E + C + H, V)), "fc_b": w(ks[11], (1, V)),
        "fh_w": w(ks[12], (C, H)), "fh_b": w(ks[13], (1, H)),
        "fc_init_w": w(ks[14], (C, H)), "fc_init_b": w(ks[15], (1, H)),
    }


def _reference_decoder(x, h, c, word, params):
    H = h.shape[1]
    Ey = params["emb"][word]
    xa = jnp.einsum("blc,ca->bla", x, params["attn_wx"]) + params["attn_bx"]
    ha = h @ params["attn_wh"] + params["attn_bh"]
    t = jnp.tanh(xa + ha[:, None, :])
    e = jnp.sum(t * params["attn_v"][None], axis=-1)
    a = jax.nn.softmax(e, axis=1)
    z = jnp.einsum("bl,blc->bc", a, x)
    gates = (jnp.concatenate([Ey, z], axis=1) @ params["lstm_wih"] + params["lstm_bih"]
             + h @ params["lstm_whh"] + params["lstm_bhh"])
    i_g = jax.nn.sigmoid(gates[:, 0 * H:1 * H])
    f_g = jax.nn.sigmoid(gates[:, 1 * H:2 * H])
    g_g = jnp.tanh(gates[:, 2 * H:3 * H])
    o_g = jax.nn.sigmoid(gates[:, 3 * H:4 * H])
    c_new = f_g * c + i_g * g_g
    h_new = o_g * jnp.tanh(c_new)
    feat = jnp.concatenate([Ey, z, h_new], axis=1)
    logits = feat @ params["fc_w"] + params["fc_b"]
    return (h_new, c_new), jax.nn.log_softmax(logits, axis=1), a


# ---------------------------------------------------------------------------
# demo
# ---------------------------------------------------------------------------
if __name__ == "__main__":
    B, L = 2, 8
    input_size, embedding_size, vocab_size, hidden_size, attn_size = 16, 32, 200, 32, 16
    bgn = 1

    key = jax.random.PRNGKey(0)
    k_par, k_x = jax.random.split(key)
    params = init_params(k_par, input_size, embedding_size, vocab_size,
                         hidden_size, attn_size)

    x = jax.random.normal(k_x, (B, L, input_size), dtype=jnp.float32)
    word = jnp.full((B,), bgn, dtype=jnp.int32)

    # get_init_hidden (glue: mean + two small linears)
    avg = x.mean(axis=1)
    h0 = avg @ params["fh_w"] + params["fh_b"]
    c0 = avg @ params["fc_init_w"] + params["fc_init_b"]

    (h1, c1), logp, attn = decoder_forward(x, (h0, c0), word, params)
    jax.block_until_ready((h1, c1, logp, attn))

    assert h1.shape == (B, hidden_size)
    assert c1.shape == (B, hidden_size)
    assert logp.shape == (B, vocab_size)
    assert attn.shape == (B, L)
    assert jnp.allclose(jnp.exp(logp).sum(axis=1), 1.0, atol=1e-3)
    assert jnp.allclose(attn.sum(axis=1), 1.0, atol=1e-2)

    # compare against a pure-JAX f32 reference (kernel matmuls are bf16)
    (h1_r, c1_r), logp_r, attn_r = _reference_decoder(x, h0, c0, word, params)
    assert jnp.max(jnp.abs(h1 - h1_r)) < 7e-2
    assert jnp.max(jnp.abs(c1 - c1_r)) < 7e-2
    assert jnp.max(jnp.abs(attn - attn_r)) < 3e-2
    assert jnp.max(jnp.abs(logp - logp_r)) < 7e-2

    print("KERNEL_OK")
</pallas_src>

<mosaic_0001>
module attributes {stable_mosaic.version = 11 : i64} {
  func.func @_decoder_step_kernel(%arg0: i32, %arg1: i32, %arg2: memref<8xi32, #tpu.memory_space<smem>>, %arg3: memref<8x8x128xbf16, #tpu.memory_space<vmem>>, %arg4: memref<8x8x128xf32, #tpu.memory_space<vmem>>, %arg5: memref<8x128xf32, #tpu.memory_space<vmem>>, %arg6: memref<8x128xf32, #tpu.memory_space<vmem>>, %arg7: memref<200x128xf32, #tpu.memory_space<any>>, %arg8: memref<128x128xbf16, #tpu.memory_space<vmem>>, %arg9: memref<1x128xf32, #tpu.memory_space<vmem>>, %arg10: memref<1x128xf32, #tpu.memory_space<vmem>>, %arg11: memref<128x512xbf16, #tpu.memory_space<vmem>>, %arg12: memref<128x512xbf16, #tpu.memory_space<vmem>>, %arg13: memref<128x512xbf16, #tpu.memory_space<vmem>>, %arg14: memref<1x512xf32, #tpu.memory_space<vmem>>, %arg15: memref<128x128xbf16, #tpu.memory_space<vmem>>, %arg16: memref<128x128xbf16, #tpu.memory_space<vmem>>, %arg17: memref<128x128xbf16, #tpu.memory_space<vmem>>, %arg18: memref<1x128xf32, #tpu.memory_space<vmem>>, %arg19: memref<8x128xf32, #tpu.memory_space<vmem>>, %arg20: memref<8x128xf32, #tpu.memory_space<vmem>>, %arg21: memref<8x8xf32, #tpu.memory_space<vmem>>, %arg22: memref<8x128xf32, #tpu.memory_space<vmem>>, %arg23: memref<8x1xf32, #tpu.memory_space<vmem>>, %arg24: memref<8x128xf32, #tpu.memory_space<vmem>>, %arg25: memref<8x128xbf16, #tpu.memory_space<vmem>>, %arg26: memref<8x128xbf16, #tpu.memory_space<vmem>>, %arg27: memref<8x1xf32, #tpu.memory_space<vmem>>, %arg28: memref<8x1xf32, #tpu.memory_space<vmem>>, %arg29: memref<8x!tpu.dma_semaphore, #tpu.memory_space<semaphore_mem>>) attributes {dimension_semantics = [#tpu.dimension_semantics<parallel>, #tpu.dimension_semantics<arbitrary>], iteration_bounds = array<i64: 1, 2>, scalar_prefetch = 1 : i64, scratch_operands = 6 : i64, tpu.core_type = #tpu.core_type<tc>, window_params = [{transform_indices = @transform_0, window_bounds = array<i64: 8, 8, 128>}, {transform_indices = @transform_1, window_bounds = array<i64: 8, 8, 128>}, {transform_indices = @transform_2, window_bounds = array<i64: 8, 128>}, {transform_indices = @transform_3, window_bounds = array<i64: 8, 128>}, {}, {pipeline_mode = #tpu.pipeline_mode<synchronous>, transform_indices = @transform_5, window_bounds = array<i64: 128, 128>}, {pipeline_mode = #tpu.pipeline_mode<synchronous>, transform_indices = @transform_6, window_bounds = array<i64: 1, 128>}, {pipeline_mode = #tpu.pipeline_mode<synchronous>, transform_indices = @transform_7, window_bounds = array<i64: 1, 128>}, {pipeline_mode = #tpu.pipeline_mode<synchronous>, transform_indices = @transform_8, window_bounds = array<i64: 128, 512>}, {pipeline_mode = #tpu.pipeline_mode<synchronous>, transform_indices = @transform_9, window_bounds = array<i64: 128, 512>}, {pipeline_mode = #tpu.pipeline_mode<synchronous>, transform_indices = @transform_10, window_bounds = array<i64: 128, 512>}, {pipeline_mode = #tpu.pipeline_mode<synchronous>, transform_indices = @transform_11, window_bounds = array<i64: 1, 512>}, {transform_indices = @transform_12, window_bounds = array<i64: 128, 128>}, {transform_indices = @transform_13, window_bounds = array<i64: 128, 128>}, {transform_indices = @transform_14, window_bounds = array<i64: 128, 128>}, {transform_indices = @transform_15, window_bounds = array<i64: 1, 128>}, {transform_indices = @transform_16, window_bounds = array<i64: 8, 128>}, {transform_indices = @transform_17, window_bounds = array<i64: 8, 128>}, {transform_indices = @transform_18, window_bounds = array<i64: 8, 8>}, {transform_indices = @transform_19, window_bounds = array<i64: 8, 128>}, {transform_indices = @transform_20, window_bounds = array<i64: 8, 1>}]} {
    %c0_i32 = arith.constant 0 : i32
    %0 = arith.cmpi eq, %arg1, %c0_i32 : i32
    %1 = arith.extui %0 : i1 to i32
    %c0_i32_0 = arith.constant 0 : i32
    %2 = arith.cmpi ne, %1, %c0_i32_0 : i32
    scf.if %2 {
      %c8_i32 = arith.constant 8 : i32
      %47 = arith.muli %arg0, %c8_i32 : i32
      %c0_i32_32 = arith.constant 0 : i32
      %48 = arith.addi %47, %c0_i32_32 : i32
      %49 = arith.index_cast %48 : i32 to index
      %50 = memref.load %arg2[%49] : memref<8xi32, #tpu.memory_space<smem>>
      %c0_i32_33 = arith.constant 0 : i32
      %c0_i32_34 = arith.constant 0 : i32
      %51 = tpu.memref_slice %arg7[%50, %c0_i32_34] : memref<200x128xf32, #tpu.memory_space<any>> -> memref<1x128xf32, #tpu.memory_space<any>>
      %c0_i32_35 = arith.constant 0 : i32
      %c0_i32_36 = arith.constant 0 : i32
      %52 = tpu.memref_slice %arg24[%c0_i32_35, %c0_i32_36] : memref<8x128xf32, #tpu.memory_space<vmem>> -> memref<1x128xf32, #tpu.memory_space<vmem>>
      %53 = tpu.memref_slice %arg29[%c0_i32_33] : memref<8x!tpu.dma_semaphore, #tpu.memory_space<semaphore_mem>> -> memref<1x!tpu.dma_semaphore, #tpu.memory_space<semaphore_mem>>
      %54 = tpu.memref_squeeze %53 : memref<1x!tpu.dma_semaphore, #tpu.memory_space<semaphore_mem>> -> memref<!tpu.dma_semaphore, #tpu.memory_space<semaphore_mem>>
      tpu.enqueue_dma source(%51 : memref<1x128xf32, #tpu.memory_space<any>>) target(%52 : memref<1x128xf32, #tpu.memory_space<vmem>>) target_semaphore(%54 : memref<!tpu.dma_semaphore, #tpu.memory_space<semaphore_mem>>)
      %c1_i32_37 = arith.constant 1 : i32
      %55 = arith.addi %47, %c1_i32_37 : i32
      %56 = arith.index_cast %55 : i32 to index
      %57 = memref.load %arg2[%56] : memref<8xi32, #tpu.memory_space<smem>>
      %c1_i32_38 = arith.constant 1 : i32
      %c0_i32_39 = arith.constant 0 : i32
      %58 = tpu.memref_slice %arg7[%57, %c0_i32_39] : memref<200x128xf32, #tpu.memory_space<any>> -> memref<1x128xf32, #tpu.memory_space<any>>
      %c1_i32_40 = arith.constant 1 : i32
      %c0_i32_41 = arith.constant 0 : i32
      %59 = tpu.memref_slice %arg24[%c1_i32_40, %c0_i32_41] : memref<8x128xf32, #tpu.memory_space<vmem>> -> memref<1x128xf32, #tpu.memory_space<vmem>>
      %60 = tpu.memref_slice %arg29[%c1_i32_38] : memref<8x!tpu.dma_semaphore, #tpu.memory_space<semaphore_mem>> -> memref<1x!tpu.dma_semaphore, #tpu.memory_space<semaphore_mem>>
      %61 = tpu.memref_squeeze %60 : memref<1x!tpu.dma_semaphore, #tpu.memory_space<semaphore_mem>> -> memref<!tpu.dma_semaphore, #tpu.memory_space<semaphore_mem>>
      tpu.enqueue_dma source(%58 : memref<1x128xf32, #tpu.memory_space<any>>) target(%59 : memref<1x128xf32, #tpu.memory_space<vmem>>) target_semaphore(%61 : memref<!tpu.dma_semaphore, #tpu.memory_space<semaphore_mem>>)
      %c2_i32 = arith.constant 2 : i32
      %62 = arith.addi %47, %c2_i32 : i32
      %63 = arith.index_cast %62 : i32 to index
      %64 = memref.load %arg2[%63] : memref<8xi32, #tpu.memory_space<smem>>
      %c2_i32_42 = arith.constant 2 : i32
      %c0_i32_43 = arith.constant 0 : i32
      %65 = tpu.memref_slice %arg7[%64, %c0_i32_43] : memref<200x128xf32, #tpu.memory_space<any>> -> memref<1x128xf32, #tpu.memory_space<any>>
      %c2_i32_44 = arith.constant 2 : i32
      %c0_i32_45 = arith.constant 0 : i32
      %66 = tpu.memref_slice %arg24[%c2_i32_44, %c0_i32_45] : memref<8x128xf32, #tpu.memory_space<vmem>> -> memref<1x128xf32, #tpu.memory_space<vmem>>
      %67 = tpu.memref_slice %arg29[%c2_i32_42] : memref<8x!tpu.dma_semaphore, #tpu.memory_space<semaphore_mem>> -> memref<1x!tpu.dma_semaphore, #tpu.memory_space<semaphore_mem>>
      %68 = tpu.memref_squeeze %67 : memref<1x!tpu.dma_semaphore, #tpu.memory_space<semaphore_mem>> -> memref<!tpu.dma_semaphore, #tpu.memory_space<semaphore_mem>>
      tpu.enqueue_dma source(%65 : memref<1x128xf32, #tpu.memory_space<any>>) target(%66 : memref<1x128xf32, #tpu.memory_space<vmem>>) target_semaphore(%68 : memref<!tpu.dma_semaphore, #tpu.memory_space<semaphore_mem>>)
      %c3_i32 = arith.constant 3 : i32
      %69 = arith.addi %47, %c3_i32 : i32
      %70 = arith.index_cast %69 : i32 to index
      %71 = memref.load %arg2[%70] : memref<8xi32, #tpu.memory_space<smem>>
      %c3_i32_46 = arith.constant 3 : i32
      %c0_i32_47 = arith.constant 0 : i32
      %72 = tpu.memref_slice %arg7[%71, %c0_i32_47] : memref<200x128xf32, #tpu.memory_space<any>> -> memref<1x128xf32, #tpu.memory_space<any>>
      %c3_i32_48 = arith.constant 3 : i32
      %c0_i32_49 = arith.constant 0 : i32
      %73 = tpu.memref_slice %arg24[%c3_i32_48, %c0_i32_49] : memref<8x128xf32, #tpu.memory_space<vmem>> -> memref<1x128xf32, #tpu.memory_space<vmem>>
      %74 = tpu.memref_slice %arg29[%c3_i32_46] : memref<8x!tpu.dma_semaphore, #tpu.memory_space<semaphore_mem>> -> memref<1x!tpu.dma_semaphore, #tpu.memory_space<semaphore_mem>>
      %75 = tpu.memref_squeeze %74 : memref<1x!tpu.dma_semaphore, #tpu.memory_space<semaphore_mem>> -> memref<!tpu.dma_semaphore, #tpu.memory_space<semaphore_mem>>
      tpu.enqueue_dma source(%72 : memref<1x128xf32, #tpu.memory_space<any>>) target(%73 : memref<1x128xf32, #tpu.memory_space<vmem>>) target_semaphore(%75 : memref<!tpu.dma_semaphore, #tpu.memory_space<semaphore_mem>>)
      %c4_i32 = arith.constant 4 : i32
      %76 = arith.addi %47, %c4_i32 : i32
      %77 = arith.index_cast %76 : i32 to index
      %78 = memref.load %arg2[%77] : memref<8xi32, #tpu.memory_space<smem>>
      %c4_i32_50 = arith.constant 4 : i32
      %c0_i32_51 = arith.constant 0 : i32
      %79 = tpu.memref_slice %arg7[%78, %c0_i32_51] : memref<200x128xf32, #tpu.memory_space<any>> -> memref<1x128xf32, #tpu.memory_space<any>>
      %c4_i32_52 = arith.constant 4 : i32
      %c0_i32_53 = arith.constant 0 : i32
      %80 = tpu.memref_slice %arg24[%c4_i32_52, %c0_i32_53] : memref<8x128xf32, #tpu.memory_space<vmem>> -> memref<1x128xf32, #tpu.memory_space<vmem>>
      %81 = tpu.memref_slice %arg29[%c4_i32_50] : memref<8x!tpu.dma_semaphore, #tpu.memory_space<semaphore_mem>> -> memref<1x!tpu.dma_semaphore, #tpu.memory_space<semaphore_mem>>
      %82 = tpu.memref_squeeze %81 : memref<1x!tpu.dma_semaphore, #tpu.memory_space<semaphore_mem>> -> memref<!tpu.dma_semaphore, #tpu.memory_space<semaphore_mem>>
      tpu.enqueue_dma source(%79 : memref<1x128xf32, #tpu.memory_space<any>>) target(%80 : memref<1x128xf32, #tpu.memory_space<vmem>>) target_semaphore(%82 : memref<!tpu.dma_semaphore, #tpu.memory_space<semaphore_mem>>)
      %c5_i32 = arith.constant 5 : i32
      %83 = arith.addi %47, %c5_i32 : i32
      %84 = arith.index_cast %83 : i32 to index
      %85 = memref.load %arg2[%84] : memref<8xi32, #tpu.memory_space<smem>>
      %c5_i32_54 = arith.constant 5 : i32
      %c0_i32_55 = arith.constant 0 : i32
      %86 = tpu.memref_slice %arg7[%85, %c0_i32_55] : memref<200x128xf32, #tpu.memory_space<any>> -> memref<1x128xf32, #tpu.memory_space<any>>
      %c5_i32_56 = arith.constant 5 : i32
      %c0_i32_57 = arith.constant 0 : i32
      %87 = tpu.memref_slice %arg24[%c5_i32_56, %c0_i32_57] : memref<8x128xf32, #tpu.memory_space<vmem>> -> memref<1x128xf32, #tpu.memory_space<vmem>>
      %88 = tpu.memref_slice %arg29[%c5_i32_54] : memref<8x!tpu.dma_semaphore, #tpu.memory_space<semaphore_mem>> -> memref<1x!tpu.dma_semaphore, #tpu.memory_space<semaphore_mem>>
      %89 = tpu.memref_squeeze %88 : memref<1x!tpu.dma_semaphore, #tpu.memory_space<semaphore_mem>> -> memref<!tpu.dma_semaphore, #tpu.memory_space<semaphore_mem>>
      tpu.enqueue_dma source(%86 : memref<1x128xf32, #tpu.memory_space<any>>) target(%87 : memref<1x128xf32, #tpu.memory_space<vmem>>) target_semaphore(%89 : memref<!tpu.dma_semaphore, #tpu.memory_space<semaphore_mem>>)
      %c6_i32 = arith.constant 6 : i32
      %90 = arith.addi %47, %c6_i32 : i32
      %91 = arith.index_cast %90 : i32 to index
      %92 = memref.load %arg2[%91] : memref<8xi32, #tpu.memory_space<smem>>
      %c6_i32_58 = arith.constant 6 : i32
      %c0_i32_59 = arith.constant 0 : i32
      %93 = tpu.memref_slice %arg7[%92, %c0_i32_59] : memref<200x128xf32, #tpu.memory_space<any>> -> memref<1x128xf32, #tpu.memory_space<any>>
      %c6_i32_60 = arith.constant 6 : i32
      %c0_i32_61 = arith.constant 0 : i32
      %94 = tpu.memref_slice %arg24[%c6_i32_60, %c0_i32_61] : memref<8x128xf32, #tpu.memory_space<vmem>> -> memref<1x128xf32, #tpu.memory_space<vmem>>
      %95 = tpu.memref_slice %arg29[%c6_i32_58] : memref<8x!tpu.dma_semaphore, #tpu.memory_space<semaphore_mem>> -> memref<1x!tpu.dma_semaphore, #tpu.memory_space<semaphore_mem>>
      %96 = tpu.memref_squeeze %95 : memref<1x!tpu.dma_semaphore, #tpu.memory_space<semaphore_mem>> -> memref<!tpu.dma_semaphore, #tpu.memory_space<semaphore_mem>>
      tpu.enqueue_dma source(%93 : memref<1x128xf32, #tpu.memory_space<any>>) target(%94 : memref<1x128xf32, #tpu.memory_space<vmem>>) target_semaphore(%96 : memref<!tpu.dma_semaphore, #tpu.memory_space<semaphore_mem>>)
      %c7_i32 = arith.constant 7 : i32
      %97 = arith.addi %47, %c7_i32 : i32
      %98 = arith.index_cast %97 : i32 to index
      %99 = memref.load %arg2[%98] : memref<8xi32, #tpu.memory_space<smem>>
      %c7_i32_62 = arith.constant 7 : i32
      %c0_i32_63 = arith.constant 0 : i32
      %100 = tpu.memref_slice %arg7[%99, %c0_i32_63] : memref<200x128xf32, #tpu.memory_space<any>> -> memref<1x128xf32, #tpu.memory_space<any>>
      %c7_i32_64 = arith.constant 7 : i32
      %c0_i32_65 = arith.constant 0 : i32
      %101 = tpu.memref_slice %arg24[%c7_i32_64, %c0_i32_65] : memref<8x128xf32, #tpu.memory_space<vmem>> -> memref<1x128xf32, #tpu.memory_space<vmem>>
      %102 = tpu.memref_slice %arg29[%c7_i32_62] : memref<8x!tpu.dma_semaphore, #tpu.memory_space<semaphore_mem>> -> memref<1x!tpu.dma_semaphore, #tpu.memory_space<semaphore_mem>>
      %103 = tpu.memref_squeeze %102 : memref<1x!tpu.dma_semaphore, #tpu.memory_space<semaphore_mem>> -> memref<!tpu.dma_semaphore, #tpu.memory_space<semaphore_mem>>
      tpu.enqueue_dma source(%100 : memref<1x128xf32, #tpu.memory_space<any>>) target(%101 : memref<1x128xf32, #tpu.memory_space<vmem>>) target_semaphore(%103 : memref<!tpu.dma_semaphore, #tpu.memory_space<semaphore_mem>>)
      %c0_i32_66 = arith.constant 0 : i32
      %c0_i32_67 = arith.constant 0 : i32
      %104 = tpu.memref_slice %arg7[%50, %c0_i32_67] : memref<200x128xf32, #tpu.memory_space<any>> -> memref<1x128xf32, #tpu.memory_space<any>>
      %c0_i32_68 = arith.constant 0 : i32
      %c0_i32_69 = arith.constant 0 : i32
      %105 = tpu.memref_slice %arg24[%c0_i32_68, %c0_i32_69] : memref<8x128xf32, #tpu.memory_space<vmem>> -> memref<1x128xf32, #tpu.memory_space<vmem>>
      %106 = tpu.memref_slice %arg29[%c0_i32_66] : memref<8x!tpu.dma_semaphore, #tpu.memory_space<semaphore_mem>> -> memref<1x!tpu.dma_semaphore, #tpu.memory_space<semaphore_mem>>
      %107 = tpu.memref_squeeze %106 : memref<1x!tpu.dma_semaphore, #tpu.memory_space<semaphore_mem>> -> memref<!tpu.dma_semaphore, #tpu.memory_space<semaphore_mem>>
      tpu.wait_dma2 semaphore(%107 : memref<!tpu.dma_semaphore, #tpu.memory_space<semaphore_mem>>) src(%104 : memref<1x128xf32, #tpu.memory_space<any>>) dst(%105 : memref<1x128xf32, #tpu.memory_space<vmem>>)
      %c1_i32_70 = arith.constant 1 : i32
      %c0_i32_71 = arith.constant 0 : i32
      %108 = tpu.memref_slice %arg7[%57, %c0_i32_71] : memref<200x128xf32, #tpu.memory_space<any>> -> memref<1x128xf32, #tpu.memory_space<any>>
      %c1_i32_72 = arith.constant 1 : i32
      %c0_i32_73 = arith.constant 0 : i32
      %109 = tpu.memref_slice %arg24[%c1_i32_72, %c0_i32_73] : memref<8x128xf32, #tpu.memory_space<vmem>> -> memref<1x128xf32, #tpu.memory_space<vmem>>
      %110 = tpu.memref_slice %arg29[%c1_i32_70] : memref<8x!tpu.dma_semaphore, #tpu.memory_space<semaphore_mem>> -> memref<1x!tpu.dma_semaphore, #tpu.memory_space<semaphore_mem>>
      %111 = tpu.memref_squeeze %110 : memref<1x!tpu.dma_semaphore, #tpu.memory_space<semaphore_mem>> -> memref<!tpu.dma_semaphore, #tpu.memory_space<semaphore_mem>>
      tpu.wait_dma2 semaphore(%111 : memref<!tpu.dma_semaphore, #tpu.memory_space<semaphore_mem>>) src(%108 : memref<1x128xf32, #tpu.memory_space<any>>) dst(%109 : memref<1x128xf32, #tpu.memory_space<vmem>>)
      %c2_i32_74 = arith.constant 2 : i32
      %c0_i32_75 = arith.constant 0 : i32
      %112 = tpu.memref_slice %arg7[%64, %c0_i32_75] : memref<200x128xf32, #tpu.memory_space<any>> -> memref<1x128xf32, #tpu.memory_space<any>>
      %c2_i32_76 = arith.constant 2 : i32
      %c0_i32_77 = arith.constant 0 : i32
      %113 = tpu.memref_slice %arg24[%c2_i32_76, %c0_i32_77] : memref<8x128xf32, #tpu.memory_space<vmem>> -> memref<1x128xf32, #tpu.memory_space<vmem>>
      %114 = tpu.memref_slice %arg29[%c2_i32_74] : memref<8x!tpu.dma_semaphore, #tpu.memory_space<semaphore_mem>> -> memref<1x!tpu.dma_semaphore, #tpu.memory_space<semaphore_mem>>
      %115 = tpu.memref_squeeze %114 : memref<1x!tpu.dma_semaphore, #tpu.memory_space<semaphore_mem>> -> memref<!tpu.dma_semaphore, #tpu.memory_space<semaphore_mem>>
      tpu.wait_dma2 semaphore(%115 : memref<!tpu.dma_semaphore, #tpu.memory_space<semaphore_mem>>) src(%112 : memref<1x128xf32, #tpu.memory_space<any>>) dst(%113 : memref<1x128xf32, #tpu.memory_space<vmem>>)
      %c3_i32_78 = arith.constant 3 : i32
      %c0_i32_79 = arith.constant 0 : i32
      %116 = tpu.memref_slice %arg7[%71, %c0_i32_79] : memref<200x128xf32, #tpu.memory_space<any>> -> memref<1x128xf32, #tpu.memory_space<any>>
      %c3_i32_80 = arith.constant 3 : i32
      %c0_i32_81 = arith.constant 0 : i32
      %117 = tpu.memref_slice %arg24[%c3_i32_80, %c0_i32_81] : memref<8x128xf32, #tpu.memory_space<vmem>> -> memref<1x128xf32, #tpu.memory_space<vmem>>
      %118 = tpu.memref_slice %arg29[%c3_i32_78] : memref<8x!tpu.dma_semaphore, #tpu.memory_space<semaphore_mem>> -> memref<1x!tpu.dma_semaphore, #tpu.memory_space<semaphore_mem>>
      %119 = tpu.memref_squeeze %118 : memref<1x!tpu.dma_semaphore, #tpu.memory_space<semaphore_mem>> -> memref<!tpu.dma_semaphore, #tpu.memory_space<semaphore_mem>>
      tpu.wait_dma2 semaphore(%119 : memref<!tpu.dma_semaphore, #tpu.memory_space<semaphore_mem>>) src(%116 : memref<1x128xf32, #tpu.memory_space<any>>) dst(%117 : memref<1x128xf32, #tpu.memory_space<vmem>>)
      %c4_i32_82 = arith.constant 4 : i32
      %c0_i32_83 = arith.constant 0 : i32
      %120 = tpu.memref_slice %arg7[%78, %c0_i32_83] : memref<200x128xf32, #tpu.memory_space<any>> -> memref<1x128xf32, #tpu.memory_space<any>>
      %c4_i32_84 = arith.constant 4 : i32
      %c0_i32_85 = arith.constant 0 : i32
      %121 = tpu.memref_slice %arg24[%c4_i32_84, %c0_i32_85] : memref<8x128xf32, #tpu.memory_space<vmem>> -> memref<1x128xf32, #tpu.memory_space<vmem>>
      %122 = tpu.memref_slice %arg29[%c4_i32_82] : memref<8x!tpu.dma_semaphore, #tpu.memory_space<semaphore_mem>> -> memref<1x!tpu.dma_semaphore, #tpu.memory_space<semaphore_mem>>
      %123 = tpu.memref_squeeze %122 : memref<1x!tpu.dma_semaphore, #tpu.memory_space<semaphore_mem>> -> memref<!tpu.dma_semaphore, #tpu.memory_space<semaphore_mem>>
      tpu.wait_dma2 semaphore(%123 : memref<!tpu.dma_semaphore, #tpu.memory_space<semaphore_mem>>) src(%120 : memref<1x128xf32, #tpu.memory_space<any>>) dst(%121 : memref<1x128xf32, #tpu.memory_space<vmem>>)
      %c5_i32_86 = arith.constant 5 : i32
      %c0_i32_87 = arith.constant 0 : i32
      %124 = tpu.memref_slice %arg7[%85, %c0_i32_87] : memref<200x128xf32, #tpu.memory_space<any>> -> memref<1x128xf32, #tpu.memory_space<any>>
      %c5_i32_88 = arith.constant 5 : i32
      %c0_i32_89 = arith.constant 0 : i32
      %125 = tpu.memref_slice %arg24[%c5_i32_88, %c0_i32_89] : memref<8x128xf32, #tpu.memory_space<vmem>> -> memref<1x128xf32, #tpu.memory_space<vmem>>
      %126 = tpu.memref_slice %arg29[%c5_i32_86] : memref<8x!tpu.dma_semaphore, #tpu.memory_space<semaphore_mem>> -> memref<1x!tpu.dma_semaphore, #tpu.memory_space<semaphore_mem>>
      %127 = tpu.memref_squeeze %126 : memref<1x!tpu.dma_semaphore, #tpu.memory_space<semaphore_mem>> -> memref<!tpu.dma_semaphore, #tpu.memory_space<semaphore_mem>>
      tpu.wait_dma2 semaphore(%127 : memref<!tpu.dma_semaphore, #tpu.memory_space<semaphore_mem>>) src(%124 : memref<1x128xf32, #tpu.memory_space<any>>) dst(%125 : memref<1x128xf32, #tpu.memory_space<vmem>>)
      %c6_i32_90 = arith.constant 6 : i32
      %c0_i32_91 = arith.constant 0 : i32
      %128 = tpu.memref_slice %arg7[%92, %c0_i32_91] : memref<200x128xf32, #tpu.memory_space<any>> -> memref<1x128xf32, #tpu.memory_space<any>>
      %c6_i32_92 = arith.constant 6 : i32
      %c0_i32_93 = arith.constant 0 : i32
      %129 = tpu.memref_slice %arg24[%c6_i32_92, %c0_i32_93] : memref<8x128xf32, #tpu.memory_space<vmem>> -> memref<1x128xf32, #tpu.memory_space<vmem>>
      %130 = tpu.memref_slice %arg29[%c6_i32_90] : memref<8x!tpu.dma_semaphore, #tpu.memory_space<semaphore_mem>> -> memref<1x!tpu.dma_semaphore, #tpu.memory_space<semaphore_mem>>
      %131 = tpu.memref_squeeze %130 : memref<1x!tpu.dma_semaphore, #tpu.memory_space<semaphore_mem>> -> memref<!tpu.dma_semaphore, #tpu.memory_space<semaphore_mem>>
      tpu.wait_dma2 semaphore(%131 : memref<!tpu.dma_semaphore, #tpu.memory_space<semaphore_mem>>) src(%128 : memref<1x128xf32, #tpu.memory_space<any>>) dst(%129 : memref<1x128xf32, #tpu.memory_space<vmem>>)
      %c7_i32_94 = arith.constant 7 : i32
      %c0_i32_95 = arith.constant 0 : i32
      %132 = tpu.memref_slice %arg7[%99, %c0_i32_95] : memref<200x128xf32, #tpu.memory_space<any>> -> memref<1x128xf32, #tpu.memory_space<any>>
      %c7_i32_96 = arith.constant 7 : i32
      %c0_i32_97 = arith.constant 0 : i32
      %133 = tpu.memref_slice %arg24[%c7_i32_96, %c0_i32_97] : memref<8x128xf32, #tpu.memory_space<vmem>> -> memref<1x128xf32, #tpu.memory_space<vmem>>
      %134 = tpu.memref_slice %arg29[%c7_i32_94] : memref<8x!tpu.dma_semaphore, #tpu.memory_space<semaphore_mem>> -> memref<1x!tpu.dma_semaphore, #tpu.memory_space<semaphore_mem>>
      %135 = tpu.memref_squeeze %134 : memref<1x!tpu.dma_semaphore, #tpu.memory_space<semaphore_mem>> -> memref<!tpu.dma_semaphore, #tpu.memory_space<semaphore_mem>>
      tpu.wait_dma2 semaphore(%135 : memref<!tpu.dma_semaphore, #tpu.memory_space<semaphore_mem>>) src(%132 : memref<1x128xf32, #tpu.memory_space<any>>) dst(%133 : memref<1x128xf32, #tpu.memory_space<vmem>>)
      %c0_98 = arith.constant 0 : index
      %c0_99 = arith.constant 0 : index
      %136 = vector.load %arg5[%c0_98, %c0_99] : memref<8x128xf32, #tpu.memory_space<vmem>>, vector<8x128xf32>
      %c0_100 = arith.constant 0 : index
      %c0_101 = arith.constant 0 : index
      %137 = vector.load %arg6[%c0_100, %c0_101] : memref<8x128xf32, #tpu.memory_space<vmem>>, vector<8x128xf32>
      %138 = arith.truncf %136 : vector<8x128xf32> to vector<8x128xbf16>
      %c0_102 = arith.constant 0 : index
      %c0_103 = arith.constant 0 : index
      %139 = vector.load %arg8[%c0_102, %c0_103] : memref<128x128xbf16, #tpu.memory_space<vmem>>, vector<128x128xbf16>
      %cst_104 = arith.constant dense<0.000000e+00> : vector<8x128xf32>
      %140 = tpu.matmul %138, %139, %cst_104 {dimension_numbers = #tpu.dot_dimension_numbers<[1], [0], [0], [1], [0, 0, 1, 1], [], []>} : vector<8x128xbf16>, vector<128x128xbf16>, vector<8x128xf32> -> vector<8x128xf32>
      %c0_105 = arith.constant 0 : index
      %c0_106 = arith.constant 0 : index
      %141 = vector.load %arg9[%c0_105, %c0_106] : memref<1x128xf32, #tpu.memory_space<vmem>>, vector<1x128xf32>
      %142 = vector.broadcast %141 : vector<1x128xf32> to vector<8x128xf32>
      %143 = arith.addf %140, %142 : vector<8x128xf32>
      %c0_107 = arith.constant 0 : index
      %c0_108 = arith.constant 0 : index
      %c0_109 = arith.constant 0 : index
      %144 = vector.load %arg4[%c0_107, %c0_108, %c0_109] : memref<8x8x128xf32, #tpu.memory_space<vmem>>, vector<8x8x128xf32>
      %145 = vector.shape_cast %143 : vector<8x128xf32> to vector<8x1x128xf32>
      %146 = vector.broadcast %145 : vector<8x1x128xf32> to vector<8x8x128xf32>
      %147 = arith.addf %144, %146 : vector<8x8x128xf32>
      %148 = math.tanh %147 : vector<8x8x128xf32>
      %c0_110 = arith.constant 0 : index
      %c0_111 = arith.constant 0 : index
      %149 = vector.load %arg10[%c0_110, %c0_111] : memref<1x128xf32, #tpu.memory_space<vmem>>, vector<1x128xf32>
      %150 = vector.shape_cast %149 : vector<1x128xf32> to vector<1x1x128xf32>
      %151 = vector.broadcast %150 : vector<1x1x128xf32> to vector<8x8x128xf32>
      %152 = arith.mulf %148, %151 : vector<8x8x128xf32>
      %cst_112 = arith.constant dense<0.000000e+00> : vector<8x8xf32>
      %153 = vector.multi_reduction <add>, %152, %cst_112 [2] : vector<8x8x128xf32> to vector<8x8xf32>
      %154 = tpu.iota {dimensions = array<i32: 1>} : vector<8x8xi32>
      %c8_i32_113 = arith.constant 8 : i32
      %155 = vector.broadcast %c8_i32_113 : i32 to vector<8x8xi32>
      %156 = arith.cmpi slt, %154, %155 : vector<8x8xi32>
      %cst_114 = arith.constant -1.000000e+30 : f32
      %157 = vector.broadcast %cst_114 : f32 to vector<8x8xf32>
      %158 = arith.select %156, %153, %157 : vector<8x8xi1>, vector<8x8xf32>
      %cst_115 = arith.constant dense<0xFF800000> : vector<8xf32>
      %159 = vector.multi_reduction <maximumf>, %158, %cst_115 [1] : vector<8x8xf32> to vector<8xf32>
      %160 = vector.shape_cast %159 : vector<8xf32> to vector<8x1xf32>
      %161 = vector.broadcast %160 : vector<8x1xf32> to vector<8x8xf32>
      %162 = arith.subf %158, %161 : vector<8x8xf32>
      %163 = math.exp %162 : vector<8x8xf32>
      %cst_116 = arith.constant dense<0.000000e+00> : vector<8xf32>
      %164 = vector.multi_reduction <add>, %163, %cst_116 [1] : vector<8x8xf32> to vector<8xf32>
      %165 = vector.shape_cast %164 : vector<8xf32> to vector<8x1xf32>
      %166 = tpu.reciprocal %165 {approx = true} : vector<8x1xf32> -> vector<8x1xf32>
      %167 = arith.mulf %165, %166 : vector<8x1xf32>
      %cst_117 = arith.constant 2.000000e+00 : f32
      %168 = vector.broadcast %cst_117 : f32 to vector<8x1xf32>
      %169 = arith.subf %168, %167 : vector<8x1xf32>
      %170 = arith.mulf %166, %169 : vector<8x1xf32>
      %171 = vector.broadcast %170 : vector<8x1xf32> to vector<8x8xf32>
      %172 = arith.mulf %163, %171 : vector<8x8xf32>
      %173 = arith.truncf %172 : vector<8x8xf32> to vector<8x8xbf16>
      %174 = vector.shape_cast %173 : vector<8x8xbf16> to vector<8x1x8xbf16>
      %c0_118 = arith.constant 0 : index
      %c0_119 = arith.constant 0 : index
      %c0_120 = arith.constant 0 : index
      %175 = vector.load %arg3[%c0_118, %c0_119, %c0_120] : memref<8x8x128xbf16, #tpu.memory_space<vmem>>, vector<8x8x128xbf16>
      "tpu.trace_start"() <{level = 10 : i32, message = "bql,blc->bqc"}> : () -> ()
      %cst_121 = arith.constant dense<0.000000e+00> : vector<8x1x128xf32>
      %176 = tpu.matmul %174, %175, %cst_121 {dimension_numbers = #tpu.dot_dimension_numbers<[2], [1], [1], [2], [0, 0, 0, 1, 1, 2], [0], [0]>} : vector<8x1x8xbf16>, vector<8x8x128xbf16>, vector<8x1x128xf32> -> vector<8x1x128xf32>
      "tpu.trace_stop"() : () -> ()
      %177 = vector.shape_cast %176 : vector<8x1x128xf32> to vector<8x128xf32>
      %c0_122 = arith.constant 0 : index
      %c0_123 = arith.constant 0 : index
      %178 = vector.load %arg24[%c0_122, %c0_123] : memref<8x128xf32, #tpu.memory_space<vmem>>, vector<8x128xf32>
      %179 = arith.truncf %178 : vector<8x128xf32> to vector<8x128xbf16>
      %c0_124 = arith.constant 0 : index
      %c0_125 = arith.constant 0 : index
      %180 = vector.load %arg11[%c0_124, %c0_125] : memref<128x512xbf16, #tpu.memory_space<vmem>>, vector<128x512xbf16>
      %cst_126 = arith.constant dense<0.000000e+00> : vector<8x512xf32>
      %181 = tpu.matmul %179, %180, %cst_126 {dimension_numbers = #tpu.dot_dimension_numbers<[1], [0], [0], [1], [0, 0, 1, 1], [], []>} : vector<8x128xbf16>, vector<128x512xbf16>, vector<8x512xf32> -> vector<8x512xf32>
      %182 = arith.truncf %177 : vector<8x128xf32> to vector<8x128xbf16>
      %c0_127 = arith.constant 0 : index
      %c0_128 = arith.constant 0 : index
      %183 = vector.load %arg12[%c0_127, %c0_128] : memref<128x512xbf16, #tpu.memory_space<vmem>>, vector<128x512xbf16>
      %cst_129 = arith.constant dense<0.000000e+00> : vector<8x512xf32>
      %184 = tpu.matmul %182, %183, %cst_129 {dimension_numbers = #tpu.dot_dimension_numbers<[1], [0], [0], [1], [0, 0, 1, 1], [], []>} : vector<8x128xbf16>, vector<128x512xbf16>, vector<8x512xf32> -> vector<8x512xf32>
      %185 = arith.addf %181, %184 : vector<8x512xf32>
      %c0_130 = arith.constant 0 : index
      %c0_131 = arith.constant 0 : index
      %186 = vector.load %arg13[%c0_130, %c0_131] : memref<128x512xbf16, #tpu.memory_space<vmem>>, vector<128x512xbf16>
      %cst_132 = arith.constant dense<0.000000e+00> : vector<8x512xf32>
      %187 = tpu.matmul %138, %186, %cst_132 {dimension_numbers = #tpu.dot_dimension_numbers<[1], [0], [0], [1], [0, 0, 1, 1], [], []>} : vector<8x128xbf16>, vector<128x512xbf16>, vector<8x512xf32> -> vector<8x512xf32>
      %188 = arith.addf %185, %187 : vector<8x512xf32>
      %c0_133 = arith.constant 0 : index
      %c0_134 = arith.constant 0 : index
      %189 = vector.load %arg14[%c0_133, %c0_134] : memref<1x512xf32, #tpu.memory_space<vmem>>, vector<1x512xf32>
      %190 = vector.broadcast %189 : vector<1x512xf32> to vector<8x512xf32>
      %191 = arith.addf %188, %190 : vector<8x512xf32>
      %192 = vector.extract_strided_slice %191 {offsets = [0, 0], sizes = [8, 128], strides = [1, 1]} : vector<8x512xf32> to vector<8x128xf32>
      %193 = arith.negf %192 : vector<8x128xf32>
      %194 = math.exp %193 : vector<8x128xf32>
      %cst_135 = arith.constant 1.000000e+00 : f32
      %195 = vector.broadcast %cst_135 : f32 to vector<8x128xf32>
      %196 = arith.addf %195, %194 : vector<8x128xf32>
      %197 = arith.divf %195, %196 : vector<8x128xf32>
      %198 = vector.extract_strided_slice %191 {offsets = [0, 128], sizes = [8, 128], strides = [1, 1]} : vector<8x512xf32> to vector<8x128xf32>
      %199 = arith.negf %198 : vector<8x128xf32>
      %200 = math.exp %199 : vector<8x128xf32>
      %cst_136 = arith.constant 1.000000e+00 : f32
      %201 = vector.broadcast %cst_136 : f32 to vector<8x128xf32>
      %202 = arith.addf %201, %200 : vector<8x128xf32>
      %203 = arith.divf %201, %202 : vector<8x128xf32>
      %204 = vector.extract_strided_slice %191 {offsets = [0, 256], sizes = [8, 128], strides = [1, 1]} : vector<8x512xf32> to vector<8x128xf32>
      %205 = math.tanh %204 : vector<8x128xf32>
      %206 = vector.extract_strided_slice %191 {offsets = [0, 384], sizes = [8, 128], strides = [1, 1]} : vector<8x512xf32> to vector<8x128xf32>
      %207 = arith.negf %206 : vector<8x128xf32>
      %208 = math.exp %207 : vector<8x128xf32>
      %cst_137 = arith.constant 1.000000e+00 : f32
      %209 = vector.broadcast %cst_137 : f32 to vector<8x128xf32>
      %210 = arith.addf %209, %208 : vector<8x128xf32>
      %211 = arith.divf %209, %210 : vector<8x128xf32>
      %212 = arith.mulf %203, %137 : vector<8x128xf32>
      %213 = arith.mulf %197, %205 : vector<8x128xf32>
      %214 = arith.addf %212, %213 : vector<8x128xf32>
      %215 = math.tanh %214 : vector<8x128xf32>
      %216 = arith.mulf %211, %215 : vector<8x128xf32>
      %c0_138 = arith.constant 0 : index
      %c0_139 = arith.constant 0 : index
      %217 = vector.load %arg19[%c0_138, %c0_139] : memref<8x128xf32, #tpu.memory_space<vmem>>, vector<8x128xf32>
      tpu.vector_store %arg19[%c0_138, %c0_139], %216 {strides = array<i32>} : memref<8x128xf32, #tpu.memory_space<vmem>>, vector<8x128xf32>,
      %c0_140 = arith.constant 0 : index
      %c0_141 = arith.constant 0 : index
      %218 = vector.load %arg20[%c0_140, %c0_141] : memref<8x128xf32, #tpu.memory_space<vmem>>, vector<8x128xf32>
      tpu.vector_store %arg20[%c0_140, %c0_141], %214 {strides = array<i32>} : memref<8x128xf32, #tpu.memory_space<vmem>>, vector<8x128xf32>,
      %c0_142 = arith.constant 0 : index
      %c0_143 = arith.constant 0 : index
      %219 = vector.load %arg21[%c0_142, %c0_143] : memref<8x8xf32, #tpu.memory_space<vmem>>, vector<8x8xf32>
      tpu.vector_store %arg21[%c0_142, %c0_143], %172 {strides = array<i32>} : memref<8x8xf32, #tpu.memory_space<vmem>>, vector<8x8xf32>,
      %220 = arith.truncf %177 : vector<8x128xf32> to vector<8x128xbf16>
      %c0_144 = arith.constant 0 : index
      %c0_145 = arith.constant 0 : index
      %221 = vector.load %arg25[%c0_144, %c0_145] : memref<8x128xbf16, #tpu.memory_space<vmem>>, vector<8x128xbf16>
      tpu.vector_store %arg25[%c0_144, %c0_145], %220 {strides = array<i32>} : memref<8x128xbf16, #tpu.memory_space<vmem>>, vector<8x128xbf16>,
      %222 = arith.truncf %216 : vector<8x128xf32> to vector<8x128xbf16>
      %c0_146 = arith.constant 0 : index
      %c0_147 = arith.constant 0 : index
      %223 = vector.load %arg26[%c0_146, %c0_147] : memref<8x128xbf16, #tpu.memory_space<vmem>>, vector<8x128xbf16>
      tpu.vector_store %arg26[%c0_146, %c0_147], %222 {strides = array<i32>} : memref<8x128xbf16, #tpu.memory_space<vmem>>, vector<8x128xbf16>,
      %cst_148 = arith.constant -1.000000e+30 : f32
      %224 = vector.broadcast %cst_148 : f32 to vector<8x1xf32>
      %c0_149 = arith.constant 0 : index
      %c0_150 = arith.constant 0 : index
      %225 = vector.load %arg27[%c0_149, %c0_150] : memref<8x1xf32, #tpu.memory_space<vmem>>, vector<8x1xf32>
      tpu.vector_store %arg27[%c0_149, %c0_150], %224 {strides = array<i32>} : memref<8x1xf32, #tpu.memory_space<vmem>>, vector<8x1xf32>,
      %cst_151 = arith.constant 0.000000e+00 : f32
      %226 = vector.broadcast %cst_151 : f32 to vector<8x1xf32>
      %c0_152 = arith.constant 0 : index
      %c0_153 = arith.constant 0 : index
      %227 = vector.load %arg28[%c0_152, %c0_153] : memref<8x1xf32, #tpu.memory_space<vmem>>, vector<8x1xf32>
      tpu.vector_store %arg28[%c0_152, %c0_153], %226 {strides = array<i32>} : memref<8x1xf32, #tpu.memory_space<vmem>>, vector<8x1xf32>,
    } else {
    }
    %c0 = arith.constant 0 : index
    %c0_1 = arith.constant 0 : index
    %3 = vector.load %arg24[%c0, %c0_1] : memref<8x128xf32, #tpu.memory_space<vmem>>, vector<8x128xf32>
    %4 = arith.truncf %3 : vector<8x128xf32> to vector<8x128xbf16>
    %c0_2 = arith.constant 0 : index
    %c0_3 = arith.constant 0 : index
    %5 = vector.load %arg15[%c0_2, %c0_3] : memref<128x128xbf16, #tpu.memory_space<vmem>>, vector<128x128xbf16>
    %cst = arith.constant dense<0.000000e+00> : vector<8x128xf32>
    %6 = tpu.matmul %4, %5, %cst {dimension_numbers = #tpu.dot_dimension_numbers<[1], [0], [0], [1], [0, 0, 1, 1], [], []>} : vector<8x128xbf16>, vector<128x128xbf16>, vector<8x128xf32> -> vector<8x128xf32>
    %c0_4 = arith.constant 0 : index
    %c0_5 = arith.constant 0 : index
    %7 = vector.load %arg25[%c0_4, %c0_5] : memref<8x128xbf16, #tpu.memory_space<vmem>>, vector<8x128xbf16>
    %c0_6 = arith.constant 0 : index
    %c0_7 = arith.constant 0 : index
    %8 = vector.load %arg16[%c0_6, %c0_7] : memref<128x128xbf16, #tpu.memory_space<vmem>>, vector<128x128xbf16>
    %cst_8 = arith.constant dense<0.000000e+00> : vector<8x128xf32>
    %9 = tpu.matmul %7, %8, %cst_8 {dimension_numbers = #tpu.dot_dimension_numbers<[1], [0], [0], [1], [0, 0, 1, 1], [], []>} : vector<8x128xbf16>, vector<128x128xbf16>, vector<8x128xf32> -> vector<8x128xf32>
    %10 = arith.addf %6, %9 : vector<8x128xf32>
    %c0_9 = arith.constant 0 : index
    %c0_10 = arith.constant 0 : index
    %11 = vector.load %arg26[%c0_9, %c0_10] : memref<8x128xbf16, #tpu.memory_space<vmem>>, vector<8x128xbf16>
    %c0_11 = arith.constant 0 : index
    %c0_12 = arith.constant 0 : index
    %12 = vector.load %arg17[%c0_11, %c0_12] : memref<128x128xbf16, #tpu.memory_space<vmem>>, vector<128x128xbf16>
    %cst_13 = arith.constant dense<0.000000e+00> : vector<8x128xf32>
    %13 = tpu.matmul %11, %12, %cst_13 {dimension_numbers = #tpu.dot_dimension_numbers<[1], [0], [0], [1], [0, 0, 1, 1], [], []>} : vector<8x128xbf16>, vector<128x128xbf16>, vector<8x128xf32> -> vector<8x128xf32>
    %14 = arith.addf %10, %13 : vector<8x128xf32>
    %c0_14 = arith.constant 0 : index
    %c0_15 = arith.constant 0 : index
    %15 = vector.load %arg18[%c0_14, %c0_15] : memref<1x128xf32, #tpu.memory_space<vmem>>, vector<1x128xf32>
    %16 = vector.broadcast %15 : vector<1x128xf32> to vector<8x128xf32>
    %17 = arith.addf %14, %16 : vector<8x128xf32>
    %c128_i32 = arith.constant 128 : i32
    %18 = arith.muli %arg1, %c128_i32 : i32
    %19 = tpu.iota {dimensions = array<i32: 1>} : vector<8x128xi32>
    %20 = vector.broadcast %18 : i32 to vector<8x128xi32>
    %21 = arith.addi %20, %19 : vector<8x128xi32>
    %c200_i32 = arith.constant 200 : i32
    %22 = vector.broadcast %c200_i32 : i32 to vector<8x128xi32>
    %23 = arith.cmpi slt, %21, %22 : vector<8x128xi32>
    %cst_16 = arith.constant -1.000000e+30 : f32
    %24 = vector.broadcast %cst_16 : f32 to vector<8x128xf32>
    %25 = arith.select %23, %17, %24 : vector<8x128xi1>, vector<8x128xf32>
    %c0_17 = arith.constant 0 : index
    %c0_18 = arith.constant 0 : index
    %26 = vector.load %arg22[%c0_17, %c0_18] : memref<8x128xf32, #tpu.memory_space<vmem>>, vector<8x128xf32>
    tpu.vector_store %arg22[%c0_17, %c0_18], %25 {strides = array<i32>} : memref<8x128xf32, #tpu.memory_space<vmem>>, vector<8x128xf32>,
    %cst_19 = arith.constant dense<0xFF800000> : vector<8xf32>
    %27 = vector.multi_reduction <maximumf>, %25, %cst_19 [1] : vector<8x128xf32> to vector<8xf32>
    %28 = vector.shape_cast %27 : vector<8xf32> to vector<8x1xf32>
    %c0_20 = arith.constant 0 : index
    %c0_21 = arith.constant 0 : index
    %29 = vector.load %arg27[%c0_20, %c0_21] : memref<8x1xf32, #tpu.memory_space<vmem>>, vector<8x1xf32>
    %30 = arith.maximumf %29, %28 : vector<8x1xf32>
    %c0_22 = arith.constant 0 : index
    %c0_23 = arith.constant 0 : index
    %31 = vector.load %arg28[%c0_22, %c0_23] : memref<8x1xf32, #tpu.memory_space<vmem>>, vector<8x1xf32>
    %c0_24 = arith.constant 0 : index
    %c0_25 = arith.constant 0 : index
    %32 = vector.load %arg27[%c0_24, %c0_25] : memref<8x1xf32, #tpu.memory_space<vmem>>, vector<8x1xf32>
    %33 = arith.subf %32, %30 : vector<8x1xf32>
    %34 = math.exp %33 : vector<8x1xf32>
    %35 = arith.mulf %31, %34 : vector<8x1xf32>
    %36 = vector.broadcast %30 : vector<8x1xf32> to vector<8x128xf32>
    %37 = arith.subf %25, %36 : vector<8x128xf32>
    %38 = math.exp %37 : vector<8x128xf32>
    %cst_26 = arith.constant dense<0.000000e+00> : vector<8xf32>
    %39 = vector.multi_reduction <add>, %38, %cst_26 [1] : vector<8x128xf32> to vector<8xf32>
    %40 = vector.shape_cast %39 : vector<8xf32> to vector<8x1xf32>
    %41 = arith.addf %35, %40 : vector<8x1xf32>
    %c0_27 = arith.constant 0 : index
    %c0_28 = arith.constant 0 : index
    %42 = vector.load %arg28[%c0_27, %c0_28] : memref<8x1xf32, #tpu.memory_space<vmem>>, vector<8x1xf32>
    tpu.vector_store %arg28[%c0_27, %c0_28], %41 {strides = array<i32>} : memref<8x1xf32, #tpu.memory_space<vmem>>, vector<8x1xf32>,
    %c0_29 = arith.constant 0 : index
    %c0_30 = arith.constant 0 : index
    %43 = vector.load %arg27[%c0_29, %c0_30] : memref<8x1xf32, #tpu.memory_space<vmem>>, vector<8x1xf32>
    tpu.vector_store %arg27[%c0_29, %c0_30], %30 {strides = array<i32>} : memref<8x1xf32, #tpu.memory_space<vmem>>, vector<8x1xf32>,
    %c1_i32 = arith.constant 1 : i32
    %44 = arith.cmpi eq, %arg1, %c1_i32 : i32
    %45 = arith.extui %44 : i1 to i32
    %c0_i32_31 = arith.constant 0 : i32
    %46 = arith.cmpi ne, %45, %c0_i32_31 : i32
    scf.if %46 {
      %c0_32 = arith.constant 0 : index
      %c0_33 = arith.constant 0 : index
      %47 = vector.load %arg27[%c0_32, %c0_33] : memref<8x1xf32, #tpu.memory_space<vmem>>, vector<8x1xf32>
      %c0_34 = arith.constant 0 : index
      %c0_35 = arith.constant 0 : index
      %48 = vector.load %arg28[%c0_34, %c0_35] : memref<8x1xf32, #tpu.memory_space<vmem>>, vector<8x1xf32>
      %49 = math.log %48 : vector<8x1xf32>
      %50 = arith.addf %47, %49 : vector<8x1xf32>
      %c0_36 = arith.constant 0 : index
      %c0_37 = arith.constant 0 : index
      %51 = vector.load %arg23[%c0_36, %c0_37] : memref<8x1xf32, #tpu.memory_space<vmem>>, vector<8x1xf32>
      tpu.vector_store %arg23[%c0_36, %c0_37], %50 {strides = array<i32>} : memref<8x1xf32, #tpu.memory_space<vmem>>, vector<8x1xf32>,
    } else {
    }
    return
  }
  func.func @transform_0(%arg0: i32, %arg1: i32, %arg2: memref<8xi32, #tpu.memory_space<smem>>) -> (i32, i32, i32) {
    %c0_i32 = arith.constant 0 : i32
    %c0_i32_0 = arith.constant 0 : i32
    %c0_i32_1 = arith.constant 0 : i32
    return %arg0, %c0_i32, %c0_i32_0 : i32, i32, i32
  }
  func.func @transform_1(%arg0: i32, %arg1: i32, %arg2: memref<8xi32, #tpu.memory_space<smem>>) -> (i32, i32, i32) {
    %c0_i32 = arith.constant 0 : i32
    %c0_i32_0 = arith.constant 0 : i32
    %c0_i32_1 = arith.constant 0 : i32
    return %arg0, %c0_i32, %c0_i32_0 : i32, i32, i32
  }
  func.func @transform_2(%arg0: i32, %arg1: i32, %arg2: memref<8xi32, #tpu.memory_space<smem>>) -> (i32, i32) {
    %c0_i32 = arith.constant 0 : i32
    %c0_i32_0 = arith.constant 0 : i32
    return %arg0, %c0_i32 : i32, i32
  }
  func.func @transform_3(%arg0: i32, %arg1: i32, %arg2: memref<8xi32, #tpu.memory_space<smem>>) -> (i32, i32) {
    %c0_i32 = arith.constant 0 : i32
    %c0_i32_0 = arith.constant 0 : i32
    return %arg0, %c0_i32 : i32, i32
  }
  func.func @transform_5(%arg0: i32, %arg1: i32, %arg2: memref<8xi32, #tpu.memory_space<smem>>) -> (i32, i32) {
    %c0_i32 = arith.constant 0 : i32
    %c0_i32_0 = arith.constant 0 : i32
    %c0_i32_1 = arith.constant 0 : i32
    return %c0_i32, %c0_i32_0 : i32, i32
  }
  func.func @transform_6(%arg0: i32, %arg1: i32, %arg2: memref<8xi32, #tpu.memory_space<smem>>) -> (i32, i32) {
    %c0_i32 = arith.constant 0 : i32
    %c0_i32_0 = arith.constant 0 : i32
    %c0_i32_1 = arith.constant 0 : i32
    return %c0_i32, %c0_i32_0 : i32, i32
  }
  func.func @transform_7(%arg0: i32, %arg1: i32, %arg2: memref<8xi32, #tpu.memory_space<smem>>) -> (i32, i32) {
    %c0_i32 = arith.constant 0 : i32
    %c0_i32_0 = arith.constant 0 : i32
    %c0_i32_1 = arith.constant 0 : i32
    return %c0_i32, %c0_i32_0 : i32, i32
  }
  func.func @transform_8(%arg0: i32, %arg1: i32, %arg2: memref<8xi32, #tpu.memory_space<smem>>) -> (i32, i32) {
    %c0_i32 = arith.constant 0 : i32
    %c0_i32_0 = arith.constant 0 : i32
    %c0_i32_1 = arith.constant 0 : i32
    return %c0_i32, %c0_i32_0 : i32, i32
  }
  func.func @transform_9(%arg0: i32, %arg1: i32, %arg2: memref<8xi32, #tpu.memory_space<smem>>) -> (i32, i32) {
    %c0_i32 = arith.constant 0 : i32
    %c0_i32_0 = arith.constant 0 : i32
    %c0_i32_1 = arith.constant 0 : i32
    return %c0_i32, %c0_i32_0 : i32, i32
  }
  func.func @transform_10(%arg0: i32, %arg1: i32, %arg2: memref<8xi32, #tpu.memory_space<smem>>) -> (i32, i32) {
    %c0_i32 = arith.constant 0 : i32
    %c0_i32_0 = arith.constant 0 : i32
    %c0_i32_1 = arith.constant 0 : i32
    return %c0_i32, %c0_i32_0 : i32, i32
  }
  func.func @transform_11(%arg0: i32, %arg1: i32, %arg2: memref<8xi32, #tpu.memory_space<smem>>) -> (i32, i32) {
    %c0_i32 = arith.constant 0 : i32
    %c0_i32_0 = arith.constant 0 : i32
    %c0_i32_1 = arith.constant 0 : i32
    return %c0_i32, %c0_i32_0 : i32, i32
  }
  func.func @transform_12(%arg0: i32, %arg1: i32, %arg2: memref<8xi32, #tpu.memory_space<smem>>) -> (i32, i32) {
    %c0_i32 = arith.constant 0 : i32
    %c0_i32_0 = arith.constant 0 : i32
    return %c0_i32, %arg1 : i32, i32
  }
  func.func @transform_13(%arg0: i32, %arg1: i32, %arg2: memref<8xi32, #tpu.memory_space<smem>>) -> (i32, i32) {
    %c0_i32 = arith.constant 0 : i32
    %c0_i32_0 = arith.constant 0 : i32
    return %c0_i32, %arg1 : i32, i32
  }
  func.func @transform_14(%arg0: i32, %arg1: i32, %arg2: memref<8xi32, #tpu.memory_space<smem>>) -> (i32, i32) {
    %c0_i32 = arith.constant 0 : i32
    %c0_i32_0 = arith.constant 0 : i32
    return %c0_i32, %arg1 : i32, i32
  }
  func.func @transform_15(%arg0: i32, %arg1: i32, %arg2: memref<8xi32, #tpu.memory_space<smem>>) -> (i32, i32) {
    %c0_i32 = arith.constant 0 : i32
    %c0_i32_0 = arith.constant 0 : i32
    return %c0_i32, %arg1 : i32, i32
  }
  func.func @transform_16(%arg0: i32, %arg1: i32, %arg2: memref<8xi32, #tpu.memory_space<smem>>) -> (i32, i32) {
    %c0_i32 = arith.constant 0 : i32
    %c0_i32_0 = arith.constant 0 : i32
    return %arg0, %c0_i32 : i32, i32
  }
  func.func @transform_17(%arg0: i32, %arg1: i32, %arg2: memref<8xi32, #tpu.memory_space<smem>>) -> (i32, i32) {
    %c0_i32 = arith.constant 0 : i32
    %c0_i32_0 = arith.constant 0 : i32
    return %arg0, %c0_i32 : i32, i32
  }
  func.func @transform_18(%arg0: i32, %arg1: i32, %arg2: memref<8xi32, #tpu.memory_space<smem>>) -> (i32, i32) {
    %c0_i32 = arith.constant 0 : i32
    %c0_i32_0 = arith.constant 0 : i32
    return %arg0, %c0_i32 : i32, i32
  }
  func.func @transform_19(%arg0: i32, %arg1: i32, %arg2: memref<8xi32, #tpu.memory_space<smem>>) -> (i32, i32) {
    %c0_i32 = arith.constant 0 : i32
    return %arg0, %arg1 : i32, i32
  }
  func.func @transform_20(%arg0: i32, %arg1: i32, %arg2: memref<8xi32, #tpu.memory_space<smem>>) -> (i32, i32) {
    %c0_i32 = arith.constant 0 : i32
    %c0_i32_0 = arith.constant 0 : i32
    return %arg0, %c0_i32 : i32, i32
  }
}

</mosaic_0001>

<bundles_post_ra>
// kernel: tpu_custom_call.1
= control target key start
LH: loop header
LB: loop body
LE: loop exit
PB: predicated region body
PF: predicated region fallthrough
CT: control target
= control target key end

     0   :  { %s6123_s0 = inlined_call_operand.hbm [shape: s32[8], index: 0, kind: input, shape index: {}]   ;;  %s6124_s1 = inlined_call_operand.hbm [shape: bf16[8,8,128], index: 1, kind: input, shape index: {}]   ;;  %s6125_s2 = inlined_call_operand.hbm [shape: f32[8,8,128], index: 2, kind: input, shape index: {}]   ;;  %s6126_s3 = inlined_call_operand.vmem [shape: f32[8,128], index: 3, kind: input, shape index: {}]   ;;  %s6127_s4 = inlined_call_operand.hbm [shape: f32[8,128], index: 4, kind: input, shape index: {}]   ;;  %s6128_s5 = inlined_call_operand.hbm [shape: f32[200,128], index: 5, kind: input, shape index: {}]   ;;  %s6129_s6 = inlined_call_operand.hbm [shape: bf16[128,128], index: 6, kind: input, shape index: {}]   ;;  %s6130_s7 = inlined_call_operand.vmem [shape: f32[1,128], index: 7, kind: input, shape index: {}]   ;;  %s6131_s8 = inlined_call_operand.vmem [shape: f32[1,128], index: 8, kind: input, shape index: {}]   ;;  %s6132_s9 = inlined_call_operand.hbm [shape: bf16[128,512], index: 9, kind: input, shape index: {}]   ;;  %s6133_s10 = inlined_call_operand.hbm [shape: bf16[128,512], index: 10, kind: input, shape index: {}]   ;;  %s6134_s11 = inlined_call_operand.hbm [shape: bf16[128,512], index: 11, kind: input, shape index: {}]   ;;  %s6135_s12 = inlined_call_operand.vmem [shape: f32[1,512], index: 12, kind: input, shape index: {}]   ;;  %s6136_s13 = inlined_call_operand.hbm [shape: bf16[128,256], index: 13, kind: input, shape index: {}]   ;;  %s6137_s14 = inlined_call_operand.hbm [shape: bf16[128,256], index: 14, kind: input, shape index: {}]   ;;  %s6138_s15 = inlined_call_operand.hbm [shape: bf16[128,256], index: 15, kind: input, shape index: {}]   ;;  %s6139_s16 = inlined_call_operand.vmem [shape: f32[1,256], index: 16, kind: input, shape index: {}]   ;;  %s6140_s17 = inlined_call_operand.hbm [shape: f32[8,128], index: 17, kind: output, shape index: {0}]   ;;  %s6141_s18 = inlined_call_operand.hbm [shape: f32[8,128], index: 18, kind: output, shape index: {1}]   ;;  %s6142_s19 = inlined_call_operand.hbm [shape: f32[8,8], index: 19, kind: output, shape index: {2}]   ;;  %s6143_s20 = inlined_call_operand.hbm [shape: f32[8,256], index: 20, kind: output, shape index: {3}]   ;;  %s6144_s21 = inlined_call_operand.vmem [shape: f32[8,1], index: 21, kind: output, shape index: {4}]  }
   0x1   :  { %6193 = sst [smem:[#allocation79_spill]] %s6123_s0 }
   0x2   :  { %6194 = sst [smem:[#allocation80_spill]] %s6124_s1  ;;  %s6213_s26 = sld [smem:[#allocation79_spill]] }
   0x3   :  { %6195 = sst [smem:[#allocation81_spill]] %s6125_s2 }
   0x4   :  { %6196 = sst [smem:[#allocation82_spill]] %s6126_s3 }
   0x5   :  { %6197 = sst [smem:[#allocation83_spill]] %s6127_s4 }
   0x6   :  { %6198 = sst [smem:[#allocation84_spill]] %s6128_s5 }
   0x7   :  { %6199 = sst [smem:[#allocation85_spill]] %s6129_s6 }
   0x8   :  { %6200 = sst [smem:[#allocation86_spill]] %s6130_s7 }
   0x9   :  { %6201 = sst [smem:[#allocation87_spill]] %s6131_s8 }
   0xa   :  { %6202 = sst [smem:[#allocation88_spill]] %s6132_s9 }
   0xb   :  { %6203 = sst [smem:[#allocation89_spill]] %s6133_s10 }
   0xc   :  { %6204 = sst [smem:[#allocation90_spill]] %s6134_s11 }
   0xd   :  { %6205 = sst [smem:[#allocation91_spill]] %s6135_s12  ;;  %s4386_s12 = scalar_lea.hbm %s6213_s26, 16 }
   0xe   :  { %6206 = sst [smem:[#allocation92_spill]] %s6136_s13  ;;  %p4387_p0 = scmp.ne.s32.totalorder %s6213_s26, %s4386_s12 }
   0xf   :  { %6207 = sst [smem:[#allocation93_spill]] %s6139_s16  ;;  %p4390_p1 = scmp.lt.u32.totalorder %s4386_s12, %s6213_s26 }
  0x10   :  { %6208 = sst [smem:[#allocation94_spill]] %s6140_s17 }
  0x11   :  { %6209 = sst [smem:[#allocation95_spill]] %s6141_s18  ;;  %p4392_p2 = pnand %p4390_p1, %p4387_p0 }
  0x12   :  { %6210 = sst [smem:[#allocation96_spill]] %s6142_s19 }
  0x13   :  { %6211 = sst [smem:[#allocation97_spill]] %s6143_s20 }
  0x14   :  { %6212 = sst [smem:[#allocation98_spill]] %s6144_s21 }
  0x15   :  { %4395 = shalt.err (!%p4392_p2)  }
  0x16   :  { %s5082_s0 = smov [#allocation9]  }
  0x17   :  { %28 = dma.hbm_to_smem %s6213_s26, 16, %s5082_s0, [#allocation8] }
  0x18   :  { %5004 = dma.done.wait [#allocation8], 16 }
  0x19   :  { %5005 = vsyncadd [#allocation8], 4294967280 }
  0x1a   :  { %30 = sfence }
  0x1b   :  { %31 = vsyncpa [#allocation11], 0 }
  0x1c   :  { %32 = vsyncpa [#allocation14], 0 }
  0x1d   :  { %33 = vsyncpa [#allocation17], 0 }
  0x1e   :  { %34 = vsyncpa [#allocation20], 0 }
  0x1f   :  { %35 = vsyncpa [#allocation23], 0 }
  0x20   :  { %37 = vsyncpa [#allocation23 + $0x1], 0 }
  0x21   :  { %38 = vsyncpa [#allocation26], 0 }
  0x22   :  { %40 = vsyncpa [#allocation26 + $0x1], 0 }
  0x23   :  { %41 = vsyncpa [#allocation12], 0 }
  0x24   :  { %42 = vsyncpa [#allocation29], 0 }
  0x25   :  { %43 = vsyncpa [#allocation32], 0 }
  0x26   :  { %45 = vsyncpa [#allocation32 + $0x1], 0  ;;  %s5241_s12 = smov 0   ;;  %s5243_s5 = smov 0  }
  0x27   :  { %s5245_s22 = smov 0   ;;  %s5247_s23 = smov 0  }
  0x28   :  { %s5249_s1 = smov 0   ;;  %s5251_s24 = smov 0  }
  0x29 LB: > { %6214 = sst [smem:[#allocation69_spill]] %s5060_s12  ;;  %s5083_s2 = smov [#allocation13]   ;;  %s5080_s24 = sphi %s5251_s24, %s51_s24   ;;  %s5076_s1 = sphi %s5249_s1, %s6305_s1   ;;  %s5072_s23 = sphi %s5247_s23, %s6304_s23   ;;  %s5068_s22 = sphi %s5245_s22, %s6307_s22   ;;  %s5064_s5 = sphi %s5243_s5, %s6306_s5   ;;  %s5060_s12 = sphi %s5241_s12, %s6302_s12  }
  0x2a   : > { %6215 = sst [smem:[#allocation70_spill]] %s5064_s5  ;;  %s586_s25 = sshll.u32 %s5083_s2, 4  ;;  %s5277_s25 = int_to_ptr.vmem [resolvable:$true] %s586_s25 }
  0x2b   : > { %6216 = sst [smem:[#allocation71_spill]] %s5072_s23  ;;  %s5272_s26 = sadd.s32 4294967295, %s5080_s24  }
  0x2c   : > { %6217 = sst [smem:[#allocation72_spill]] %s5076_s1  ;;  %p3573_p3 = scmp.ge.s32.totalorder %s5080_s24, 1 }
  0x2d   : > { %6218 = sst [smem:[#allocation73_spill]] %s5080_s24  ;;  %p6157_p4 = scmp.eq.s32.totalorder %s5272_s26, 0 }
  0x2e   : > { %p555_p5 = scmp.lt.s32.totalorder %s5080_s24, 3  ;;  %s5084_s28 = smov [#allocation16]  }
  0x2f   : > { %s619_s29 = sshll.u32 %s5084_s28, 4  ;;  %s6221_s30 = sld [smem:[#allocation81_spill]]  ;;  %s5292_s29 = int_to_ptr.vmem [resolvable:$true] %s619_s29 }
  0x30   : > { %p5279_p6 = pnand %p3573_p3, %p555_p5 }
  0x32   : > { %s6219_s27 = scalar_select %p5279_p6, 1, 0 }
  0x33   : > { %p4028_p8 = pneg %p5279_p6 }
  0x35   : > { %p5288_p9 = pnand %p4028_p8, %p6157_p4  ;;  %s4396_s2 = scalar_lea.hbm %s6221_s30, 1024 }
  0x36   : > { %p4397_p10 = scmp.ne.s32.totalorder %s6221_s30, %s4396_s2  ;;  %p4403_p0 = scmp.lt.u32.totalorder %s4396_s2, %s6221_s30 }
  0x37   : > { %s6220_s3 = scalar_select %p5288_p9, 1, 0 }
  0x38   : > { %p5302_p11 = pneg %p5288_p9 }
  0x3a   : > { %s6222_s17 = scalar_select %p5302_p11, 1, 0 }
  0x3b   : > { %p4399_p12 = pnand %p5302_p11, %p4397_p10 }
  0x3d   : > { %p4400_p13 = pneg %p4399_p12 }
  0x3f   : > { %p4405_p1 = pnand %p4403_p0, %p4400_p13 }
  0x41   : > { %4408 = shalt.err (!%p4405_p1)
}
  0x42   : > { %s4409_s19 = scalar_lea.vmem %s5277_s25, 1024  ;;  %p4417_p8 = scmp.lt.s32.totalorder %s5277_s25, %s5277_s25 }
  0x43   : > { %p4410_p2 = scmp.ne.s32.totalorder %s5277_s25, %s4409_s19  ;;  %p4418_p7 = scmp.lt.s32.totalorder %s4409_s19, %s4409_s19 }
  0x45   : > { %p4412_p3 = pnand %p4410_p2, %p5302_p11  ;;  %p4419_p10 = por %p4418_p7, %p4417_p8 }
  0x47   : > { %p4413_p5 = pneg %p4412_p3 }
  0x49   : > { %p4420_p12 = pnand %p4419_p10, %p4413_p5 }
  0x4b   : > { %4423 = shalt.err (!%p4420_p12)
}
  0x4c   : > { %s6154_s20 = smov 128   ;;  %s5086_s18 = smov 8  }
  0x4d   : > { %4034 = dma.hbm_to_vmem [thread:$0]  (!%p5288_p9), %s6221_s30, 1024, %s5277_s25, [#allocation14], %s6154_s20, %s6154_s20, %s5086_s18  }
  0x4e   : > { %s6223_s6 = sld [smem:[#allocation85_spill]] }
  0x54   : > { %s4424_s21 = scalar_lea.hbm %s6223_s6, 1024 }
  0x55   : > { %p4425_p7 = scmp.ne.s32.totalorder %s6223_s6, %s4424_s21  ;;  %p4431_p1 = scmp.lt.u32.totalorder %s4424_s21, %s6223_s6 }
  0x57   : > { %p4427_p13 = pnand %p4425_p7, %p5302_p11 }
  0x59   : > { %p4428_p0 = pneg %p4427_p13 }
  0x5b   : > { %p4433_p2 = pnand %p4431_p1, %p4428_p0 }
  0x5d   : > { %4436 = shalt.err (!%p4433_p2)
}
  0x5e   : > { %s4437_s25 = scalar_lea.vmem %s5292_s29, 1024  ;;  %p4445_p10 = scmp.lt.s32.totalorder %s5292_s29, %s5292_s29 }
  0x5f   : > { %p4438_p3 = scmp.ne.s32.totalorder %s5292_s29, %s4437_s25  ;;  %p4446_p12 = scmp.lt.s32.totalorder %s4437_s25, %s4437_s25 }
  0x61   : > { %p4440_p5 = pnand %p4438_p3, %p5302_p11  ;;  %p4447_p7 = por %p4446_p12, %p4445_p10 }
  0x63   : > { %p4441_p8 = pneg %p4440_p5 }
  0x65   : > { %p4448_p13 = pnand %p4447_p7, %p4441_p8 }
  0x67   : > { %4451 = shalt.err (!%p4448_p13)
}
  0x68   : > { %s6163_s8 = smov 64   ;;  %s6165_s7 = smov 4  }
  0x69   : > { %4040 = dma.hbm_to_vmem [thread:$0]  (!%p5288_p9), %s6223_s6, 1024, %s5292_s29, [#allocation17], %s6163_s8, %s6163_s8, %s6165_s7  }
  0x6a   : > { %s5089_s18 = smov [#allocation19]   ;;  %s6224_s10 = sld [smem:[#allocation89_spill]] }
  0x6b   : > { %s651_s0 = sshll.u32 %s5089_s18, 4  ;;  %s652_s0 = int_to_ptr.vmem [resolvable:$true] %s651_s0 }
  0x70   : > { %s4452_s28 = scalar_lea.hbm %s6224_s10, 4096 }
  0x71   : > { %p4453_p0 = scmp.ne.s32.totalorder %s6224_s10, %s4452_s28  ;;  %p4459_p3 = scmp.lt.u32.totalorder %s4452_s28, %s6224_s10 }
  0x73   : > { %p4455_p1 = pnand %p4453_p0, %p5302_p11 }
  0x75   : > { %p4456_p2 = pneg %p4455_p1 }
  0x77   : > { %p4461_p5 = pnand %p4459_p3, %p4456_p2 }
  0x79   : > { %4464 = shalt.err (!%p4461_p5)
}
  0x7a   : > { %s4465_s29 = scalar_lea.vmem %s652_s0, 4096  ;;  %p4473_p7 = scmp.lt.s32.totalorder %s652_s0, %s652_s0 }
  0x7b   : > { %p4466_p8 = scmp.ne.s32.totalorder %s652_s0, %s4465_s29  ;;  %p4474_p13 = scmp.lt.s32.totalorder %s4465_s29, %s4465_s29 }
  0x7d   : > { %p4468_p10 = pnand %p4466_p8, %p5302_p11  ;;  %p4475_p4 = por %p4474_p13, %p4473_p7 }
  0x7f   : > { %p4469_p12 = pneg %p4468_p10 }
  0x81   : > { %p4476_p6 = pnand %p4475_p4, %p4469_p12 }
  0x83   : > { %4479 = shalt.err (!%p4476_p6)
}
  0x84   : > { %s6159_s16 = smov 256   ;;  %s6161_s30 = smov 16  }
  0x85   : > { %4046 = dma.hbm_to_vmem [thread:$0]  (!%p5288_p9), %s6224_s10, 4096, %s652_s0, [#allocation20], %s6159_s16, %s6159_s16, %s6161_s30  }
  0x86   : > { %s3572_s18 = sadd.s32 4294967294, %s5080_s24   ;;  %s60_s4 = sadd.s32 1, %s5076_s1 }
  0x87   : > { %s321_s2 = sadd.s32 1, %s5068_s22  ;;  %p61_p4 = scmp.ge.s32.totalorder %s60_s4, 2 }
  0x88   : > { %p328_p6 = scmp.ne.s32.totalorder %s5068_s22, %s5064_s5  ;;  %p329_p0 = scmp.eq.s32.totalorder %s5080_s24, 0 }
  0x89   : > { %p334_p1 = scmp.ne.s32.totalorder %s5064_s5, %s5060_s12  ;;  %s6309_s4 = smov (%p61_p4, %s60_s4), 0 }
  0x8a   : > { %6225 = sst [smem:[#allocation74_spill]] %s6309_s4  ;;  %p5382_p2 = por %p329_p0, %p328_p6 }
  0x8b   : > { %p6227_p3 = scmp.eq.s32.totalorder %s5272_s26, 0  ;;  %s318_s19 = ssub.s32 %s5076_s1, %s6309_s4 }
  0x8c   : > { %p6170_p8 = scmp.eq.s32.totalorder %s5272_s26, 1  ;;  %p319_p10 = scmp.eq.s32.totalorder %s318_s19, 0 }
  0x8d   : > { %p5388_p5 = por %p6227_p3, %p334_p1  ;;  %p522_p12 = scmp.eq.s32.totalorder %s3572_s18, 1 }
  0x8e   : > { %p5397_p7 = por %p6170_p8, %p328_p6  ;;  %p4071_p13 = scmp.lt.s32.totalorder %s5080_s24, 2 }
  0x8f   : > { %s6228_s0 = scalar_select %p5388_p5, 1, 0 }
  0x90   : > { %s6230_s25 = scalar_select %p5397_p7, 1, 0 }
  0x91   : > { %6229 = sst [smem:[#allocation75_spill]] %s6228_s0  ;;  %p5405_p4 = por %p522_p12, %p334_p1 }
  0x92   : > { %6231 = sst [smem:[#allocation76_spill]] %s6230_s25  ;;  %s681_s21 = sand.u32 1, %s5080_s24  }
  0x93   : > { %s5403_s29 = scalar_select %p319_p10, %s5068_s22, %s321_s2  }
  0x94   : > { %s6233_s20 = scalar_select %p5405_p4, 1, 0 }
  0x95   : > { %6232 = sst [smem:[#allocation77_spill]] %s5403_s29  ;;  %s6167_s16 = sand.u32 1, %s5068_s22  }
  0x96   : > { %6234 = sst [smem:[#allocation78_spill]] %s6233_s20  ;;  %s5413_s30 = sshll.u32 %s6167_s16, 6 }
  0x97   : > { %s5416_s19 = sshll.u32 %s5076_s1, 6  ;;  %s6235_s13 = sld [smem:[#allocation92_spill]] }
  0x98   : > { %s685_s2 = scalar_lea.vmem [#allocation22], %s5413_s30  ;;  %p5427_p6 = pnand %p4071_p13, %p5382_p2 }
  0x99   : > { %s691_s6 = sshll.u32 %s685_s2, 4  ;;  %s5433_s16 = scalar_lea.sflag [#allocation23], %s681_s21  ;;  %s5431_s6 = int_to_ptr.vmem [resolvable:$true] %s691_s6 }
  0x9a   : > { %s6236_s10 = scalar_select %p5427_p6, 1, 0 }
  0x9b   : > { %p5439_p1 = pneg %p5427_p6 }
  0x9d   : > { %s5422_s7 = scalar_lea.hbm %s6235_s13, %s5416_s19  ;;  %s4485_s2 = scalar_lea.hbm %s6235_s13, 2048 }
  0x9e   : > { %s4480_s4 = scalar_lea.hbm %s5422_s7, 1024  ;;  %p4486_p2 = scmp.lt.u32.totalorder %s5422_s7, %s6235_s13 }
  0x9f   : > { %p4481_p0 = scmp.ne.s32.totalorder %s5422_s7, %s4480_s4  ;;  %p4487_p12 = scmp.lt.u32.totalorder %s4485_s2, %s4480_s4 }
  0xa0   : > { %s6237_s8 = scalar_select %p5439_p1, 1, 0 }
  0xa1   : > { %p4483_p3 = pnand %p5439_p1, %p4481_p0  ;;  %p4488_p13 = por %p4487_p12, %p4486_p2 }
  0xa2   : > { %p4489_p8 = scmp.lt.u32.totalorder %s4480_s4, %s5422_s7 }
  0xa3   : > { %p4484_p10 = pneg %p4483_p3 }
  0xa4   : > { %p4490_p4 = por %p4489_p8, %p4488_p13 }
  0xa6   : > { %p4491_p7 = pnand %p4490_p4, %p4484_p10 }
  0xa8   : > { %4494 = shalt.err (!%p4491_p7)
}
  0xa9   : > { %s4495_s21 = scalar_lea.vmem %s5431_s6, 1024  ;;  %s5092_s28 = smov [#allocation22]  }
  0xaa   : > { %p4496_p0 = scmp.ne.s32.totalorder %s5431_s6, %s4495_s21  ;;  %s4500_s18 = sshll.u32 %s5092_s28, 4  ;;  %s4501_s18 = int_to_ptr.vmem [resolvable:$false] %s4500_s18 }
  0xab   : > { %s4502_s1 = scalar_lea.vmem %s4501_s18, 2048  ;;  %p4503_p9 = scmp.lt.s32.totalorder %s5431_s6, %s4501_s18 }
  0xac   : > { %p4498_p3 = pnand %p4496_p0, %p5439_p1  ;;  %p4504_p11 = scmp.lt.s32.totalorder %s4502_s1, %s4495_s21 }
  0xae   : > { %p4499_p5 = pneg %p4498_p3  ;;  %p4505_p2 = por %p4504_p11, %p4503_p9 }
  0xb0   : > { %p4506_p12 = pnand %p4505_p2, %p4499_p5 }
  0xb2   : > { %4509 = shalt.err (!%p4506_p12)
}
  0xb3   : > { %s6238_s4 = smov 4   ;;  %s6239_s29 = smov 64  }
  0xb4   : > { %s6240_s2 = smov 128   ;;  %s5093_s13 = smov [#allocation10]  }
  0xb5   : > { %4053 = dma.hbm_to_vmem [thread:$0]  (!%p5427_p6), %s5422_s7, 1024, %s5431_s6, %s5433_s16, %s6240_s2, %s6239_s29, %s6238_s4  }
  0xb6   : > { %s570_s24 = sshll.u32 %s5093_s13, 4  ;;  %s5094_s28 = smov [#allocation15]   ;;  %s571_s24 = int_to_ptr.vmem [resolvable:$true] %s570_s24 }
  0xb7   : > { %s609_s20 = sshll.u32 %s5094_s28, 4  ;;  %s6241_s1 = sld [smem:[#allocation80_spill]]  ;;  %s5466_s20 = int_to_ptr.vmem [resolvable:$true] %s609_s20 }
  0xb8   : > { %p6243_p11 = scmp.ne.s32.totalorder %s6222_s17, 0 }
  0xbd   : > { %s6242_s25 = smov %s6241_s1  ;;  %s4510_s12 = scalar_lea.hbm %s6241_s1, 512 }
  0xbe   : > { %p4511_p9 = scmp.ne.s32.totalorder %s6242_s25, %s4510_s12  ;;  %p4517_p7 = scmp.lt.u32.totalorder %s4510_s12, %s6242_s25 }
  0xc0   : > { %p4513_p5 = pnand %p4511_p9, %p6243_p11 }
  0xc2   : > { %p4514_p8 = pneg %p4513_p5 }
  0xc4   : > { %p4519_p4 = pnand %p4517_p7, %p4514_p8 }
  0xc6   : > { %4522 = shalt.err (!%p4519_p4)
}
  0xc7   : > { %s4523_s13 = scalar_lea.vmem %s571_s24, 512  ;;  %p4531_p3 = scmp.lt.s32.totalorder %s571_s24, %s571_s24 }
  0xc8   : > { %p4524_p10 = scmp.ne.s32.totalorder %s571_s24, %s4523_s13  ;;  %p4532_p2 = scmp.lt.s32.totalorder %s4523_s13, %s4523_s13 }
  0xca   : > { %p4526_p13 = pnand %p4524_p10, %p6243_p11  ;;  %p4533_p12 = por %p4532_p2, %p4531_p3 }
  0xcc   : > { %p4527_p0 = pneg %p4526_p13 }
  0xce   : > { %p4534_p6 = pnand %p4533_p12, %p4527_p0 }
  0xd0   : > { %4537 = shalt.err (!%p4534_p6)
}
  0xd1   : > { %p6244_p9 = scmp.ne.s32.totalorder %s6220_s3, 0  ;;  %s6245_s0 = sld [smem:[#allocation83_spill]] }
  0xd3   : > { %4031 = dma.hbm_to_vmem [thread:$0]  (!%p6244_p9), %s6242_s25, 512, %s571_s24, [#allocation11], %s6239_s29, %s6239_s29, %s6238_s4  }
  0xd7   : > { %s4538_s28 = scalar_lea.hbm %s6245_s0, 128 }
  0xd8   : > { %p4539_p5 = scmp.ne.s32.totalorder %s6245_s0, %s4538_s28  ;;  %p4545_p7 = scmp.lt.u32.totalorder %s4538_s28, %s6245_s0 }
  0xda   : > { %p4541_p6 = pnand %p4539_p5, %p6243_p11 }
  0xdc   : > { %p4542_p8 = pneg %p4541_p6 }
  0xde   : > { %p4547_p4 = pnand %p4545_p7, %p4542_p8 }
  0xe0   : > { %4550 = shalt.err (!%p4547_p4)
}
  0xe1   : > { %s4551_s24 = scalar_lea.vmem %s5466_s20, 128  ;;  %p4559_p3 = scmp.lt.s32.totalorder %s5466_s20, %s5466_s20 }
  0xe2   : > { %p4552_p10 = scmp.ne.s32.totalorder %s5466_s20, %s4551_s24  ;;  %p4560_p2 = scmp.lt.s32.totalorder %s4551_s24, %s4551_s24 }
  0xe4   : > { %p4554_p13 = pnand %p4552_p10, %p6243_p11  ;;  %p4561_p12 = por %p4560_p2, %p4559_p3 }
  0xe6   : > { %p4555_p0 = pneg %p4554_p13 }
  0xe8   : > { %p4562_p5 = pnand %p4561_p12, %p4555_p0 }
  0xea   : > { %4565 = shalt.err (!%p4562_p5)
}
  0xeb   : > { %4037 = dma.hbm_to_vmem [thread:$0]  (!%p6244_p9), %s6245_s0, 128, %s5466_s20, [#allocation14]  }
  0xec   : > { %s5095_s12 = smov [#allocation18]   ;;  %s5096_s7 = smov [#allocation21]  }
  0xed   : > { %s638_s23 = sshll.u32 %s5095_s12, 4  ;;  %s664_s28 = sshll.u32 %s5096_s7, 4  ;;  %s639_s23 = int_to_ptr.vmem [resolvable:$true] %s638_s23  ;;  %s5512_s28 = int_to_ptr.vmem [resolvable:$true] %s664_s28 }
  0xee   : > { %s6246_s9 = sld [smem:[#allocation88_spill]] }
  0xf4   : > { %s4566_s1 = scalar_lea.hbm %s6246_s9, 4096 }
  0xf5   : > { %p4567_p6 = scmp.ne.s32.totalorder %s6246_s9, %s4566_s1  ;;  %p4573_p4 = scmp.lt.u32.totalorder %s4566_s1, %s6246_s9 }
  0xf7   : > { %p4569_p8 = pnand %p4567_p6, %p6243_p11 }
  0xf9   : > { %p4570_p7 = pneg %p4569_p8 }
  0xfb   : > { %p4575_p10 = pnand %p4573_p4, %p4570_p7 }
  0xfd   : > { %4578 = shalt.err (!%p4575_p10)
}
  0xfe   : > { %s4579_s5 = scalar_lea.vmem %s639_s23, 4096  ;;  %p4587_p2 = scmp.lt.s32.totalorder %s639_s23, %s639_s23 }
  0xff   : > { %p4580_p13 = scmp.ne.s32.totalorder %s639_s23, %s4579_s5  ;;  %p4588_p12 = scmp.lt.s32.totalorder %s4579_s5, %s4579_s5 }
 0x101   : > { %p4582_p0 = pnand %p4580_p13, %p6243_p11  ;;  %p4589_p5 = por %p4588_p12, %p4587_p2 }
 0x103   : > { %p4583_p3 = pneg %p4582_p0 }
 0x105   : > { %p4590_p1 = pnand %p4589_p5, %p4583_p3 }
 0x107   : > { %4593 = shalt.err (!%p4590_p1)
}
 0x108   : > { %s6247_s12 = smov 16   ;;  %s6248_s7 = smov 256  }
 0x109   : > { %4043 = dma.hbm_to_vmem [thread:$0]  (!%p6244_p9), %s6246_s9, 4096, %s639_s23, [#allocation17], %s6248_s7, %s6248_s7, %s6247_s12  }
 0x10a   : > { %s6249_s11 = sld [smem:[#allocation90_spill]] }
 0x110   : > { %s4594_s24 = scalar_lea.hbm %s6249_s11, 4096 }
 0x111   : > { %p4595_p6 = scmp.ne.s32.totalorder %s6249_s11, %s4594_s24  ;;  %p4601_p7 = scmp.lt.u32.totalorder %s4594_s24, %s6249_s11 }
 0x113   : > { %p4597_p1 = pnand %p4595_p6, %p6243_p11 }
 0x115   : > { %p4598_p8 = pneg %p4597_p1 }
 0x117   : > { %p4603_p4 = pnand %p4601_p7, %p4598_p8 }
 0x119   : > { %4606 = shalt.err (!%p4603_p4)
}
 0x11a   : > { %s4607_s23 = scalar_lea.vmem %s5512_s28, 4096  ;;  %p4615_p3 = scmp.lt.s32.totalorder %s5512_s28, %s5512_s28 }
 0x11b   : > { %p4608_p10 = scmp.ne.s32.totalorder %s5512_s28, %s4607_s23  ;;  %p4616_p2 = scmp.lt.s32.totalorder %s4607_s23, %s4607_s23 }
 0x11d   : > { %p4610_p13 = pnand %p4608_p10, %p6243_p11  ;;  %p4617_p12 = por %p4616_p2, %p4615_p3 }
 0x11f   : > { %p4611_p0 = pneg %p4610_p13 }
 0x121   : > { %p4618_p5 = pnand %p4617_p12, %p4611_p0 }
 0x123   : > { %4621 = shalt.err (!%p4618_p5)
}
 0x124   : > { %4049 = dma.hbm_to_vmem [thread:$0]  (!%p6244_p9), %s6249_s11, 4096, %s5512_s28, [#allocation20], %s6248_s7, %s6248_s7, %s6247_s12  }
 0x125   : > { %s5565_s1 = scalar_lea.hbm %s6137_s14, %s5416_s19  ;;  %s705_s3 = scalar_lea.vmem [#allocation24], %s5413_s30 }
 0x126   : > { %s711_s6 = sshll.u32 %s705_s3, 4  ;;  %s4622_s24 = scalar_lea.hbm %s5565_s1, 1024  ;;  %s5568_s6 = int_to_ptr.vmem [resolvable:$true] %s711_s6 }
 0x127   : > { %p4623_p11 = scmp.ne.s32.totalorder %s5565_s1, %s4622_s24  ;;  %p6250_p6 = scmp.ne.s32.totalorder %s6237_s8, 0 }
 0x128   : > { %s4627_s12 = scalar_lea.hbm %s6137_s14, 2048  ;;  %p4628_p9 = scmp.lt.u32.totalorder %s5565_s1, %s6137_s14 }
 0x129   : > { %p4625_p1 = pnand %p4623_p11, %p6250_p6  ;;  %p4629_p7 = scmp.lt.u32.totalorder %s4627_s12, %s4622_s24 }
 0x12a   : > { %p4631_p10 = scmp.lt.u32.totalorder %s4622_s24, %s5565_s1 }
 0x12b   : > { %p4626_p8 = pneg %p4625_p1  ;;  %p4630_p4 = por %p4629_p7, %p4628_p9 }
 0x12d   : > { %p4632_p13 = por %p4631_p10, %p4630_p4 }
 0x12f   : > { %p4633_p0 = pnand %p4632_p13, %p4626_p8 }
 0x131   : > { %4636 = shalt.err (!%p4633_p0)
}
 0x132   : > { %s4637_s5 = scalar_lea.vmem %s5568_s6, 1024  ;;  %s5097_s23 = smov [#allocation24]  }
 0x133   : > { %p4638_p3 = scmp.ne.s32.totalorder %s5568_s6, %s4637_s5  ;;  %s4642_s0 = sshll.u32 %s5097_s23, 4  ;;  %s4643_s0 = int_to_ptr.vmem [resolvable:$false] %s4642_s0 }
 0x134   : > { %s4644_s21 = scalar_lea.vmem %s4643_s0, 2048  ;;  %p4645_p5 = scmp.lt.s32.totalorder %s5568_s6, %s4643_s0 }
 0x135   : > { %p4640_p2 = pnand %p4638_p3, %p6250_p6  ;;  %p4646_p11 = scmp.lt.s32.totalorder %s4644_s21, %s4637_s5 }
 0x137   : > { %p4641_p12 = pneg %p4640_p2  ;;  %p4647_p1 = por %p4646_p11, %p4645_p5 }
 0x139   : > { %p4648_p9 = pnand %p4647_p1, %p4641_p12 }
 0x13b   : > { %4651 = shalt.err (!%p4648_p9)
}
 0x13c   : > { %p6251_p8 = scmp.ne.s32.totalorder %s6236_s10, 0  ;;  %s5599_s3 = scalar_lea.hbm %s6138_s15, %s5416_s19 }
 0x13d   : > { %s725_s24 = scalar_lea.vmem [#allocation25], %s5413_s30  ;;  %s6252_s28 = sand.u32 1, %s5068_s22  }
 0x13e   : > { %4056 = dma.hbm_to_vmem [thread:$0]  (!%p6251_p8), %s5565_s1, 1024, %s5568_s6, %s5433_s16, %s6240_s2, %s6239_s29, %s6238_s4  }
 0x13f   : > { %s731_s13 = sshll.u32 %s725_s24, 4  ;;  %s5606_s12 = scalar_lea.sflag [#allocation26], %s6252_s28  ;;  %s5602_s13 = int_to_ptr.vmem [resolvable:$true] %s731_s13 }
 0x140   : > { %s4652_s7 = scalar_lea.hbm %s5599_s3, 1024  ;;  %s4657_s19 = scalar_lea.hbm %s6138_s15, 2048 }
 0x141   : > { %p4653_p7 = scmp.ne.s32.totalorder %s5599_s3, %s4652_s7  ;;  %p4658_p13 = scmp.lt.u32.totalorder %s5599_s3, %s6138_s15 }
 0x142   : > { %p4659_p0 = scmp.lt.u32.totalorder %s4657_s19, %s4652_s7  ;;  %p4661_p2 = scmp.lt.u32.totalorder %s4652_s7, %s5599_s3 }
 0x143   : > { %p4655_p4 = pnand %p4653_p7, %p6250_p6 }
 0x144   : > { %p4660_p3 = por %p4659_p0, %p4658_p13 }
 0x145   : > { %p4656_p10 = pneg %p4655_p4 }
 0x146   : > { %p4662_p12 = por %p4661_p2, %p4660_p3 }
 0x148   : > { %p4663_p5 = pnand %p4662_p12, %p4656_p10 }
 0x14a   : > { %4666 = shalt.err (!%p4663_p5)
}
 0x14b   : > { %s4667_s30 = scalar_lea.vmem %s5602_s13, 1024  ;;  %s5098_s5 = smov [#allocation25]  }
 0x14c   : > { %p4668_p11 = scmp.ne.s32.totalorder %s5602_s13, %s4667_s30  ;;  %s4672_s23 = sshll.u32 %s5098_s5, 4  ;;  %s4673_s23 = int_to_ptr.vmem [resolvable:$false] %s4672_s23 }
 0x14d   : > { %s4674_s0 = scalar_lea.vmem %s4673_s23, 2048  ;;  %p4675_p7 = scmp.lt.s32.totalorder %s5602_s13, %s4673_s23 }
 0x14e   : > { %p4670_p1 = pnand %p4668_p11, %p6250_p6  ;;  %p4676_p4 = scmp.lt.s32.totalorder %s4674_s0, %s4667_s30 }
 0x150   : > { %p4671_p9 = pneg %p4670_p1  ;;  %p4677_p13 = por %p4676_p4, %p4675_p7 }
 0x152   : > { %p4678_p0 = pnand %p4677_p13, %p4671_p9 }
 0x154   : > { %4681 = shalt.err (!%p4678_p0)
}
 0x155   : > { %4059 = dma.hbm_to_vmem [thread:$0]  (!%p6251_p8), %s5599_s3, 1024, %s5602_s13, %s5606_s12, %s6240_s2, %s6239_s29, %s6238_s4  }
 0x156   : > { %p6253_p6 = scmp.ne.s32.totalorder %s6219_s27, 0 }
 0x157   : > { %p6254_p10 = scmp.eq.s32.totalorder (!%p6253_p6), %s5272_s26, 0 }
 0x158   : > { %749 = sbr.rel (%p6253_p6) target bundleno = 2785 (0xae1), region = 80 }
 0x15f   : > { %5007 = dma.done.wait (%p6254_p10), [#allocation11], 512   ;;  %p6255_p3 = pmov %p6254_p10 }
 0x161   : > { %5009 = vsyncadd (%p6255_p3), [#allocation11], 4294966784  ;;  %p6256_p2 = pmov %p6255_p3 }
 0x163   : > { %5011 = dma.done.wait (%p6256_p2), [#allocation14], 1152   ;;  %p6257_p12 = pmov %p6256_p2 }
 0x164   : > { %p6258_p5 = pmov %p6256_p2 }
 0x165   : > { %5013 = vsyncadd (%p6257_p12), [#allocation14], 4294966144 }
 0x166   : > { %5015 = dma.done.wait (%p6258_p5), [#allocation17], 5120   ;;  %p6259_p8 = pmov %p6256_p2 }
 0x167   : > { %p6260_p11 = pmov %p6256_p2 }
 0x168   : > { %5017 = vsyncadd (%p6259_p8), [#allocation17], 4294962176 }
 0x169   : > { %5019 = dma.done.wait (%p6260_p11), [#allocation20], 8192   ;;  %p6261_p1 = pmov %p6256_p2 }
 0x16a   : > { %s6262_s10 = sld [smem:[#allocation70_spill]]  ;;  %s6263_s27 = sld [smem:[#allocation75_spill]] }
 0x16b   : > { %5021 = vsyncadd (%p6261_p1), [#allocation20], 4294959104  ;;  %s779_s8 = sand.u32 1, %s5272_s26  }
 0x16c   : > { %s780_s2 = scalar_lea.sflag [#allocation23], %s779_s8 }
 0x170   : > { %s5653_s4 = sand.u32 1, %s6262_s10   ;;  %p6264_p9 = scmp.ne.s32.totalorder %s6263_s27, 0 }
 0x171   : > { %s3597_s29 = sshll.u32 %s5653_s4, 6 }
 0x172   : > { %s5656_s21 = scalar_lea.vmem [#allocation22], %s3597_s29 }
 0x173   : > { %5023 = dma.done.wait (%p6264_p9), %s780_s2, 2048  }
 0x174   : > { %5025 = vsyncadd (%p6264_p9), %s780_s2, 4294965248  ;;  %s5662_s17 = scalar_lea.vmem [#allocation24], %s3597_s29  ;;  %s798_s18 = scalar_lea.sflag [#allocation26], %s5653_s4 }
 0x175   : > { %s5665_s3 = scalar_lea.vmem [#allocation25], %s3597_s29 }
 0x176   : > { %5027 = dma.done.wait (%p6264_p9), %s798_s18, 1024  }
 0x177   : > { %5029 = vsyncadd (%p6264_p9), %s798_s18, 4294966272  ;;  %s6265_s24 = sld [smem:[#allocation71_spill]]  ;;  %s3600_s13 = sshll.u32 %s5653_s4, 3 }
 0x178   : > { %s5680_s19 = scalar_lea.vmem [#allocation31], %s3600_s13 }
 0x17d   : > { %p883_p7 = scmp.lt.s32.totalorder %s6265_s24, 1  ;;  %p3601_p4 = scmp.ne.s32.totalorder %s6265_s24, 0 }
 0x17e   : > { %s896_s6 = sld [smem:[#allocation9]] (!%p3601_p4)  ;;  %s5099_s20 = smov (!%p3601_p4), [#allocation2]  }
 0x17f   : > { %s5674_s28 = scalar_select %p883_p7, %s6265_s24, 1 }
 0x180   : > { %894 = sbr.rel (%p3601_p4) target bundleno = 1928 (0x788), region = 124  ;;  %s906_s30 = sshll.u32 (!%p3601_p4), %s5099_s20, 4  ;;  %s5685_s30 = int_to_ptr.vmem [resolvable:$true] %s906_s30 }
 0x181   : > { %s5683_s5 = sld [smem:[#allocation9 + $0x1]] (!%p3601_p4)  ;;  %s5100_s23 = smov (!%p3601_p4), [#allocation2 + $0x1]  }
 0x182   : > { %s923_s0 = sshll.u32 (!%p3601_p4), %s5100_s23, 4  ;;  %s5687_s10 = sld [smem:[#allocation9 + $0x2]] (!%p3601_p4)  ;;  %s5689_s0 = int_to_ptr.vmem [resolvable:$true] %s923_s0 }
 0x183   : > { %s5101_s27 = smov (!%p3601_p4), [#allocation2 + $0x2]   ;;  %s5691_s29 = sld [smem:[#allocation9 + $0x3]] (!%p3601_p4) }
 0x184   : > { %s940_s8 = sshll.u32 (!%p3601_p4), %s5101_s27, 4  ;;  %s3602_s2 = sshll.u32 (!%p3601_p4), %s896_s6, 4  ;;  %s5693_s8 = int_to_ptr.vmem [resolvable:$true] %s940_s8 }
 0x185   : > { %s6267_s13 = sld [smem:[#allocation84_spill]] (!%p3601_p4) }
 0x187   : > { %s3604_s7 = sshll.u32 %s5683_s5, 4 }
 0x18b   : > { %s898_s12 = scalar_lea.hbm %s6267_s13, %s3602_s2  ;;  %s5702_s1 = scalar_lea.hbm %s6267_s13, 3200 }
 0x18c   : > { %s4682_s16 = scalar_lea.hbm %s898_s12, 16  ;;  %p4685_p0 = scmp.lt.u32.totalorder %s898_s12, %s6267_s13 }
 0x18d   : > { %p4683_p13 = scmp.ne.s32.totalorder %s898_s12, %s4682_s16  ;;  %p4686_p6 = scmp.lt.u32.totalorder %s5702_s1, %s4682_s16 }
 0x18e   : > { %p4688_p3 = scmp.lt.u32.totalorder %s4682_s16, %s898_s12 }
 0x18f   : > { %p4687_p10 = por %p4686_p6, %p4685_p0 }
 0x191   : > { %p4689_p2 = por %p4688_p3, %p4687_p10 }
 0x193   : > { %p4690_p12 = pnand %p4689_p2, %p4683_p13 }
 0x195   : > { %4693 = shalt.err (!%p4690_p12)  }
 0x196   : > { %s4694_s6 = scalar_lea.vmem %s5685_s30, 16  ;;  %s5711_s5 = scalar_lea.vmem %s5685_s30, 128 }
 0x197   : > { %p4695_p5 = scmp.ne.s32.totalorder %s5685_s30, %s4694_s6  ;;  %p4699_p8 = scmp.lt.s32.totalorder %s5685_s30, %s5685_s30 }
 0x198   : > { %p4700_p11 = scmp.lt.s32.totalorder %s5711_s5, %s4694_s6 }
 0x19a   : > { %p4701_p1 = por %p4700_p11, %p4699_p8 }
 0x19c   : > { %p4702_p9 = pnand %p4701_p1, %p4695_p5 }
 0x19e   : > { %4705 = shalt.err (!%p4702_p9)  }
 0x19f   : > { %909 = dma.hbm_to_vmem [thread:$0]  %s898_s12, 16, %s5685_s30, [#allocation7] }
 0x1a0   : > { %s913_s27 = scalar_lea.hbm %s6267_s13, %s3604_s7  ;;  %s3606_s2 = sshll.u32 %s5687_s10, 4 }
 0x1a1   : > { %s4706_s18 = scalar_lea.hbm %s913_s27, 16  ;;  %p4709_p4 = scmp.lt.u32.totalorder %s913_s27, %s6267_s13 }
 0x1a2   : > { %p4707_p7 = scmp.ne.s32.totalorder %s913_s27, %s4706_s18  ;;  %p4710_p13 = scmp.lt.u32.totalorder %s5702_s1, %s4706_s18 }
 0x1a3   : > { %p4712_p6 = scmp.lt.u32.totalorder %s4706_s18, %s913_s27 }
 0x1a4   : > { %p4711_p0 = por %p4710_p13, %p4709_p4 }
 0x1a6   : > { %p4713_p10 = por %p4712_p6, %p4711_p0 }
 0x1a8   : > { %p4714_p3 = pnand %p4713_p10, %p4707_p7 }
 0x1aa   : > { %4717 = shalt.err (!%p4714_p3)  }
 0x1ab   : > { %s4718_s12 = scalar_lea.vmem %s5689_s0, 16  ;;  %p4723_p12 = scmp.lt.s32.totalorder %s5689_s0, %s5685_s30 }
 0x1ac   : > { %p4719_p2 = scmp.ne.s32.totalorder %s5689_s0, %s4718_s12  ;;  %p4724_p5 = scmp.lt.s32.totalorder %s5711_s5, %s4718_s12 }
 0x1ae   : > { %p4725_p8 = por %p4724_p5, %p4723_p12 }
 0x1b0   : > { %p4726_p11 = pnand %p4725_p8, %p4719_p2 }
 0x1b2   : > { %4729 = shalt.err (!%p4726_p11)  }
 0x1b3   : > { %926 = dma.hbm_to_vmem [thread:$0]  %s913_s27, 16, %s5689_s0, [#allocation7 + $0x1] }
 0x1b4   : > { %s930_s20 = scalar_lea.hbm %s6267_s13, %s3606_s2  ;;  %s3608_s23 = sshll.u32 %s5691_s29, 4 }
 0x1b5   : > { %s4730_s6 = scalar_lea.hbm %s930_s20, 16  ;;  %p4733_p9 = scmp.lt.u32.totalorder %s930_s20, %s6267_s13 }
 0x1b6   : > { %p4731_p1 = scmp.ne.s32.totalorder %s930_s20, %s4730_s6  ;;  %p4734_p7 = scmp.lt.u32.totalorder %s5702_s1, %s4730_s6 }
 0x1b7   : > { %p4736_p13 = scmp.lt.u32.totalorder %s4730_s6, %s930_s20 }
 0x1b8   : > { %p4735_p4 = por %p4734_p7, %p4733_p9 }
 0x1ba   : > { %p4737_p0 = por %p4736_p13, %p4735_p4 }
 0x1bc   : > { %p4738_p6 = pnand %p4737_p0, %p4731_p1 }
 0x1be   : > { %4741 = shalt.err (!%p4738_p6)  }
 0x1bf   : > { %s4742_s0 = scalar_lea.vmem %s5693_s8, 16  ;;  %p4747_p3 = scmp.lt.s32.totalorder %s5693_s8, %s5685_s30 }
 0x1c0   : > { %p4743_p10 = scmp.ne.s32.totalorder %s5693_s8, %s4742_s0  ;;  %p4748_p2 = scmp.lt.s32.totalorder %s5711_s5, %s4742_s0 }
 0x1c2   : > { %p4749_p12 = por %p4748_p2, %p4747_p3 }
 0x1c4   : > { %p4750_p5 = pnand %p4749_p12, %p4743_p10 }
 0x1c6   : > { %4753 = shalt.err (!%p4750_p5)  }
 0x1c7   : > { %943 = dma.hbm_to_vmem [thread:$0]  %s930_s20, 16, %s5693_s8, [#allocation7 + $0x2] }
 0x1c8   : > { %s947_s2 = scalar_lea.hbm %s6267_s13, %s3608_s23  ;;  %s5102_s18 = smov [#allocation2 + $0x3]  }
 0x1c9   : > { %s957_s24 = sshll.u32 %s5102_s18, 4  ;;  %s5748_s16 = sld [smem:[#allocation9 + $0x4]]  ;;  %s958_s24 = int_to_ptr.vmem [resolvable:$true] %s957_s24 }
 0x1ca   : > { %s4754_s12 = scalar_lea.hbm %s947_s2, 16  ;;  %p4757_p11 = scmp.lt.u32.totalorder %s947_s2, %s6267_s13 }
 0x1cb   : > { %p4755_p8 = scmp.ne.s32.totalorder %s947_s2, %s4754_s12  ;;  %p4758_p1 = scmp.lt.u32.totalorder %s5702_s1, %s4754_s12 }
 0x1cc   : > { %p4760_p7 = scmp.lt.u32.totalorder %s4754_s12, %s947_s2 }
 0x1cd   : > { %p4759_p9 = por %p4758_p1, %p4757_p11 }
 0x1cf   : > { %p4761_p4 = por %p4760_p7, %p4759_p9 }
 0x1d1   : > { %p4762_p13 = pnand %p4761_p4, %p4755_p8 }
 0x1d3   : > { %4765 = shalt.err (!%p4762_p13)  }
 0x1d4   : > { %s4766_s8 = scalar_lea.vmem %s958_s24, 16  ;;  %p4771_p6 = scmp.lt.s32.totalorder %s958_s24, %s5685_s30 }
 0x1d5   : > { %p4767_p0 = scmp.ne.s32.totalorder %s958_s24, %s4766_s8  ;;  %p4772_p10 = scmp.lt.s32.totalorder %s5711_s5, %s4766_s8 }
 0x1d7   : > { %p4773_p3 = por %p4772_p10, %p4771_p6 }
 0x1d9   : > { %p4774_p2 = pnand %p4773_p3, %p4767_p0 }
 0x1db   : > { %4777 = shalt.err (!%p4774_p2)  }
 0x1dc   : > { %960 = dma.hbm_to_vmem [thread:$0]  %s947_s2, 16, %s958_s24, [#allocation7 + $0x3] }
 0x1dd   : > { %s5103_s20 = smov [#allocation2 + $0x4]   ;;  %s5756_s6 = sld [smem:[#allocation9 + $0x5]] }
 0x1de   : > { %s974_s23 = sshll.u32 %s5103_s20, 4  ;;  %s5104_s9 = smov [#allocation2 + $0x5]   ;;  %s975_s23 = int_to_ptr.vmem [resolvable:$true] %s974_s23 }
 0x1df   : > { %s991_s11 = sshll.u32 %s5104_s9, 4  ;;  %s5758_s0 = sld [smem:[#allocation9 + $0x6]]  ;;  %s5761_s11 = int_to_ptr.vmem [resolvable:$true] %s991_s11 }
 0x1e0   : > { %s3610_s29 = sshll.u32 %s5748_s16, 4 }
 0x1e1   : > { %s964_s12 = scalar_lea.hbm %s6267_s13, %s3610_s29 }
 0x1e2   : > { %s4778_s10 = scalar_lea.hbm %s964_s12, 16  ;;  %p4781_p5 = scmp.lt.u32.totalorder %s964_s12, %s6267_s13 }
 0x1e3   : > { %p4779_p12 = scmp.ne.s32.totalorder %s964_s12, %s4778_s10  ;;  %p4782_p8 = scmp.lt.u32.totalorder %s5702_s1, %s4778_s10 }
 0x1e4   : > { %p4784_p1 = scmp.lt.u32.totalorder %s4778_s10, %s964_s12 }
 0x1e5   : > { %p4783_p11 = por %p4782_p8, %p4781_p5 }
 0x1e7   : > { %p4785_p9 = por %p4784_p1, %p4783_p11 }
 0x1e9   : > { %p4786_p7 = pnand %p4785_p9, %p4779_p12 }
 0x1eb   : > { %4789 = shalt.err (!%p4786_p7)  }
 0x1ec   : > { %s4790_s7 = scalar_lea.vmem %s975_s23, 16  ;;  %p4795_p13 = scmp.lt.s32.totalorder %s975_s23, %s5685_s30 }
 0x1ed   : > { %p4791_p4 = scmp.ne.s32.totalorder %s975_s23, %s4790_s7  ;;  %p4796_p0 = scmp.lt.s32.totalorder %s5711_s5, %s4790_s7 }
 0x1ef   : > { %p4797_p6 = por %p4796_p0, %p4795_p13 }
 0x1f1   : > { %p4798_p10 = pnand %p4797_p6, %p4791_p4 }
 0x1f3   : > { %4801 = shalt.err (!%p4798_p10)  }
 0x1f4   : > { %977 = dma.hbm_to_vmem [thread:$0]  %s964_s12, 16, %s975_s23, [#allocation7 + $0x4] }
 0x1f5   : > { %s3612_s16 = sshll.u32 %s5756_s6, 4  ;;  %s5105_s8 = smov [#allocation2 + $0x6]  }
 0x1f6   : > { %s1008_s20 = sshll.u32 %s5105_s8, 4  ;;  %s981_s27 = scalar_lea.hbm %s6267_s13, %s3612_s16  ;;  %s5776_s20 = int_to_ptr.vmem [resolvable:$true] %s1008_s20 }
 0x1f7   : > { %s4802_s18 = scalar_lea.hbm %s981_s27, 16  ;;  %p4805_p2 = scmp.lt.u32.totalorder %s981_s27, %s6267_s13 }
 0x1f8   : > { %p4803_p3 = scmp.ne.s32.totalorder %s981_s27, %s4802_s18  ;;  %p4806_p12 = scmp.lt.u32.totalorder %s5702_s1, %s4802_s18 }
 0x1f9   : > { %p4808_p8 = scmp.lt.u32.totalorder %s4802_s18, %s981_s27 }
 0x1fa   : > { %p4807_p5 = por %p4806_p12, %p4805_p2 }
 0x1fc   : > { %p4809_p11 = por %p4808_p8, %p4807_p5 }
 0x1fe   : > { %p4810_p1 = pnand %p4809_p11, %p4803_p3 }
 0x200   : > { %4813 = shalt.err (!%p4810_p1)  }
 0x201   : > { %s4814_s23 = scalar_lea.vmem %s5761_s11, 16  ;;  %p4819_p7 = scmp.lt.s32.totalorder %s5761_s11, %s5685_s30 }
 0x202   : > { %p4815_p9 = scmp.ne.s32.totalorder %s5761_s11, %s4814_s23  ;;  %p4820_p4 = scmp.lt.s32.totalorder %s5711_s5, %s4814_s23 }
 0x204   : > { %p4821_p13 = por %p4820_p4, %p4819_p7 }
 0x206   : > { %p4822_p0 = pnand %p4821_p13, %p4815_p9 }
 0x208   : > { %4825 = shalt.err (!%p4822_p0)  }
 0x209   : > { %994 = dma.hbm_to_vmem [thread:$0]  %s981_s27, 16, %s5761_s11, [#allocation7 + $0x5] }
 0x20a   : > { %s3614_s6 = sshll.u32 %s5758_s0, 4  ;;  %s3615_s12 = sld [smem:[#allocation9 + $0x7]] }
 0x20b   : > { %s998_s16 = scalar_lea.hbm %s6267_s13, %s3614_s6 }
 0x20c   : > { %s4826_s8 = scalar_lea.hbm %s998_s16, 16  ;;  %p4829_p10 = scmp.lt.u32.totalorder %s998_s16, %s6267_s13 }
 0x20d   : > { %p4827_p6 = scmp.ne.s32.totalorder %s998_s16, %s4826_s8  ;;  %p4830_p3 = scmp.lt.u32.totalorder %s5702_s1, %s4826_s8 }
 0x20e   : > { %p4832_p12 = scmp.lt.u32.totalorder %s4826_s8, %s998_s16 }
 0x20f   : > { %p4831_p2 = por %p4830_p3, %p4829_p10 }
 0x211   : > { %p4833_p5 = por %p4832_p12, %p4831_p2 }
 0x213   : > { %p4834_p8 = pnand %p4833_p5, %p4827_p6 }
 0x215   : > { %4837 = shalt.err (!%p4834_p8)  }
 0x216   : > { %s4838_s11 = scalar_lea.vmem %s5776_s20, 16  ;;  %p4843_p1 = scmp.lt.s32.totalorder %s5776_s20, %s5685_s30 }
 0x217   : > { %p4839_p11 = scmp.ne.s32.totalorder %s5776_s20, %s4838_s11  ;;  %p4844_p9 = scmp.lt.s32.totalorder %s5711_s5, %s4838_s11 }
 0x219   : > { %p4845_p7 = por %p4844_p9, %p4843_p1 }
 0x21b   : > { %p4846_p4 = pnand %p4845_p7, %p4839_p11 }
 0x21d   : > { %4849 = shalt.err (!%p4846_p4)  }
 0x21e   : > { %1011 = dma.hbm_to_vmem [thread:$0]  %s998_s16, 16, %s5776_s20, [#allocation7 + $0x6] }
 0x21f   : > { %s5106_s0 = smov [#allocation2 + $0x7]   ;;  %s3616_s18 = sshll.u32 %s3615_s12, 4 }
 0x220   : > { %s1025_s27 = sshll.u32 %s5106_s0, 4  ;;  %s1015_s23 = scalar_lea.hbm %s6267_s13, %s3616_s18  ;;  %s1026_s27 = int_to_ptr.vmem [resolvable:$true] %s1025_s27 }
 0x221   : > { %s4850_s6 = scalar_lea.hbm %s1015_s23, 16  ;;  %p4853_p0 = scmp.lt.u32.totalorder %s1015_s23, %s6267_s13 }
 0x222   : > { %p4851_p13 = scmp.ne.s32.totalorder %s1015_s23, %s4850_s6  ;;  %p4854_p6 = scmp.lt.u32.totalorder %s5702_s1, %s4850_s6 }
 0x223   : > { %p4856_p3 = scmp.lt.u32.totalorder %s4850_s6, %s1015_s23 }
 0x224   : > { %p4855_p10 = por %p4854_p6, %p4853_p0 }
 0x226   : > { %p4857_p2 = por %p4856_p3, %p4855_p10 }
 0x228   : > { %p4858_p12 = pnand %p4857_p2, %p4851_p13 }
 0x22a   : > { %4861 = shalt.err (!%p4858_p12)  }
 0x22b   : > { %s4862_s20 = scalar_lea.vmem %s1026_s27, 16  ;;  %p4867_p8 = scmp.lt.s32.totalorder %s1026_s27, %s5685_s30 }
 0x22c   : > { %p4863_p5 = scmp.ne.s32.totalorder %s1026_s27, %s4862_s20  ;;  %p4868_p11 = scmp.lt.s32.totalorder %s5711_s5, %s4862_s20 }
 0x22e   : > { %p4869_p1 = por %p4868_p11, %p4867_p8 }
 0x230   : > { %p4870_p9 = pnand %p4869_p1, %p4863_p5 }
 0x232   : > { %4873 = shalt.err (!%p4870_p9)  }
 0x233   : > { %1028 = dma.hbm_to_vmem [thread:$0]  %s1015_s23, 16, %s1026_s27, [#allocation7 + $0x7] }
 0x234   : > { %5030 = dma.done.wait [#allocation7], 16 }
 0x235   : > { %5031 = vsyncadd [#allocation7], 4294967280 }
 0x236   : > { %5032 = dma.done.wait [#allocation7 + $0x1], 16 }
 0x237   : > { %5033 = vsyncadd [#allocation7 + $0x1], 4294967280 }
 0x238   : > { %5034 = dma.done.wait [#allocation7 + $0x2], 16 }
 0x239   : > { %5035 = vsyncadd [#allocation7 + $0x2], 4294967280 }
 0x23a   : > { %5036 = dma.done.wait [#allocation7 + $0x3], 16 }
 0x23b   : > { %5037 = vsyncadd [#allocation7 + $0x3], 4294967280 }
 0x23c   : > { %5038 = dma.done.wait [#allocation7 + $0x4], 16 }
 0x23d   : > { %5039 = vsyncadd [#allocation7 + $0x4], 4294967280 }
 0x23e   : > { %5040 = dma.done.wait [#allocation7 + $0x5], 16 }
 0x23f   : > { %5041 = vsyncadd [#allocation7 + $0x5], 4294967280 }
 0x240   : > { %5042 = dma.done.wait [#allocation7 + $0x6], 16 }
 0x241   : > { %5043 = vsyncadd [#allocation7 + $0x6], 4294967280 }
 0x242   : > { %5044 = dma.done.wait [#allocation7 + $0x7], 16 }
 0x243   : > { %5045 = vsyncadd [#allocation7 + $0x7], 4294967280  ;;  %vm2786_vm0 = vcmask 7168   ;;  %v5107_v0 = vmov 0.0   ;;  %v5108_v1 = vmov -1e+30   ;;  %v1173_v14 = vlaneseq }
 0x244   : > { %3852 = vmatprep.subr.bf16.mxu0 %v5107_v0  ;;  %2787 = vst.msk [vmem:[#allocation5] sm:$0xff] %vm2786_vm0, %v5108_v1  ;;  %2788 = vst.msk [vmem:[#allocation6] sm:$0xff] %vm2786_vm0, %v5107_v0  ;;  %3872 = vmatprep.subr.bf16.mxu1 %v5107_v0  ;;  %vm5109_vm1 = vmmov 0   ;;  %v4167_v2 = vld [vmem:[#allocation16] sm:$0xff]   ;;  %v4168_v3 = vld [vmem:[#allocation16 + $0x8] sm:$0xff]   ;;  %s6268_s5 = sld [smem:[#allocation82_spill]] }
 0x245   : > { %3868 = vmatprep.mubr.msk.bf16.mxu0 %vm5109_vm1, %v5107_v0  ;;  %3874 = vmatprep.mubr.msk.bf16.mxu1 %vm5109_vm1, %v5107_v0  ;;  %v4169_v4 = vld [vmem:[#allocation16 + $0x10] sm:$0xff]   ;;  %v4170_v5 = vld [vmem:[#allocation16 + $0x18] sm:$0xff]   ;;  %v4171_v6 = vld [vmem:[#allocation16 + $0x20] sm:$0xff]   ;;  %v5110_v12 = vmov 1966171168   ;;  %v5835_v16 = vshrl.u32 %v1173_v14, 7 }
 0x246   : > { %3853 = vmatpush3.bf16.msra.mxu0 %v4167_v2  ;;  %v4172_v7 = vld [vmem:[#allocation16 + $0x28] sm:$0xff]   ;;  %v4173_v8 = vld [vmem:[#allocation16 + $0x30] sm:$0xff]   ;;  %v4174_v9 = vld [vmem:[#allocation16 + $0x38] sm:$0xff]   ;;  %v1171_v13 = vunpack.c.l.s4 %v5110_v12  ;;  %s6269_s8 = sld [smem:[#allocation86_spill]]  ;;  %s6270_s11 = sld [smem:[#allocation87_spill]]  ;;  %vm1348_vm2 = vcmask 1041409  }
 0x247   : > { %3854 = vmatprep.subr.bf16.mxu0 %v5107_v0  ;;  %v5845_v26 = vsub.s32 0, %v5835_v16  ;;  %v1160_v30 = vld [vmem:[#allocation13] sm:$0xff]  ;;  %v1161_v36 = vld [vmem:[#allocation13 + $0x8] sm:$0xff]  ;;  %v1162_v37 = vld [vmem:[#allocation13 + $0x10] sm:$0xff]  ;;  %vm1350_vm3 = vcmask 1042434   ;;  %vm1352_vm4 = vcmask 1043459  }
 0x248   : > { %v1172_v15 = vunpack.c.0.s8 %v1171_v13  ;;  %v1164_v41 = vld [vmem:[#allocation13 + $0x20] sm:$0xff]  ;;  %v1163_v46 = vld [vmem:[#allocation13 + $0x18] sm:$0xff]  ;;  %v1165_v52 = vld [vmem:[#allocation13 + $0x28] sm:$0xff]  ;;  %vm1354_vm5 = vcmask 1044484   ;;  %vm1356_vm6 = vcmask 1045509   ;;  %vm1358_vm7 = vcmask 1046534  }
 0x249   : > { %v1166_v56 = vld [vmem:[#allocation13 + $0x30] sm:$0xff]  ;;  %v1167_v60 = vld [vmem:[#allocation13 + $0x38] sm:$0xff]  ;;  %vm1360_vm8 = vcmask 1047559   ;;  %vm1364_vm10 = vcmask 64512   ;;  %vm1429_vm11 = vcmask 1043456   ;;  %s6271_s18 = sld [smem:[#allocation91_spill]] }
 0x24a   : > { %3855 = vmatpush3.bf16.msra.mxu0 %v4168_v3  ;;  %v1046_v10 = vld [vmem:[%s6268_s5] sm:$0xff]  ;;  %v5841_v18 = vsub.s32 %v1172_v15, %v5835_v16 }
 0x24b   : > { %3856 = vmatprep.subr.bf16.mxu0 %v5107_v0  ;;  %v5828_v11 = vpack.c.bf16 %v1046_v10, %v1046_v10 }
 0x24c   : > { %v3617_v17 = vld [vmem:[%s6269_s8] ss:$0 sm:$0xff] }
 0x24d   : > { %v3626_v61 = vld [vmem:[%s6270_s11] ss:$0 sm:$0xff] }
 0x24e   : > { %3857 = vmatpush3.bf16.msra.mxu0 %v4169_v4 }
 0x24f   : > { %3858 = vmatprep.subr.bf16.mxu0 %v5107_v0 }
 0x252   : > { %3859 = vmatpush3.bf16.msra.mxu0 %v4170_v5 }
 0x253   : > { %3860 = vmatprep.subr.bf16.mxu0 %v5107_v0 }
 0x256   : > { %3861 = vmatpush3.bf16.msra.mxu0 %v4171_v6 }
 0x257   : > { %3862 = vmatprep.subr.bf16.mxu0 %v5107_v0 }
 0x25a   : > { %3863 = vmatpush3.bf16.msra.mxu0 %v4172_v7 }
 0x25b   : > { %3864 = vmatprep.subr.bf16.mxu0 %v5107_v0 }
 0x25e   : > { %3865 = vmatpush3.bf16.msra.mxu0 %v4173_v8 }
 0x25f   : > { %3866 = vmatprep.subr.bf16.mxu0 %v5107_v0 }
 0x262   : > { %3867 = vmatpush3.bf16.msra.mxu0 %v4174_v9 }
 0x263   : > { %3902 = vmatprep.subr.bf16.mxu0 %v5107_v0 }
 0x265   : > { %3869 = vmatmul.mubr.bf16.vlgmr.msra.gmra.mrb[0].mxu0 %v5828_v11 }
 0x266   : > { %3904 = vmatprep.mubr.msk.bf16.mxu0 %vm5109_vm1, %v5107_v0 }
 0x338   : > { %v1154_v19 = vpop.f32.mrb[0].mxu0 }
 0x339   : > { %v1155_v20 = vadd.f32 %v3617_v17, %v1154_v19  ;;  %v3870_v21 = vpop.f32.mrb[1].mxu0 }
 0x33a   : > { %v1157_v22 = vpop.f32.mrb[2].mxu0 }
 0x33b   : > { %v1169_v23 = vcombine.high %v1155_v20, %v1155_v20  ;;  %v1176_v24 = vrot.slane %v1155_v20, %v5841_v18  ;;  %v3871_v25 = vpop.f32.mrb[3].mxu0  ;;  %v1306_v20 = vand.u32 127, %v1173_v14 }
 0x33d   : > { %v1183_v27 = vrot.slane %v1169_v23, %v5841_v18  ;;  %v1184_v28 = vcombine.high %v1176_v24, %v1176_v24  ;;  %v1192_v29 = vrot.slane %v1176_v24, %v5841_v18  ;;  %v1318_v22 = vsub.s32 %v1306_v20, %v5835_v16 }
 0x33e   : > { %vm1307_vm9 = vcmp.lt.s32.totalorder %v1306_v20, 8 }
 0x33f   : > { %v1185_v31 = vcombine.high %v1183_v27, %v1183_v27  ;;  %v1199_v32 = vrot.slane %v1183_v27, %v5841_v18  ;;  %v1206_v33 = vrot.slane %v1184_v28, %v5841_v18  ;;  %v1214_v34 = vcombine.high %v1192_v29, %v1192_v29 }
 0x340   : > { %v1221_v35 = vrot.slane %v1192_v29, %v5845_v26 }
 0x341   : > { %v1213_v38 = vrot.slane %v1185_v31, %v5841_v18  ;;  %v1216_v39 = vcombine.high %v1206_v33, %v1206_v33  ;;  %v1225_v40 = vrot.slane %v1206_v33, %v5845_v26  ;;  %v1215_v42 = vcombine.high %v1199_v32, %v1199_v32 }
 0x342   : > { %v1229_v43 = vrot.slane %v1214_v34, %v5845_v26  ;;  %v1237_v44 = vrot.slane %v1199_v32, %v5845_v26  ;;  %v1258_v45 = vadd.f32 %v1221_v35, %v1160_v30 }
 0x343   : > { %v1233_v47 = vrot.slane %v1216_v39, %v5845_v26  ;;  %v1259_v48 = vadd.f32 %v1225_v40, %v1161_v36  ;;  %v1241_v50 = vrot.slane %v1213_v38, %v5845_v26  ;;  %v1217_v53 = vcombine.high %v1213_v38, %v1213_v38 }
 0x344   : > { %v1260_v49 = vadd.f32 %v1229_v43, %v1162_v37  ;;  %4319 = vtanh.f32 %v1258_v45  ;;  %v1262_v51 = vadd.f32 %v1237_v44, %v1164_v41  ;;  %v1245_v54 = vrot.slane %v1215_v42, %v5845_v26 }
 0x345   : > { %v1261_v55 = vadd.f32 %v1233_v47, %v1163_v46  ;;  %4321 = vtanh.f32 %v1259_v48  ;;  %v1263_v57 = vadd.f32 %v1241_v50, %v1165_v52  ;;  %v1249_v58 = vrot.slane %v1217_v53, %v5845_v26  ;;  %v1413_v52 = vld [vmem:[#allocation10] sm:$0xf] }
 0x346   : > { %4323 = vtanh.f32 %v1260_v49  ;;  %v1264_v59 = vadd.f32 %v1245_v54, %v1166_v56  ;;  %v1431_v53 = vsel %vm1429_vm11, %v1413_v52, 0  ;;  %v1418_v54 = vld [vmem:[#allocation10 + $0x14] sm:$0xf]  ;;  %v4195_v52 = vld [vmem:[#allocation19 + $0x64] ss:$16 sps:$4 sm:$0xff]  }
 0x347   : > { %4325 = vtanh.f32 %v1262_v51  ;;  %v1265_v63 = vadd.f32 %v1249_v58, %v1167_v60  ;;  %3873 = vmatpush3.bf16.msra.mxu1 %v1431_v53  ;;  %v4198_v53 = vld [vmem:[#allocation19 + $0x6c] ss:$16 sps:$4 sm:$0xff]  }
 0x348   : > { %4327 = vtanh.f32 %v1261_v55  ;;  %3878 = vmatprep.subr.bf16.mxu1 %v5107_v0  ;;  %v1686_v55 = vsel %vm1429_vm11, %v1418_v54, 0  ;;  %v4193_v54 = vld [vmem:[#allocation19 + $0x60] ss:$16 sps:$4 sm:$0xff]  }
 0x349   : > { %4329 = vtanh.f32 %v1263_v57  ;;  %3903 = vmatpush3.bf16.msra.mxu0 %v1686_v55  ;;  %v4196_v55 = vld [vmem:[#allocation19 + $0x68] ss:$16 sps:$4 sm:$0xff]  }
 0x34a   : > { %4331 = vtanh.f32 %v1264_v59  ;;  %3914 = vmatprep.subr.bf16.mxu0 %v5107_v0 }
 0x34b   : > { %4333 = vtanh.f32 %v1265_v63 }
 0x34e   : > { %v4320_v62 = vpop.eup %4319 }
 0x34f   : > { %v1281_v1 = vmul.f32 %v4320_v62, %v3626_v61  ;;  %v4322_v2 = vpop.eup %4321 }
 0x350   : > { %v4324_v3 = vpop.eup %4323  ;;  %v1282_v6 = vmul.f32 %v4322_v2, %v3626_v61 }
 0x351   : > { %1289 = vadd.xlane.f32.xlu0 %v1281_v1  ;;  %v4326_v4 = vpop.eup %4325  ;;  %v1283_v5 = vmul.f32 %v4324_v3, %v3626_v61  ;;  %v1414_v3 = vld [vmem:[#allocation10 + $0x4] sm:$0xf] }
 0x352   : > { %v4328_v7 = vpop.eup %4327  ;;  %v1285_v10 = vmul.f32 %v4326_v4, %v3626_v61 }
 0x353   : > { %1293 = vadd.xlane.f32.xlu1 %v1283_v5  ;;  %v4330_v8 = vpop.eup %4329  ;;  %v1284_v9 = vmul.f32 %v4328_v7, %v3626_v61  ;;  %v1482_v7 = vsel %vm1429_vm11, %v1414_v3, 0  ;;  %v4211_v3 = vld [vmem:[#allocation19 + $0xc0] ss:$16 sps:$4 sm:$0xff]  }
 0x354   : > { %v4332_v12 = vpop.eup %4331  ;;  %v1286_v13 = vmul.f32 %v4330_v8, %v3626_v61 }
 0x355   : > { %1291 = vadd.xlane.f32.xlu0 %v1282_v6  ;;  %v1287_v15 = vmul.f32 %v4332_v12, %v3626_v61  ;;  %v4334_v17 = vpop.eup %4333 }
 0x356   : > { %v1288_v19 = vmul.f32 %v4334_v17, %v3626_v61 }
 0x357   : > { %1295 = vadd.xlane.f32.xlu1 %v1284_v9 }
 0x359   : > { %1297 = vadd.xlane.f32.xlu0 %v1285_v10 }
 0x35b   : > { %1299 = vadd.xlane.f32.xlu1 %v1286_v13  ;;  %v1420_v13 = vld [vmem:[#allocation10 + $0x1c] sm:$0xf] }
 0x35d   : > { %1301 = vadd.xlane.f32.xlu0 %v1287_v15 }
 0x35f   : > { %1303 = vadd.xlane.f32.xlu1 %v1288_v19  ;;  %v1788_v19 = vsel %vm1429_vm11, %v1420_v13, 0 }
 0x3de   : > { %v1290_v21 = vpop.xlane.xlu0 %1289 }
 0x3df   : > { %v1319_v25 = vrot.slane %v1290_v21, %v1318_v22  ;;  %v1415_v21 = vld [vmem:[#allocation10 + $0x8] sm:$0xf] }
 0x3e0   : > { %v1294_v23 = vpop.xlane.xlu1 %1293 }
 0x3e1   : > { %v1327_v28 = vrot.slane %v1294_v23, %v1318_v22  ;;  %v1533_v23 = vsel %vm1429_vm11, %v1415_v21, 0 }
 0x3e2   : > { %v1292_v24 = vpop.xlane.xlu0 %1291 }
 0x3e3   : > { %v1323_v27 = vrot.slane %v1292_v24, %v1318_v22 }
 0x3e4   : > { %v1296_v31 = vpop.xlane.xlu1 %1295 }
 0x3e5   : > { %v1349_v29 = vsel %vm1348_vm2, %v1323_v27, %v1319_v25  ;;  %v1331_v33 = vrot.slane %v1296_v31, %v1318_v22 }
 0x3e6   : > { %v1351_v30 = vsel %vm1350_vm3, %v1327_v28, %v1349_v29  ;;  %v1298_v32 = vpop.xlane.xlu0 %1297  ;;  %v1416_v28 = vld [vmem:[#allocation10 + $0xc] sm:$0xf] }
 0x3e7   : > { %v1335_v14 = vrot.slane %v1298_v32, %v1318_v22  ;;  %v1353_v34 = vsel %vm1352_vm4, %v1331_v33, %v1351_v30  ;;  %v1584_v30 = vsel %vm1429_vm11, %v1416_v28, 0  ;;  %v1417_v33 = vld [vmem:[#allocation10 + $0x10] sm:$0xf] }
 0x3e8   : > { %v1300_v36 = vpop.xlane.xlu1 %1299 }
 0x3e9   : > { %v1355_v35 = vsel %vm1354_vm5, %v1335_v14, %v1353_v34  ;;  %v1339_v38 = vrot.slane %v1300_v36, %v1318_v22  ;;  %v1635_v34 = vsel %vm1429_vm11, %v1417_v33, 0  ;;  %v1419_v36 = vld [vmem:[#allocation10 + $0x18] sm:$0xf] }
 0x3ea   : > { %v1302_v37 = vpop.xlane.xlu0 %1301 }
 0x3eb   : > { %v1343_v39 = vrot.slane %v1302_v37, %v1318_v22  ;;  %v1357_v40 = vsel %vm1356_vm6, %v1339_v38, %v1355_v35  ;;  %v1737_v38 = vsel %vm1429_vm11, %v1419_v36, 0 }
 0x3ec   : > { %v1304_v41 = vpop.xlane.xlu1 %1303 }
 0x3ed   : > { %v1359_v42 = vsel %vm1358_vm7, %v1343_v39, %v1357_v40  ;;  %v1347_v43 = vrot.slane %v1304_v41, %v1318_v22  ;;  %v4177_v41 = vld [vmem:[#allocation19 + $0x4] ss:$16 sps:$4 sm:$0xff]  }
 0x3ef   : > { %v1361_v44 = vsel %vm1360_vm8, %v1347_v43, %v1359_v42  ;;  %v4180_v42 = vld [vmem:[#allocation19 + $0xc] ss:$16 sps:$4 sm:$0xff]   ;;  %v4175_v43 = vld [vmem:[#allocation19] ss:$16 sps:$4 sm:$0xff]  }
 0x3f0   : > { %v1363_v45 = vsel %vm1307_vm9, %v1361_v44, -1e+30  ;;  %v4178_v44 = vld [vmem:[#allocation19 + $0x8] ss:$16 sps:$4 sm:$0xff]  }
 0x3f1   : > { %v1365_v46 = vsel %vm1364_vm10, %v1363_v45, -inf }
 0x3f2   : > { %1366 = vmax.xlane.f32.xlu0 %v1365_v46  ;;  %v4186_v46 = vld [vmem:[#allocation19 + $0x2c] ss:$16 sps:$4 sm:$0xff]  }
 0x47f   : > { %v1367_v47 = vpop.xlane.xlu0 %1366 }
 0x480   : > { %v1368_v48 = vsub.f32 %v1363_v45, %v1367_v47  ;;  %v4183_v45 = vld [vmem:[#allocation19 + $0x24] ss:$16 sps:$4 sm:$0xff]   ;;  %v4181_v47 = vld [vmem:[#allocation19 + $0x20] ss:$16 sps:$4 sm:$0xff]  }
 0x482   : > { %v1369_v49 = vmul.f32 1.442695, %v1368_v48  ;;  %v4184_v48 = vld [vmem:[#allocation19 + $0x28] ss:$16 sps:$4 sm:$0xff]  }
 0x484   : > { %4335 = vpow2.f32 %v1369_v49  ;;  %v4192_v49 = vld [vmem:[#allocation19 + $0x4c] ss:$16 sps:$4 sm:$0xff]  }
 0x48e   : > { %v4336_v50 = vpop.eup %4335 }
 0x48f   : > { %v1371_v51 = vsel %vm1364_vm10, %v4336_v50, 0.0 }
 0x490   : > { %1372 = vadd.xlane.f32.xlu1 %v1371_v51  ;;  %v4190_v51 = vld [vmem:[#allocation19 + $0x48] ss:$16 sps:$4 sm:$0xff]  }
 0x51d   : > { %v1373_v56 = vpop.xlane.xlu1 %1372 }
 0x51e   : > { %4337 = vrcp.f32 %v1373_v56 }
 0x528   : > { %v4338_v57 = vpop.eup %4337 }
 0x529   : > { %v1375_v58 = vmul.f32 %v4338_v57, %v1373_v56  ;;  %v4201_v56 = vld [vmem:[#allocation19 + $0x84] ss:$16 sps:$4 sm:$0xff]  }
 0x52b   : > { %v1376_v59 = vsub.f32 2.0, %v1375_v58  ;;  %v4199_v58 = vld [vmem:[#allocation19 + $0x80] ss:$16 sps:$4 sm:$0xff]  }
 0x52d   : > { %v1377_v60 = vmul.f32 %v4338_v57, %v1376_v59  ;;  %v4204_v57 = vld [vmem:[#allocation19 + $0x8c] ss:$16 sps:$4 sm:$0xff]   ;;  %v4202_v59 = vld [vmem:[#allocation19 + $0x88] ss:$16 sps:$4 sm:$0xff]  }
 0x52f   : > { %v1378_v61 = vmul.f32 %v4336_v50, %v1377_v60  ;;  %v4187_v50 = vld [vmem:[#allocation19 + $0x40] ss:$16 sps:$4 sm:$0xff]   ;;  %v4207_v60 = vld [vmem:[#allocation19 + $0xa4] ss:$16 sps:$4 sm:$0xff]  }
 0x531   : > { %v1379_v62 = vpack.c.bf16 %v1378_v61, %v1378_v61  ;;  %2750 = vst.msk [vmem:[#allocation30] sm:$0xff] %vm1364_vm10, %v1378_v61  ;;  %v4210_v61 = vld [vmem:[#allocation19 + $0xac] ss:$16 sps:$4 sm:$0xff]  }
 0x533   : > { %v1387_v63 = vrot.slane %v1379_v62, %v5841_v18  ;;  %v4205_v62 = vld [vmem:[#allocation19 + $0xa0] ss:$16 sps:$4 sm:$0xff]  }
 0x535   : > { %v1388_v1 = vcombine.high %v1387_v63, %v1387_v63  ;;  %v1395_v2 = vrot.slane %v1387_v63, %v5841_v18  ;;  %v4208_v63 = vld [vmem:[#allocation19 + $0xa8] ss:$16 sps:$4 sm:$0xff]  }
 0x537   : > { %v1402_v4 = vrot.slane %v1388_v1, %v5841_v18  ;;  %v1403_v5 = vcombine.high %v1395_v2, %v1395_v2  ;;  %v3627_v6 = vpack.i.b16 %v1395_v2, %v1395_v2  ;;  %v1406_v10 = vunpack.i.h.s16 %v1395_v2  ;;  %v4213_v1 = vld [vmem:[#allocation19 + $0xc4] ss:$16 sps:$4 sm:$0xff]   ;;  %v4216_v2 = vld [vmem:[#allocation19 + $0xcc] ss:$16 sps:$4 sm:$0xff]  }
 0x539   : > { %v1425_v8 = vrot.slane %v3627_v6, %v5845_v26  ;;  %v1410_v9 = vunpack.i.h.s16 %v1403_v5  ;;  %v1404_v12 = vcombine.high %v1402_v4, %v1402_v4  ;;  %v1473_v18 = vpack.i.b16 %v1406_v10, %v1406_v10  ;;  %v4222_v6 = vld [vmem:[#allocation19 + $0xec] ss:$16 sps:$4 sm:$0xff]  }
 0x53a   : > { %v3630_v27 = vpack.i.b16 %v1402_v4, %v1402_v4  ;;  %v1408_v31 = vunpack.i.h.s16 %v1402_v4  ;;  %v3633_v35 = vpack.i.b16 %v1403_v5, %v1403_v5  ;;  %v4214_v4 = vld [vmem:[#allocation19 + $0xc8] ss:$16 sps:$4 sm:$0xff]   ;;  %v4219_v5 = vld [vmem:[#allocation19 + $0xe4] ss:$16 sps:$4 sm:$0xff]   ;;  %v4228_v10 = vld [vmem:[#allocation18 + $0xc] ss:$16 sps:$4 sm:$0xff]  }
 0x53b   : > { %3875 = vmatmul.mubr.msk.bf16.vlgmr.msra.gmra.mrb[0].mxu1 %vm1364_vm10, %v1425_v8  ;;  %v1677_v15 = vpack.i.b16 %v1410_v9, %v1410_v9  ;;  %v1412_v20 = vunpack.i.h.s16 %v1404_v12  ;;  %v1477_v22 = vrot.slane %v1473_v18, %v5845_v26  ;;  %v3636_v39 = vpack.i.b16 %v1404_v12, %v1404_v12  ;;  %v4220_v8 = vld [vmem:[#allocation19 + $0xe8] ss:$16 sps:$4 sm:$0xff]   ;;  %v4225_v9 = vld [vmem:[#allocation18 + $0x4] ss:$16 sps:$4 sm:$0xff]  }
 0x53c   : > { %3879 = vmatpush3.bf16.msra.mxu1 %v1482_v7  ;;  %3880 = vmatprep.mubr.msk.bf16.mxu1 %vm5109_vm1, %v5107_v0  ;;  %v1528_v29 = vrot.slane %v3630_v27, %v5845_v26  ;;  %v1575_v32 = vpack.i.b16 %v1408_v31, %v1408_v31  ;;  %v1630_v37 = vrot.slane %v3633_v35, %v5845_v26  ;;  %v4217_v7 = vld [vmem:[#allocation19 + $0xe0] ss:$16 sps:$4 sm:$0xff]   ;;  %v5111_v12 = vmov 0  }
 0x53d   : > { %v1681_v17 = vrot.slane %v1677_v15, %v5845_v26  ;;  %3884 = vmatprep.subr.bf16.mxu1 %v5107_v0  ;;  %v1779_v24 = vpack.i.b16 %v1412_v20, %v1412_v20  ;;  %v1732_v40 = vrot.slane %v3636_v39, %v5845_v26 }
 0x53e   : > { %v1579_v14 = vrot.slane %v1575_v32, %v5845_v26 }
 0x53f   : > { %3905 = vmatmul.mubr.msk.bf16.vlgmr.msra.gmra.mrb[4].mxu0 %vm1364_vm10, %v1681_v17  ;;  %v1783_v25 = vrot.slane %v1779_v24, %v5845_v26 }
 0x540   : > { %3915 = vmatpush3.bf16.msra.mxu0 %v1788_v19  ;;  %3916 = vmatprep.mubr.msk.bf16.mxu0 %vm5109_vm1, %v5107_v0 }
 0x541   : > { %2137 = vmatprep.subr.bf16.mxu0 %v4180_v42 }
 0x543   : > { %3881 = vmatmul.mubr.msk.bf16.vlgmr.msra.gmra.mrb[4].mxu1 %vm1364_vm10, %v1477_v22 }
 0x544   : > { %3885 = vmatpush3.bf16.msra.mxu1 %v1533_v23  ;;  %3886 = vmatprep.mubr.msk.bf16.mxu1 %vm5109_vm1, %v5107_v0 }
 0x545   : > { %3890 = vmatprep.subr.bf16.mxu1 %v5107_v0 }
 0x547   : > { %3917 = vmatmul.mubr.msk.bf16.vlgmr.msra.gmra.mrb[8].mxu0 %vm1364_vm10, %v1783_v25 }
 0x548   : > { %2138 = vmatpush1.bf16.msra.mxu0 %v4178_v44  ;;  %2169 = vmatprep.mubr.bf16.mxu0 %v5111_v12 }
 0x549   : > { %2139 = vmatprep.subr.bf16.mxu0 %v4186_v46 }
 0x54b   : > { %3887 = vmatmul.mubr.msk.bf16.vlgmr.msra.gmra.mrb[8].mxu1 %vm1364_vm10, %v1528_v29 }
 0x54c   : > { %3891 = vmatpush3.bf16.msra.mxu1 %v1584_v30  ;;  %3892 = vmatprep.mubr.msk.bf16.mxu1 %vm5109_vm1, %v5107_v0 }
 0x54d   : > { %3896 = vmatprep.subr.bf16.mxu1 %v5107_v0  ;;  %2140 = vmatpush1.bf16.msra.mxu0 %v4184_v48 }
 0x54e   : > { %2141 = vmatprep.subr.bf16.mxu0 %v4192_v49 }
 0x551   : > { %2142 = vmatpush1.bf16.msra.mxu0 %v4190_v51 }
 0x552   : > { %2143 = vmatprep.subr.bf16.mxu0 %v4198_v53 }
 0x553   : > { %3893 = vmatmul.mubr.msk.bf16.vlgmr.msra.gmra.mrb[12].mxu1 %vm1364_vm10, %v1579_v14 }
 0x554   : > { %3897 = vmatpush3.bf16.msra.mxu1 %v1635_v34  ;;  %3898 = vmatprep.mubr.msk.bf16.mxu1 %vm5109_vm1, %v5107_v0 }
 0x555   : > { %3908 = vmatprep.subr.bf16.mxu1 %v5107_v0  ;;  %2144 = vmatpush1.bf16.msra.mxu0 %v4196_v55 }
 0x556   : > { %2145 = vmatprep.subr.bf16.mxu0 %v4204_v57 }
 0x559   : > { %2146 = vmatpush1.bf16.msra.mxu0 %v4202_v59 }
 0x55a   : > { %2147 = vmatprep.subr.bf16.mxu0 %v4210_v61 }
 0x55b   : > { %3899 = vmatmul.mubr.msk.bf16.vlgmr.msra.gmra.mrb[16].mxu1 %vm1364_vm10, %v1630_v37 }
 0x55c   : > { %3909 = vmatpush3.bf16.msra.mxu1 %v1737_v38  ;;  %3910 = vmatprep.mubr.msk.bf16.mxu1 %vm5109_vm1, %v5107_v0  ;;  %v4189_v0 = vld [vmem:[#allocation19 + $0x44] ss:$16 sps:$4 sm:$0xff]  }
 0x55d   : > { %2096 = vmatprep.subr.bf16.mxu1 %v4177_v41  ;;  %2148 = vmatpush1.bf16.msra.mxu0 %v4208_v63 }
 0x55e   : > { %2149 = vmatprep.subr.bf16.mxu0 %v4216_v2 }
 0x561   : > { %2150 = vmatpush1.bf16.msra.mxu0 %v4214_v4 }
 0x562   : > { %2151 = vmatprep.subr.bf16.mxu0 %v4222_v6 }
 0x563   : > { %3911 = vmatmul.mubr.msk.bf16.vlgmr.msra.gmra.mrb[20].mxu1 %vm1364_vm10, %v1732_v40 }
 0x564   : > { %2097 = vmatpush1.bf16.msra.mxu1 %v4175_v43  ;;  %2128 = vmatprep.mubr.bf16.mxu1 %v5111_v12 }
 0x565   : > { %2098 = vmatprep.subr.bf16.mxu1 %v4183_v45  ;;  %2152 = vmatpush1.bf16.msra.mxu0 %v4220_v8 }
 0x566   : > { %2379 = vmatprep.subr.bf16.mxu0 %v4228_v10 }
 0x568   : > { %2099 = vmatpush1.bf16.msra.mxu1 %v4181_v47 }
 0x569   : > { %2100 = vmatprep.subr.bf16.mxu1 %v4189_v0 }
 0x56c   : > { %2101 = vmatpush1.bf16.msra.mxu1 %v4187_v50 }
 0x56d   : > { %2102 = vmatprep.subr.bf16.mxu1 %v4195_v52 }
 0x570   : > { %2103 = vmatpush1.bf16.msra.mxu1 %v4193_v54 }
 0x571   : > { %2104 = vmatprep.subr.bf16.mxu1 %v4201_v56 }
 0x574   : > { %2105 = vmatpush1.bf16.msra.mxu1 %v4199_v58 }
 0x575   : > { %2106 = vmatprep.subr.bf16.mxu1 %v4207_v60 }
 0x578   : > { %2107 = vmatpush1.bf16.msra.mxu1 %v4205_v62 }
 0x579   : > { %2108 = vmatprep.subr.bf16.mxu1 %v4213_v1 }
 0x57c   : > { %2109 = vmatpush1.bf16.msra.mxu1 %v4211_v3 }
 0x57d   : > { %2110 = vmatprep.subr.bf16.mxu1 %v4219_v5 }
 0x580   : > { %2111 = vmatpush1.bf16.msra.mxu1 %v4217_v7 }
 0x581   : > { %2338 = vmatprep.subr.bf16.mxu1 %v4225_v9 }
 0x60e   : > { %v1467_v13 = vpop.f32.mrb[0].mxu1 }
 0x60f   : > { %v3876_v15 = vpop.f32.mrb[1].mxu1  ;;  %v1864_v24 = vpack.c.bf16 %v1467_v13, %v1467_v13 }
 0x610   : > { %v1470_v17 = vpop.f32.mrb[2].mxu1  ;;  %v4223_v15 = vld [vmem:[#allocation18] ss:$16 sps:$4 sm:$0xff]  }
 0x611   : > { %v3877_v18 = vpop.f32.mrb[3].mxu1  ;;  %v1912_v32 = vunpack.c.l.b16 %v1864_v24  ;;  %v4226_v17 = vld [vmem:[#allocation18 + $0x8] ss:$16 sps:$4 sm:$0xff]   ;;  %v4237_v24 = vld [vmem:[#allocation18 + $0x44] ss:$16 sps:$4 sm:$0xff]  }
 0x612   : > { %v1722_v19 = vpop.f32.mrb[4].mxu0 }
 0x613   : > { %v3906_v20 = vpop.f32.mrb[5].mxu0  ;;  %v1869_v51 = vpack.c.bf16 %v1722_v19, %v1722_v19 }
 0x614   : > { %v1725_v21 = vpop.f32.mrb[6].mxu0  ;;  %v4231_v20 = vld [vmem:[#allocation18 + $0x24] ss:$16 sps:$4 sm:$0xff]  }
 0x615   : > { %v3907_v22 = vpop.f32.mrb[7].mxu0  ;;  %v1917_v56 = vunpack.c.l.b16 %v1869_v51  ;;  %v4234_v21 = vld [vmem:[#allocation18 + $0x2c] ss:$16 sps:$4 sm:$0xff]   ;;  %v4271_v51 = vld [vmem:[#allocation21] ss:$16 sps:$4 sm:$0xff]  }
 0x616   : > { %v1518_v23 = vpop.f32.mrb[4].mxu1  ;;  %v4229_v22 = vld [vmem:[#allocation18 + $0x20] ss:$16 sps:$4 sm:$0xff]  }
 0x617   : > { %v1865_v25 = vpack.c.bf16 %v1518_v23, %v1518_v23  ;;  %v3882_v27 = vpop.f32.mrb[5].mxu1  ;;  %v1928_v61 = vrot.slane %v1917_v56, 3  ;;  %v4232_v23 = vld [vmem:[#allocation18 + $0x28] ss:$16 sps:$4 sm:$0xff]  }
 0x618   : > { %v1521_v28 = vpop.f32.mrb[6].mxu1  ;;  %v4235_v27 = vld [vmem:[#allocation18 + $0x40] ss:$16 sps:$4 sm:$0xff]   ;;  %v4280_v56 = vld [vmem:[#allocation21 + $0x28] ss:$16 sps:$4 sm:$0xff]  }
 0x619   : > { %v1913_v29 = vunpack.c.l.b16 %v1865_v25  ;;  %v3883_v30 = vpop.f32.mrb[7].mxu1  ;;  %v4240_v25 = vld [vmem:[#allocation18 + $0x4c] ss:$16 sps:$4 sm:$0xff]   ;;  %v4238_v28 = vld [vmem:[#allocation18 + $0x48] ss:$16 sps:$4 sm:$0xff]  }
 0x61a   : > { %v1824_v31 = vpop.f32.mrb[8].mxu0  ;;  %v4246_v30 = vld [vmem:[#allocation18 + $0x6c] ss:$16 sps:$4 sm:$0xff]  }
 0x61b   : > { %v1920_v33 = vrot.slane %v1913_v29, 7  ;;  %v3918_v14 = vpop.f32.mrb[9].mxu0  ;;  %v1871_v62 = vpack.c.bf16 %v1824_v31, %v1824_v31  ;;  %v4243_v29 = vld [vmem:[#allocation18 + $0x64] ss:$16 sps:$4 sm:$0xff]   ;;  %v4241_v31 = vld [vmem:[#allocation18 + $0x60] ss:$16 sps:$4 sm:$0xff]  }
 0x61c   : > { %v1827_v34 = vpop.f32.mrb[10].mxu0  ;;  %v4252_v14 = vld [vmem:[#allocation18 + $0x8c] ss:$16 sps:$4 sm:$0xff]  }
 0x61d   : > { %v1921_v35 = vsel %vm1348_vm2, %v1920_v33, %v1912_v32  ;;  %v3919_v36 = vpop.f32.mrb[11].mxu0  ;;  %v1919_v5 = vunpack.c.l.b16 %v1871_v62  ;;  %v4244_v32 = vld [vmem:[#allocation18 + $0x68] ss:$16 sps:$4 sm:$0xff]   ;;  %v4249_v33 = vld [vmem:[#allocation18 + $0x84] ss:$16 sps:$4 sm:$0xff]  }
 0x61e   : > { %v1569_v37 = vpop.f32.mrb[8].mxu1  ;;  %v4247_v34 = vld [vmem:[#allocation18 + $0x80] ss:$16 sps:$4 sm:$0xff]   ;;  %v4255_v36 = vld [vmem:[#allocation18 + $0xa4] ss:$16 sps:$4 sm:$0xff]  }
 0x61f   : > { %v1866_v38 = vpack.c.bf16 %v1569_v37, %v1569_v37  ;;  %v3888_v39 = vpop.f32.mrb[9].mxu1  ;;  %v1932_v10 = vrot.slane %v1919_v5, 1  ;;  %v4258_v37 = vld [vmem:[#allocation18 + $0xac] ss:$16 sps:$4 sm:$0xff]   ;;  %v4303_v5 = vld [vmem:[#allocation21 + $0xa4] ss:$16 sps:$4 sm:$0xff]  }
 0x620   : > { %v1572_v40 = vpop.f32.mrb[10].mxu1  ;;  %v4256_v39 = vld [vmem:[#allocation18 + $0xa8] ss:$16 sps:$4 sm:$0xff]   ;;  %v4294_v62 = vld [vmem:[#allocation21 + $0x6c] ss:$16 sps:$4 sm:$0xff]  }
 0x621   : > { %v1914_v41 = vunpack.c.l.b16 %v1866_v38  ;;  %v3889_v42 = vpop.f32.mrb[11].mxu1  ;;  %v4253_v38 = vld [vmem:[#allocation18 + $0xa0] ss:$16 sps:$4 sm:$0xff]   ;;  %v4261_v40 = vld [vmem:[#allocation18 + $0xc4] ss:$16 sps:$4 sm:$0xff]  }
 0x622   : > { %v4259_v42 = vld [vmem:[#allocation18 + $0xc0] ss:$16 sps:$4 sm:$0xff]  }
 0x623   : > { %v1922_v43 = vrot.slane %v1914_v41, 6  ;;  %v4264_v41 = vld [vmem:[#allocation18 + $0xcc] ss:$16 sps:$4 sm:$0xff]  }
 0x625   : > { %v1923_v44 = vsel %vm1350_vm3, %v1922_v43, %v1921_v35  ;;  %v4250_v35 = vld [vmem:[#allocation18 + $0x88] ss:$16 sps:$4 sm:$0xff]  }
 0x626   : > { %v1620_v45 = vpop.f32.mrb[12].mxu1  ;;  %v4262_v43 = vld [vmem:[#allocation18 + $0xc8] ss:$16 sps:$4 sm:$0xff]  }
 0x627   : > { %v1867_v46 = vpack.c.bf16 %v1620_v45, %v1620_v45  ;;  %v3894_v47 = vpop.f32.mrb[13].mxu1  ;;  %v4270_v45 = vld [vmem:[#allocation18 + $0xec] ss:$16 sps:$4 sm:$0xff]  }
 0x628   : > { %v1623_v48 = vpop.f32.mrb[14].mxu1  ;;  %v4268_v47 = vld [vmem:[#allocation18 + $0xe8] ss:$16 sps:$4 sm:$0xff]  }
 0x629   : > { %v1915_v0 = vunpack.c.l.b16 %v1867_v46  ;;  %v3895_v49 = vpop.f32.mrb[15].mxu1  ;;  %v4265_v46 = vld [vmem:[#allocation18 + $0xe0] ss:$16 sps:$4 sm:$0xff]   ;;  %v1830_v48 = vld [vmem:[#allocation2] sm:$0xff] }
 0x62a   : > { %v4276_v49 = vld [vmem:[#allocation21 + $0xc] ss:$16 sps:$4 sm:$0xff]  }
 0x62b   : > { %v1924_v50 = vrot.slane %v1915_v0, 5  ;;  %v4273_v0 = vld [vmem:[#allocation21 + $0x4] ss:$16 sps:$4 sm:$0xff]  }
 0x62d   : > { %v1925_v52 = vsel %vm1352_vm4, %v1924_v50, %v1923_v44  ;;  %v4267_v44 = vld [vmem:[#allocation18 + $0xe4] ss:$16 sps:$4 sm:$0xff]   ;;  %v1831_v50 = vpack.c.bf16 %v1830_v48, %v1830_v48 }
 0x62e   : > { %v1671_v53 = vpop.f32.mrb[16].mxu1 }
 0x62f   : > { %v1868_v54 = vpack.c.bf16 %v1671_v53, %v1671_v53  ;;  %v3900_v55 = vpop.f32.mrb[17].mxu1  ;;  %v4279_v53 = vld [vmem:[#allocation21 + $0x24] ss:$16 sps:$4 sm:$0xff]  }
 0x630   : > { %v1674_v57 = vpop.f32.mrb[18].mxu1  ;;  %v4277_v55 = vld [vmem:[#allocation21 + $0x20] ss:$16 sps:$4 sm:$0xff]  }
 0x631   : > { %v1916_v58 = vunpack.c.l.b16 %v1868_v54  ;;  %v3901_v59 = vpop.f32.mrb[19].mxu1  ;;  %v4282_v54 = vld [vmem:[#allocation21 + $0x2c] ss:$16 sps:$4 sm:$0xff]   ;;  %v4285_v57 = vld [vmem:[#allocation21 + $0x44] ss:$16 sps:$4 sm:$0xff]  }
 0x632   : > { %v4283_v59 = vld [vmem:[#allocation21 + $0x40] ss:$16 sps:$4 sm:$0xff]  }
 0x633   : > { %v1926_v60 = vrot.slane %v1916_v58, 4  ;;  %v4288_v58 = vld [vmem:[#allocation21 + $0x4c] ss:$16 sps:$4 sm:$0xff]  }
 0x635   : > { %v1927_v63 = vsel %vm1354_vm5, %v1926_v60, %v1925_v52  ;;  %v4274_v52 = vld [vmem:[#allocation21 + $0x8] ss:$16 sps:$4 sm:$0xff]  }
 0x636   : > { %v1773_v1 = vpop.f32.mrb[20].mxu1  ;;  %v1929_v2 = vsel %vm1356_vm6, %v1928_v61, %v1927_v63  ;;  %v4286_v60 = vld [vmem:[#allocation21 + $0x48] ss:$16 sps:$4 sm:$0xff]   ;;  %v4291_v61 = vld [vmem:[#allocation21 + $0x64] ss:$16 sps:$4 sm:$0xff]  }
 0x637   : > { %v1870_v3 = vpack.c.bf16 %v1773_v1, %v1773_v1  ;;  %v3912_v4 = vpop.f32.mrb[21].mxu1  ;;  %v4289_v63 = vld [vmem:[#allocation21 + $0x60] ss:$16 sps:$4 sm:$0xff]   ;;  %v4292_v1 = vld [vmem:[#allocation21 + $0x68] ss:$16 sps:$4 sm:$0xff]  }
 0x638   : > { %v1776_v6 = vpop.f32.mrb[22].mxu1  ;;  %v4295_v4 = vld [vmem:[#allocation21 + $0x80] ss:$16 sps:$4 sm:$0xff]  }
 0x639   : > { %v1918_v7 = vunpack.c.l.b16 %v1870_v3  ;;  %v3913_v8 = vpop.f32.mrb[23].mxu1  ;;  %v4300_v3 = vld [vmem:[#allocation21 + $0x8c] ss:$16 sps:$4 sm:$0xff]  }
 0x63a   : > { %v4306_v6 = vld [vmem:[#allocation21 + $0xac] ss:$16 sps:$4 sm:$0xff]   ;;  %v4304_v8 = vld [vmem:[#allocation21 + $0xa8] ss:$16 sps:$4 sm:$0xff]  }
 0x63b   : > { %v1930_v9 = vrot.slane %v1918_v7, 2  ;;  %v4301_v7 = vld [vmem:[#allocation21 + $0xa0] ss:$16 sps:$4 sm:$0xff]  }
 0x63d   : > { %v1931_v13 = vsel %vm1358_vm7, %v1930_v9, %v1929_v2  ;;  %v4297_v2 = vld [vmem:[#allocation21 + $0x84] ss:$16 sps:$4 sm:$0xff]  }
 0x63e   : > { %v1933_v18 = vsel %vm1360_vm8, %v1932_v10, %v1931_v13  ;;  %v4309_v9 = vld [vmem:[#allocation21 + $0xc4] ss:$16 sps:$4 sm:$0xff]   ;;  %v4312_v10 = vld [vmem:[#allocation21 + $0xcc] ss:$16 sps:$4 sm:$0xff]   ;;  %v4307_v13 = vld [vmem:[#allocation21 + $0xc0] ss:$16 sps:$4 sm:$0xff]  }
 0x63f   : > { %v1934_v19 = vpack.c.b16 %v1933_v18, %v1933_v18  ;;  %v4318_v18 = vld [vmem:[#allocation21 + $0xec] ss:$16 sps:$4 sm:$0xff]  }
 0x641   : > { %2129 = vmatmul.mubr.bf16.vlgmr.msra.gmra.mrb[24].mxu1 %v1934_v19  ;;  %2783 = vst [vmem:[#allocation3] sm:$0xf] %v1934_v19  ;;  %2170 = vmatmul.mubr.bf16.vlgmr.msra.gmra.mrb[12].mxu0 %v1934_v19  ;;  %v4313_v19 = vld [vmem:[#allocation21 + $0xe0] ss:$16 sps:$4 sm:$0xff]  }
 0x642   : > { %2339 = vmatpush1.bf16.msra.mxu1 %v4223_v15  ;;  %2380 = vmatpush1.bf16.msra.mxu0 %v4226_v17  ;;  %v4310_v15 = vld [vmem:[#allocation21 + $0xc8] ss:$16 sps:$4 sm:$0xff]   ;;  %v4315_v17 = vld [vmem:[#allocation21 + $0xe4] ss:$16 sps:$4 sm:$0xff]  }
 0x643   : > { %2340 = vmatprep.subr.bf16.mxu1 %v4231_v20  ;;  %2381 = vmatprep.subr.bf16.mxu0 %v4234_v21  ;;  %v4316_v20 = vld [vmem:[#allocation21 + $0xe8] ss:$16 sps:$4 sm:$0xff]  }
 0x644   : > { %2370 = vmatprep.mubr.bf16.mxu1 %v5111_v12  ;;  %2411 = vmatprep.mubr.bf16.mxu0 %v5111_v12 }
 0x646   : > { %2341 = vmatpush1.bf16.msra.mxu1 %v4229_v22  ;;  %2382 = vmatpush1.bf16.msra.mxu0 %v4232_v23 }
 0x647   : > { %2342 = vmatprep.subr.bf16.mxu1 %v4237_v24  ;;  %2383 = vmatprep.subr.bf16.mxu0 %v4240_v25 }
 0x64a   : > { %2343 = vmatpush1.bf16.msra.mxu1 %v4235_v27  ;;  %2384 = vmatpush1.bf16.msra.mxu0 %v4238_v28 }
 0x64b   : > { %2344 = vmatprep.subr.bf16.mxu1 %v4243_v29  ;;  %2385 = vmatprep.subr.bf16.mxu0 %v4246_v30 }
 0x64e   : > { %2345 = vmatpush1.bf16.msra.mxu1 %v4241_v31  ;;  %2386 = vmatpush1.bf16.msra.mxu0 %v4244_v32 }
 0x64f   : > { %2346 = vmatprep.subr.bf16.mxu1 %v4249_v33  ;;  %2387 = vmatprep.subr.bf16.mxu0 %v4252_v14 }
 0x652   : > { %2347 = vmatpush1.bf16.msra.mxu1 %v4247_v34  ;;  %2388 = vmatpush1.bf16.msra.mxu0 %v4250_v35 }
 0x653   : > { %2348 = vmatprep.subr.bf16.mxu1 %v4255_v36  ;;  %2389 = vmatprep.subr.bf16.mxu0 %v4258_v37 }
 0x656   : > { %2349 = vmatpush1.bf16.msra.mxu1 %v4253_v38  ;;  %2390 = vmatpush1.bf16.msra.mxu0 %v4256_v39 }
 0x657   : > { %2350 = vmatprep.subr.bf16.mxu1 %v4261_v40  ;;  %2391 = vmatprep.subr.bf16.mxu0 %v4264_v41  ;;  %v2698_v40 = vld [vmem:[%s6271_s18] sm:$0xf]  ;;  %v2706_v41 = vsub.s32 1, %v5835_v16 }
 0x65a   : > { %2351 = vmatpush1.bf16.msra.mxu1 %v4259_v42  ;;  %2392 = vmatpush1.bf16.msra.mxu0 %v4262_v43  ;;  %v2703_v42 = vrot.slane %v2698_v40, %v5845_v26 }
 0x65b   : > { %2352 = vmatprep.subr.bf16.mxu1 %v4267_v44  ;;  %2393 = vmatprep.subr.bf16.mxu0 %v4270_v45  ;;  %v2707_v45 = vrot.slane %v2698_v40, %v2706_v41 }
 0x65e   : > { %2353 = vmatpush1.bf16.msra.mxu1 %v4265_v46  ;;  %2394 = vmatpush1.bf16.msra.mxu0 %v4268_v47 }
 0x65f   : > { %2612 = vmatprep.subr.bf16.mxu1 %v4273_v0  ;;  %2653 = vmatprep.subr.bf16.mxu0 %v4276_v49 }
 0x661   : > { %2371 = vmatmul.mubr.bf16.vlgmr.msra.gmra.mrb[28].mxu1 %v1831_v50  ;;  %2412 = vmatmul.mubr.bf16.vlgmr.msra.gmra.mrb[16].mxu0 %v1831_v50 }
 0x662   : > { %2613 = vmatpush1.bf16.msra.mxu1 %v4271_v51  ;;  %2654 = vmatpush1.bf16.msra.mxu0 %v4274_v52  ;;  %v2714_v51 = vsub.s32 3, %v5835_v16 }
 0x663   : > { %2614 = vmatprep.subr.bf16.mxu1 %v4279_v53  ;;  %2655 = vmatprep.subr.bf16.mxu0 %v4282_v54 }
 0x664   : > { %2644 = vmatprep.mubr.bf16.mxu1 %v5111_v12  ;;  %2685 = vmatprep.mubr.bf16.mxu0 %v5111_v12  ;;  %v4298_v12 = vld [vmem:[#allocation21 + $0x88] ss:$16 sps:$4 sm:$0xff]   ;;  %v2715_v26 = vrot.slane %v2698_v40, %v2714_v51 }
 0x666   : > { %2615 = vmatpush1.bf16.msra.mxu1 %v4277_v55  ;;  %2656 = vmatpush1.bf16.msra.mxu0 %v4280_v56 }
 0x667   : > { %2616 = vmatprep.subr.bf16.mxu1 %v4285_v57  ;;  %2657 = vmatprep.subr.bf16.mxu0 %v4288_v58 }
 0x66a   : > { %2617 = vmatpush1.bf16.msra.mxu1 %v4283_v59  ;;  %2658 = vmatpush1.bf16.msra.mxu0 %v4286_v60  ;;  %v2710_v60 = vsub.s32 2, %v5835_v16 }
 0x66b   : > { %2618 = vmatprep.subr.bf16.mxu1 %v4291_v61  ;;  %2659 = vmatprep.subr.bf16.mxu0 %v4294_v62 }
 0x66c   : > { %v2711_v62 = vrot.slane %v2698_v40, %v2710_v60 }
 0x66e   : > { %2619 = vmatpush1.bf16.msra.mxu1 %v4289_v63  ;;  %2660 = vmatpush1.bf16.msra.mxu0 %v4292_v1 }
 0x66f   : > { %2620 = vmatprep.subr.bf16.mxu1 %v4297_v2  ;;  %2661 = vmatprep.subr.bf16.mxu0 %v4300_v3 }
 0x672   : > { %2621 = vmatpush1.bf16.msra.mxu1 %v4295_v4  ;;  %2662 = vmatpush1.bf16.msra.mxu0 %v4298_v12 }
 0x673   : > { %2622 = vmatprep.subr.bf16.mxu1 %v4303_v5  ;;  %2663 = vmatprep.subr.bf16.mxu0 %v4306_v6 }
 0x676   : > { %2623 = vmatpush1.bf16.msra.mxu1 %v4301_v7  ;;  %2664 = vmatpush1.bf16.msra.mxu0 %v4304_v8  ;;  %v1047_v7 = vld [vmem:[#allocation15] sm:$0xff] }
 0x677   : > { %2624 = vmatprep.subr.bf16.mxu1 %v4309_v9  ;;  %2665 = vmatprep.subr.bf16.mxu0 %v4312_v10 }
 0x67a   : > { %2625 = vmatpush1.bf16.msra.mxu1 %v4307_v13  ;;  %2666 = vmatpush1.bf16.msra.mxu0 %v4310_v15 }
 0x67b   : > { %2626 = vmatprep.subr.bf16.mxu1 %v4315_v17  ;;  %2667 = vmatprep.subr.bf16.mxu0 %v4318_v18 }
 0x67e   : > { %2627 = vmatpush1.bf16.msra.mxu1 %v4313_v19  ;;  %2668 = vmatpush1.bf16.msra.mxu0 %v4316_v20 }
 0x681   : > { %2645 = vmatmul.mubr.bf16.vlgmr.msra.gmra.mrb[32].mxu1 %v5828_v11  ;;  %2686 = vmatmul.mubr.bf16.vlgmr.msra.gmra.mrb[20].mxu0 %v5828_v11 }
 0x714   : > { %v2130_v21 = vpop.f32.mrb[24].mxu1  ;;  %v2171_v22 = vpop.f32.mrb[12].mxu0 }
 0x715   : > { %v2132_v23 = vpop.f32.mrb[25].mxu1  ;;  %v2173_v24 = vpop.f32.mrb[13].mxu0 }
 0x716   : > { %v2134_v25 = vpop.f32.mrb[26].mxu1  ;;  %v2175_v27 = vpop.f32.mrb[14].mxu0 }
 0x717   : > { %v2135_v28 = vpop.f32.mrb[27].mxu1  ;;  %v2176_v29 = vpop.f32.mrb[15].mxu0 }
 0x734   : > { %v2372_v30 = vpop.f32.mrb[28].mxu1  ;;  %v2413_v31 = vpop.f32.mrb[16].mxu0 }
 0x735   : > { %v2373_v32 = vadd.f32 %v2372_v30, %v2130_v21  ;;  %v2414_v33 = vadd.f32 %v2413_v31, %v2171_v22  ;;  %v2374_v14 = vpop.f32.mrb[29].mxu1  ;;  %v2415_v34 = vpop.f32.mrb[17].mxu0 }
 0x736   : > { %v2375_v35 = vadd.f32 %v2374_v14, %v2132_v23  ;;  %v2416_v36 = vadd.f32 %v2415_v34, %v2173_v24  ;;  %v2376_v37 = vpop.f32.mrb[30].mxu1  ;;  %v2417_v38 = vpop.f32.mrb[18].mxu0 }
 0x737   : > { %v2377_v39 = vpop.f32.mrb[31].mxu1  ;;  %v2418_v11 = vpop.f32.mrb[19].mxu0 }
 0x754   : > { %v2646_v43 = vpop.f32.mrb[32].mxu1  ;;  %v2687_v44 = vpop.f32.mrb[20].mxu0 }
 0x755   : > { %v2694_v46 = vadd.f32 %v2646_v43, %v2373_v32  ;;  %v2696_v47 = vadd.f32 %v2687_v44, %v2414_v33  ;;  %v2648_v48 = vpop.f32.mrb[33].mxu1  ;;  %v2689_v0 = vpop.f32.mrb[21].mxu0 }
 0x756   : > { %v2695_v49 = vadd.f32 %v2648_v48, %v2375_v35  ;;  %v2697_v50 = vadd.f32 %v2689_v0, %v2416_v36  ;;  %v2650_v52 = vpop.f32.mrb[34].mxu1  ;;  %v2691_v53 = vpop.f32.mrb[22].mxu0 }
 0x757   : > { %v2720_v54 = vadd.f32 %v2703_v42, %v2694_v46  ;;  %v2651_v55 = vpop.f32.mrb[35].mxu1  ;;  %v2692_v56 = vpop.f32.mrb[23].mxu0  ;;  %v2722_v1 = vadd.f32 %v2711_v62, %v2696_v47 }
 0x758   : > { %v2721_v57 = vadd.f32 %v2707_v45, %v2695_v49  ;;  %v2723_v61 = vadd.f32 %v2715_v26, %v2697_v50 }
 0x759   : > { %v3735_v58 = vmul.f32 -1.442695, %v2720_v54 }
 0x75a   : > { %v3736_v59 = vmul.f32 -1.442695, %v2721_v57  ;;  %v3737_v63 = vmul.f32 -1.442695, %v2723_v61 }
 0x75b   : > { %4339 = vpow2.f32 %v3735_v58 }
 0x75c   : > { %4341 = vpow2.f32 %v3736_v59 }
 0x75d   : > { %4343 = vpow2.f32 %v3737_v63 }
 0x75e   : > { %4345 = vtanh.f32 %v2722_v1 }
 0x765   : > { %v4340_v2 = vpop.eup %4339 }
 0x766   : > { %v4342_v3 = vpop.eup %4341  ;;  %v2727_v4 = vadd.f32 1.0, %v4340_v2 }
 0x767   : > { %v2733_v12 = vadd.f32 1.0, %v4342_v3  ;;  %v4344_v5 = vpop.eup %4343 }
 0x768   : > { %4347 = vrcp.f32 %v2727_v4  ;;  %v4346_v6 = vpop.eup %4345  ;;  %v2740_v16 = vadd.f32 1.0, %v4344_v5 }
 0x769   : > { %4349 = vrcp.f32 %v2733_v12 }
 0x76a   : > { %4351 = vrcp.f32 %v2740_v16 }
 0x772   : > { %v4348_v8 = vpop.eup %4347 }
 0x773   : > { %v4350_v9 = vpop.eup %4349  ;;  %v2744_v10 = vmul.f32 %v4348_v8, %v4346_v6 }
 0x774   : > { %v2743_v13 = vmul.f32 %v4350_v9, %v1047_v7  ;;  %v4352_v17 = vpop.eup %4351 }
 0x776   : > { %v2745_v15 = vadd.f32 %v2744_v10, %v2743_v13 }
 0x778   : > { %4353 = vtanh.f32 %v2745_v15  ;;  %2749 = vst [vmem:[#allocation28] sm:$0xff] %v2745_v15 }
 0x782   : > { %v4354_v18 = vpop.eup %4353 }
 0x783   : > { %v2747_v19 = vmul.f32 %v4354_v18, %v4352_v17 }
 0x785   : > { %2748 = vst [vmem:[#allocation27] sm:$0xff] %v2747_v19  ;;  %v2784_v20 = vpack.c.bf16 %v2747_v19, %v2747_v19 }
 0x787   : > { %2785 = vst [vmem:[#allocation4] sm:$0xf] %v2784_v20 }
 0x788 PF: > { %v4356_v21 = vld [vmem:[%s5662_s17] sm:$0xff]   ;;  %v5112_v22 = vmov 0.0   ;;  %v4358_v24 = vld [vmem:[%s5662_s17 + $0x8] sm:$0xff]   ;;  %vm5113_vm12 = vmmov 0   ;;  %v4360_v27 = vld [vmem:[%s5662_s17 + $0x10] sm:$0xff]   ;;  %v3115_v57 = vlaneseq  ;;  %s6273_s2 = sld [smem:[#allocation93_spill]] }
 0x789   : > { %3920 = vmatprep.subr.bf16.mxu0 %v5112_v22  ;;  %3940 = vmatprep.subr.bf16.mxu1 %v5112_v22  ;;  %v4357_v23 = vld [vmem:[%s5656_s21] sm:$0xff]   ;;  %v4359_v25 = vld [vmem:[%s5656_s21 + $0x8] sm:$0xff]   ;;  %v4361_v28 = vld [vmem:[%s5656_s21 + $0x10] sm:$0xff]   ;;  %v5114_v12 = vmov 0   ;;  %vm3142_vm14 = vcmask 7168  }
 0x78a   : > { %3921 = vmatpush3.bf16.msra.mxu0 %v4356_v21  ;;  %3936 = vmatprep.mubr.msk.bf16.mxu0 %vm5113_vm12, %v5112_v22  ;;  %v4362_v29 = vld [vmem:[%s5662_s17 + $0x18] sm:$0xff]   ;;  %v4364_v31 = vld [vmem:[%s5662_s17 + $0x20] sm:$0xff]   ;;  %v4366_v33 = vld [vmem:[%s5662_s17 + $0x28] sm:$0xff]   ;;  %v3116_v58 = vand.u32 127, %v3115_v57 }
 0x78b   : > { %3941 = vmatpush3.bf16.msra.mxu1 %v4357_v23  ;;  %3922 = vmatprep.subr.bf16.mxu0 %v5112_v22  ;;  %v4363_v30 = vld [vmem:[%s5656_s21 + $0x18] sm:$0xff]   ;;  %v4365_v32 = vld [vmem:[%s5656_s21 + $0x20] sm:$0xff]   ;;  %v4367_v14 = vld [vmem:[%s5656_s21 + $0x28] sm:$0xff]  }
 0x78c   : > { %3942 = vmatprep.subr.bf16.mxu1 %v5112_v22  ;;  %3956 = vmatprep.mubr.msk.bf16.mxu1 %vm5113_vm12, %v5112_v22  ;;  %v4368_v34 = vld [vmem:[%s5662_s17 + $0x30] sm:$0xff]   ;;  %v4370_v36 = vld [vmem:[%s5662_s17 + $0x38] sm:$0xff]   ;;  %v2807_v39 = vld [vmem:[#allocation3] sm:$0xf] }
 0x78d   : > { %v4369_v35 = vld [vmem:[%s5656_s21 + $0x30] sm:$0xff]   ;;  %v4371_v37 = vld [vmem:[%s5656_s21 + $0x38] sm:$0xff]   ;;  %v4372_v40 = vld [vmem:[%s5665_s3] sm:$0xff]   ;;  %s6272_s21 = sld [smem:[#allocation71_spill]]  ;;  %4355 = vset.pattern.permute.xlu0 %v5114_v12 }
 0x78e   : > { %3923 = vmatpush3.bf16.msra.mxu0 %v4358_v24  ;;  %v2789_v38 = vld [vmem:[#allocation2] sm:$0xff]  ;;  %v4373_v41 = vld [vmem:[%s5665_s3 + $0x8] sm:$0xff]   ;;  %v4374_v42 = vld [vmem:[%s5665_s3 + $0x10] sm:$0xff]   ;;  %s6274_s23 = scalar_lea.vmem %s6273_s2, %s5674_s28 }
 0x78f   : > { %3943 = vmatpush3.bf16.msra.mxu1 %v4359_v25  ;;  %3924 = vmatprep.subr.bf16.mxu0 %v5112_v22  ;;  %v2790_v11 = vpack.c.bf16 %v2789_v38, %v2789_v38  ;;  %v4375_v43 = vld [vmem:[%s5665_s3 + $0x18] sm:$0xff]   ;;  %v4376_v44 = vld [vmem:[%s5665_s3 + $0x20] sm:$0xff]   ;;  %v4377_v45 = vld [vmem:[%s5665_s3 + $0x28] sm:$0xff]  }
 0x790   : > { %3944 = vmatprep.subr.bf16.mxu1 %v5112_v22  ;;  %v4378_v46 = vld [vmem:[%s5665_s3 + $0x30] sm:$0xff]   ;;  %v4379_v47 = vld [vmem:[%s5665_s3 + $0x38] sm:$0xff]   ;;  %v3000_v48 = vld [vmem:[#allocation4] sm:$0xf] }
 0x791   : > { %v3770_v61 = vld [vmem:[%s6274_s23] ss:$0 sm:$0xff]  ;;  %v3124_v5 = vld [vmem:[#allocation5] sm:$0xff]  ;;  %v3126_v18 = vld [vmem:[#allocation6] sm:$0xff] }
 0x792   : > { %3925 = vmatpush3.bf16.msra.mxu0 %v4360_v27 }
 0x793   : > { %3945 = vmatpush3.bf16.msra.mxu1 %v4361_v28  ;;  %3926 = vmatprep.subr.bf16.mxu0 %v5112_v22  ;;  %s3771_s17 = sshll.u32 %s6272_s21, 7  ;;  %p3772_p7 = scmp.ne.s32.totalorder %s6272_s21, 1 }
 0x794   : > { %3946 = vmatprep.subr.bf16.mxu1 %v5112_v22  ;;  %v3117_v59 = vstv %s3771_s17  ;;  %s6275_s24 = sld [smem:[#allocation98_spill]] (!%p3772_p7) }
 0x795   : > { %v3118_v26 = vadd.s32 %v3117_v59, %v3116_v58 }
 0x796   : > { %3927 = vmatpush3.bf16.msra.mxu0 %v4362_v29 }
 0x797   : > { %3947 = vmatpush3.bf16.msra.mxu1 %v4363_v30  ;;  %3928 = vmatprep.subr.bf16.mxu0 %v5112_v22  ;;  %vm3119_vm13 = vcmp.lt.s32.totalorder %v3118_v26, 200 }
 0x798   : > { %3948 = vmatprep.subr.bf16.mxu1 %v5112_v22 }
 0x79a   : > { %3929 = vmatpush3.bf16.msra.mxu0 %v4364_v31 }
 0x79b   : > { %3949 = vmatpush3.bf16.msra.mxu1 %v4365_v32  ;;  %3930 = vmatprep.subr.bf16.mxu0 %v5112_v22 }
 0x79c   : > { %3950 = vmatprep.subr.bf16.mxu1 %v5112_v22 }
 0x79e   : > { %3931 = vmatpush3.bf16.msra.mxu0 %v4366_v33 }
 0x79f   : > { %3951 = vmatpush3.bf16.msra.mxu1 %v4367_v14  ;;  %3932 = vmatprep.subr.bf16.mxu0 %v5112_v22 }
 0x7a0   : > { %3952 = vmatprep.subr.bf16.mxu1 %v5112_v22 }
 0x7a2   : > { %3933 = vmatpush3.bf16.msra.mxu0 %v4368_v34 }
 0x7a3   : > { %3953 = vmatpush3.bf16.msra.mxu1 %v4369_v35  ;;  %3934 = vmatprep.subr.bf16.mxu0 %v5112_v22 }
 0x7a4   : > { %3954 = vmatprep.subr.bf16.mxu1 %v5112_v22 }
 0x7a6   : > { %3935 = vmatpush3.bf16.msra.mxu0 %v4370_v36 }
 0x7a7   : > { %3955 = vmatpush3.bf16.msra.mxu1 %v4371_v37  ;;  %3960 = vmatprep.subr.bf16.mxu0 %v5112_v22 }
 0x7a9   : > { %3937 = vmatmul.mubr.bf16.vlgmr.msra.gmra.mrb[0].mxu0 %v2807_v39 }
 0x7aa   : > { %3957 = vmatmul.mubr.bf16.vlgmr.msra.gmra.mrb[0].mxu1 %v2790_v11  ;;  %3961 = vmatpush3.bf16.msra.mxu0 %v4372_v40 }
 0x7ab   : > { %3962 = vmatprep.subr.bf16.mxu0 %v5112_v22  ;;  %3976 = vmatprep.mubr.msk.bf16.mxu0 %vm5113_vm12, %v5112_v22 }
 0x7ae   : > { %3963 = vmatpush3.bf16.msra.mxu0 %v4373_v41 }
 0x7af   : > { %3964 = vmatprep.subr.bf16.mxu0 %v5112_v22 }
 0x7b2   : > { %3965 = vmatpush3.bf16.msra.mxu0 %v4374_v42 }
 0x7b3   : > { %3966 = vmatprep.subr.bf16.mxu0 %v5112_v22 }
 0x7b6   : > { %3967 = vmatpush3.bf16.msra.mxu0 %v4375_v43 }
 0x7b7   : > { %3968 = vmatprep.subr.bf16.mxu0 %v5112_v22 }
 0x7ba   : > { %3969 = vmatpush3.bf16.msra.mxu0 %v4376_v44 }
 0x7bb   : > { %3970 = vmatprep.subr.bf16.mxu0 %v5112_v22 }
 0x7be   : > { %3971 = vmatpush3.bf16.msra.mxu0 %v4377_v45 }
 0x7bf   : > { %3972 = vmatprep.subr.bf16.mxu0 %v5112_v22 }
 0x7c2   : > { %3973 = vmatpush3.bf16.msra.mxu0 %v4378_v46 }
 0x7c3   : > { %3974 = vmatprep.subr.bf16.mxu0 %v5112_v22 }
 0x7c6   : > { %3975 = vmatpush3.bf16.msra.mxu0 %v4379_v47 }
 0x7c9   : > { %3977 = vmatmul.mubr.bf16.vlgmr.msra.gmra.mrb[4].mxu0 %v3000_v48 }
 0x87c   : > { %v2906_v0 = vpop.f32.mrb[0].mxu0 }
 0x87d   : > { %v3938_v49 = vpop.f32.mrb[1].mxu0  ;;  %v2994_v50 = vpop.f32.mrb[0].mxu1 }
 0x87e   : > { %v2995_v51 = vadd.f32 %v2994_v50, %v2906_v0  ;;  %v2909_v52 = vpop.f32.mrb[2].mxu0  ;;  %v3958_v53 = vpop.f32.mrb[1].mxu1 }
 0x87f   : > { %v3939_v54 = vpop.f32.mrb[3].mxu0  ;;  %v2997_v55 = vpop.f32.mrb[2].mxu1 }
 0x880   : > { %v3959_v56 = vpop.f32.mrb[3].mxu1 }
 0x89c   : > { %v3099_v60 = vpop.f32.mrb[4].mxu0 }
 0x89d   : > { %v3105_v62 = vadd.f32 %v3099_v60, %v2995_v51  ;;  %v3978_v63 = vpop.f32.mrb[5].mxu0 }
 0x89e   : > { %v3102_v1 = vpop.f32.mrb[6].mxu0 }
 0x89f   : > { %v3113_v2 = vadd.f32 %v3770_v61, %v3105_v62  ;;  %v3979_v3 = vpop.f32.mrb[7].mxu0 }
 0x8a1   : > { %v3120_v4 = vsel %vm3119_vm13, %v3113_v2, -1e+30 }
 0x8a2   : > { %3122 = vmax.xlane.f32.xlu0 %v3120_v4  ;;  %3121 = vst [vmem:[%s5680_s19] sm:$0xff] %v3120_v4 }
 0x92f   : > { %v3123_v6 = vpop.xlane.xlu0 %3122 }
 0x930   : > { %v3125_v7 = vmax.f32 %v3124_v5, %v3123_v6 }
 0x932   : > { %v3127_v8 = vsub.f32 %v3124_v5, %v3125_v7  ;;  %3144 = vst.msk [vmem:[#allocation5] sm:$0xff] %vm3142_vm14, %v3125_v7  ;;  %3133 = vperm.xlu0 %4355, %v3125_v7  }
 0x934   : > { %v3128_v15 = vmul.f32 1.442695, %v3127_v8 }
 0x939   : > { %v3149_v24 = vld [vmem:[#allocation5] sm:$0xff] (!%p3772_p7) }
 0x9b1   : > { %v3134_v9 = vpop.permute.xlu0 %3133 }
 0x9b2   : > { %v3136_v10 = vsub.f32 %v3120_v4, %v3134_v9 }
 0x9b4   : > { %v3137_v16 = vmul.f32 1.442695, %v3136_v10 }
 0x9b6   : > { %4380 = vpow2.f32 %v3137_v16 }
 0x9b7   : > { %4382 = vpow2.f32 %v3128_v15 }
 0x9c0   : > { %v4381_v13 = vpop.eup %4380 }
 0x9c1   : > { %3139 = vadd.xlane.f32.xlu1 %v4381_v13  ;;  %v4383_v17 = vpop.eup %4382 }
 0x9c2   : > { %v3130_v19 = vmul.f32 %v4383_v17, %v3126_v18 }
 0xa4b   : > { %3148 = sbr.rel (%p3772_p7) target bundleno = 2665 (0xa69), region = 160 }
 0xa4e   : > { %v3140_v20 = vpop.xlane.xlu1 %3139 }
 0xa4f   : > { %v3141_v21 = vadd.f32 %v3140_v20, %v3130_v19 }
 0xa51   : > { %3143 = vst.msk [vmem:[#allocation6] sm:$0xff] %vm3142_vm14, %v3141_v21 }
 0xa58   : > { %v3150_v22 = vld [vmem:[#allocation6] sm:$0xff] }
 0xa59   : > { %4384 = vlog2.f32 %v3150_v22 }
 0xa63   : > { %v4385_v23 = vpop.eup %4384 }
 0xa64   : > { %v3152_v25 = vmul.f32 0.6931472, %v4385_v23 }
 0xa66   : > { %v3153_v27 = vadd.f32 %v3152_v25, %v3149_v24 }
 0xa68   : > { %3154 = vst.msk [vmem:[%s6275_s24] sm:$0xff] %vm3142_vm14, %v3153_v27 }
 0xa69 PF: > { %s5115_s7 = smov [#allocation28]   ;;  %s5116_s1 = smov [#allocation27]  }
 0xa6a   : > { %s3186_s20 = sshll.u32 %s5115_s7, 4  ;;  %s3173_s30 = sshll.u32 %s5116_s1, 4  ;;  %s3187_s20 = int_to_ptr.vmem [resolvable:$true] %s3186_s20  ;;  %s3174_s30 = int_to_ptr.vmem [resolvable:$true] %s3173_s30 }
 0xa6b   : > { %s4874_s5 = scalar_lea.vmem %s3187_s20, 128  ;;  %p6276_p13 = scmp.eq.s32.totalorder %s5272_s26, 1 }
 0xa6c   : > { %p4875_p4 = scmp.ne.s32.totalorder %s3187_s20, %s4874_s5  ;;  %p4881_p10 = scmp.lt.s32.totalorder %s3187_s20, %s3187_s20 }
 0xa6d   : > { %p4882_p3 = scmp.lt.s32.totalorder %s4874_s5, %s4874_s5 }
 0xa6e   : > { %p4876_p0 = pnand %p4875_p4, %p6276_p13 }
 0xa6f   : > { %p4883_p2 = por %p4882_p3, %p4881_p10 }
 0xa70   : > { %p4877_p6 = pneg %p4876_p0 }
 0xa72   : > { %p4884_p12 = pnand %p4883_p2, %p4877_p6 }
 0xa74   : > { %4887 = shalt.err (!%p4884_p12)
}
 0xa75   : > { %s6277_s8 = sld [smem:[#allocation95_spill]]  ;;  %p6278_p8 = pmov %p6276_p13 }
 0xa7b   : > { %s4888_s9 = scalar_lea.hbm %s6277_s8, 128 }
 0xa7c   : > { %p4889_p5 = scmp.ne.s32.totalorder %s6277_s8, %s4888_s9  ;;  %p4894_p9 = scmp.lt.u32.totalorder %s4888_s9, %s6277_s8 }
 0xa7e   : > { %p4890_p11 = pnand %p4889_p5, %p6278_p8 }
 0xa80   : > { %p4891_p1 = pneg %p4890_p11 }
 0xa82   : > { %p4896_p7 = pnand %p4894_p9, %p4891_p1 }
 0xa84   : > { %4899 = shalt.err (!%p4896_p7)
}
 0xa85   : > { %p6279_p4 = pmov %p6278_p8  ;;  %s4900_s3 = scalar_lea.vmem %s3174_s30, 128 }
 0xa86   : > { %p4901_p13 = scmp.ne.s32.totalorder %s3174_s30, %s4900_s3  ;;  %p4907_p3 = scmp.lt.s32.totalorder %s3174_s30, %s3174_s30 }
 0xa87   : > { %4017 = dma.vmem_to_hbm [thread:$0]  (%p6279_p4), %s3187_s20, 128, %s6277_s8, [#allocation29]  }
 0xa88   : > { %p6280_p0 = pmov %p6279_p4  ;;  %p4908_p2 = scmp.lt.s32.totalorder %s4900_s3, %s4900_s3 }
 0xa8a   : > { %p4902_p6 = pnand %p4901_p13, %p6280_p0  ;;  %p4909_p12 = por %p4908_p2, %p4907_p3 }
 0xa8c   : > { %p4903_p10 = pneg %p4902_p6 }
 0xa8e   : > { %p4910_p5 = pnand %p4909_p12, %p4903_p10 }
 0xa90   : > { %4913 = shalt.err (!%p4910_p5)
}
 0xa91   : > { %s6281_s23 = sld [smem:[#allocation94_spill]]  ;;  %p6283_p11 = pmov %p6280_p0 }
 0xa97   : > { %s6282_s28 = smov %s6281_s23  ;;  %s4914_s6 = scalar_lea.hbm %s6281_s23, 128 }
 0xa98   : > { %p4915_p8 = scmp.ne.s32.totalorder %s6282_s28, %s4914_s6  ;;  %p4920_p7 = scmp.lt.u32.totalorder %s4914_s6, %s6282_s28 }
 0xa9a   : > { %p4916_p1 = pnand %p4915_p8, %p6283_p11 }
 0xa9c   : > { %p4917_p9 = pneg %p4916_p1 }
 0xa9e   : > { %p4922_p4 = pnand %p4920_p7, %p4917_p9 }
 0xaa0   : > { %4925 = shalt.err (!%p4922_p4)
}
 0xaa1   : > { %p6284_p13 = pmov %p6280_p0  ;;  %s5117_s9 = smov [#allocation30]  }
 0xaa2   : > { %s3199_s29 = sshll.u32 %s5117_s9, 4  ;;  %s6286_s27 = sld [smem:[#allocation97_spill]]  ;;  %s3200_s29 = int_to_ptr.vmem [resolvable:$true] %s3199_s29 }
 0xaa3   : > { %4015 = dma.vmem_to_hbm [thread:$0]  (%p6284_p13), %s3174_s30, 128, %s6282_s28, [#allocation12]  }
 0xaa4   : > { %s4926_s21 = scalar_lea.vmem %s3200_s29, 128  ;;  %p6287_p6 = pmov %p6283_p11 }
 0xaa5   : > { %p4927_p0 = scmp.ne.s32.totalorder %s3200_s29, %s4926_s21  ;;  %p4933_p2 = scmp.lt.s32.totalorder %s3200_s29, %s3200_s29 }
 0xaa6   : > { %p4934_p12 = scmp.lt.s32.totalorder %s4926_s21, %s4926_s21 }
 0xaa7   : > { %p4928_p10 = pnand %p4927_p0, %p6287_p6 }
 0xaa8   : > { %s6053_s18 = scalar_lea.hbm %s6286_s27, %s3771_s17  ;;  %p4935_p5 = por %p4934_p12, %p4933_p2 }
 0xaa9   : > { %p4929_p3 = pneg %p4928_p10 }
 0xaab   : > { %p4936_p8 = pnand %p4935_p5, %p4929_p3 }
 0xaad   : > { %4939 = shalt.err (!%p4936_p8)
}
 0xaae   : > { %s6288_s10 = sld [smem:[#allocation96_spill]]  ;;  %p6289_p1 = pmov %p6287_p6 }
 0xab4   : > { %s4940_s2 = scalar_lea.hbm %s6288_s10, 128 }
 0xab5   : > { %p4941_p11 = scmp.ne.s32.totalorder %s6288_s10, %s4940_s2  ;;  %p4946_p4 = scmp.lt.u32.totalorder %s4940_s2, %s6288_s10 }
 0xab7   : > { %p4942_p9 = pnand %p4941_p11, %p6289_p1 }
 0xab9   : > { %p4943_p7 = pneg %p4942_p9 }
 0xabb   : > { %p4948_p13 = pnand %p4946_p4, %p4943_p7 }
 0xabd   : > { %4951 = shalt.err (!%p4948_p13)
}
 0xabe   : > { %p6290_p0 = pmov %p6289_p1  ;;  %s6291_s1 = sld [smem:[#allocation76_spill]] }
 0xabf   : > { %s3214_s5 = sshll.u32 %s5680_s19, 4  ;;  %s3156_s12 = scalar_lea.sflag [#allocation32], %s5653_s4  ;;  %s3215_s5 = int_to_ptr.vmem [resolvable:$true] %s3214_s5 }
 0xac0   : > { %4019 = dma.vmem_to_hbm [thread:$0]  (%p6290_p0), %s3200_s29, 128, %s6288_s10, [#allocation29]  }
 0xac1   : > { %s4952_s16 = scalar_lea.vmem %s3215_s5, 128  ;;  %s5118_s9 = smov [#allocation31]  }
 0xac2   : > { %p4953_p6 = scmp.ne.s32.totalorder %s3215_s5, %s4952_s16  ;;  %s4956_s11 = sshll.u32 %s5118_s9, 4  ;;  %s4957_s11 = int_to_ptr.vmem [resolvable:$false] %s4956_s11 }
 0xac3   : > { %s4958_s0 = scalar_lea.vmem %s4957_s11, 256  ;;  %p4959_p12 = scmp.lt.s32.totalorder %s3215_s5, %s4957_s11 }
 0xac4   : > { %p6292_p10 = scmp.ne.s32.totalorder %s6291_s1, 0  ;;  %p4960_p5 = scmp.lt.s32.totalorder %s4958_s0, %s4952_s16 }
 0xac6   : > { %p4954_p3 = pnand %p4953_p6, %p6292_p10  ;;  %p4961_p8 = por %p4960_p5, %p4959_p12 }
 0xac8   : > { %p4955_p2 = pneg %p4954_p3 }
 0xaca   : > { %p4962_p11 = pnand %p4961_p8, %p4955_p2 }
 0xacc   : > { %4965 = shalt.err (!%p4962_p11)
}
 0xacd   : > { %s4966_s4 = scalar_lea.hbm %s6053_s18, 128  ;;  %s4970_s21 = scalar_lea.hbm %s6286_s27, 256 }
 0xace   : > { %p4967_p1 = scmp.ne.s32.totalorder %s6053_s18, %s4966_s4  ;;  %p4971_p4 = scmp.lt.u32.totalorder %s6053_s18, %s6286_s27 }
 0xacf   : > { %p4972_p13 = scmp.lt.u32.totalorder %s4970_s21, %s4966_s4  ;;  %p4974_p6 = scmp.lt.u32.totalorder %s4966_s4, %s6053_s18 }
 0xad0   : > { %p4968_p9 = pnand %p4967_p1, %p6292_p10 }
 0xad1   : > { %p4973_p0 = por %p4972_p13, %p4971_p4 }
 0xad2   : > { %p4969_p7 = pneg %p4968_p9 }
 0xad3   : > { %p4975_p3 = por %p4974_p6, %p4973_p0 }
 0xad5   : > { %p4976_p2 = pnand %p4975_p3, %p4969_p7 }
 0xad7   : > { %4979 = shalt.err (!%p4976_p2)
}
 0xad8   : > { %4020 = dma.vmem_to_hbm [thread:$0]  (%p6292_p10), %s3215_s5, 128, %s6053_s18, %s3156_s12  }
 0xad9   : > { %p6293_p12 = scmp.eq.s32.totalorder %s5272_s26, 1 }
 0xadb   : > { %5047 = dma.done.wait (%p6293_p12), [#allocation12], 128   ;;  %p6294_p5 = pmov %p6293_p12 }
 0xadd   : > { %5049 = vsyncadd (%p6294_p5), [#allocation12], 4294967168  ;;  %p6295_p8 = pmov %p6294_p5 }
 0xade   : > { %p6296_p11 = pmov %p6294_p5 }
 0xadf   : > { %5051 = dma.done.wait (%p6295_p8), [#allocation29], 256  }
 0xae0   : > { %5053 = vsyncadd (%p6296_p11), [#allocation29], 4294967040 }
 0xae1 PF: > { %s6297_s2 = sld [smem:[#allocation69_spill]]  ;;  %s6298_s23 = sld [smem:[#allocation78_spill]] }
 0xae2   : > { %s6299_s6 = sld [smem:[#allocation73_spill]] }
 0xae7   : > { %s3248_s17 = sand.u32 1, %s6297_s2   ;;  %p6300_p1 = scmp.ne.s32.totalorder %s6298_s23, 0 }
 0xae8   : > { %p6301_p9 = scmp.ge.s32.totalorder %s6299_s6, 2  ;;  %s3249_s18 = scalar_lea.sflag [#allocation32], %s3248_s17 }
 0xaea   : > { %p4061_p7 = pnand %p6301_p9, %p6300_p1 }
 0xaec   : > { %5055 = dma.done.wait (!%p4061_p7), %s3249_s18, 128  }
 0xaed   : > { %5057 = vsyncadd (!%p4061_p7), %s3249_s18, 4294967168  ;;  %s51_s24 = sadd.s32 1, %s6299_s6   ;;  %s6302_s12 = sld [smem:[#allocation70_spill]] }
 0xaee   : > { %p48_p10 = scmp.ge.s32.totalorder %s51_s24, 4   ;;  %s6303_s7 = sld [smem:[#allocation77_spill]] }
 0xaef   : > { %s6304_s23 = sld [smem:[#allocation72_spill]]  ;;  %s6305_s1 = sld [smem:[#allocation74_spill]] }
 0xaf0   : > { %s6306_s5 = smov %s5068_s22  ;;  %50 = sbr.rel (!%p48_p10) target bundleno = 41 (0x29), region = 296 }
 0xaf4   : > { %s6307_s22 = smov %s6303_s7 }
 0xaf7   :  { %3254 = vsyncpa [#allocation11], 1 }
 0xaf8   :  { %3256 = vsyncpa [#allocation11 + $0x1], 1 }
 0xaf9   :  { %3257 = vsyncpa [#allocation14], 1 }
 0xafa   :  { %3258 = vsyncpa [#allocation17], 1 }
 0xafb   :  { %3259 = vsyncpa [#allocation20], 1 }
 0xafc   :  { %3260 = vsyncpa [#allocation23], 1 }
 0xafd   :  { %3262 = vsyncpa [#allocation23 + $0x1], 1 }
 0xafe   :  { %3263 = vsyncpa [#allocation26], 1 }
 0xaff   :  { %3265 = vsyncpa [#allocation26 + $0x1], 1 }
 0xb00   :  { %3266 = vsyncpa [#allocation12], 1 }
 0xb01   :  { %3268 = vsyncpa [#allocation12 + $0x1], 1 }
 0xb02   :  { %3269 = vsyncpa [#allocation29], 1 }
 0xb03   :  { %3270 = vsyncpa [#allocation32], 1 }
 0xb04   :  { %3272 = vsyncpa [#allocation32 + $0x1], 1 }
 0xb05   :  { %3273 = vsyncmov [#allocation7] }
 0xb08   :  { %s3274_s26 = vpop.sfrf %3273 }
 0xb09   :  { %p3784_p4 = scmp.ne.s32.totalorder %s3274_s26, 0 }
 0xb0b   :  { %3278 = shalt.err (%p3784_p4)  }
 0xb0c   :  { %3280 = vsyncmov [#allocation7 + $0x1] }
 0xb0f   :  { %s3281_s24 = vpop.sfrf %3280 }
 0xb10   :  { %p3785_p13 = scmp.ne.s32.totalorder %s3281_s24, 0 }
 0xb12   :  { %3285 = shalt.err (%p3785_p13)  }
 0xb13   :  { %3287 = vsyncmov [#allocation7 + $0x2] }
 0xb16   :  { %s3288_s14 = vpop.sfrf %3287 }
 0xb17   :  { %p3786_p0 = scmp.ne.s32.totalorder %s3288_s14, 0 }
 0xb19   :  { %3292 = shalt.err (%p3786_p0)  }
 0xb1a   :  { %3294 = vsyncmov [#allocation7 + $0x3] }
 0xb1d   :  { %s3295_s15 = vpop.sfrf %3294 }
 0xb1e   :  { %p3787_p6 = scmp.ne.s32.totalorder %s3295_s15, 0 }
 0xb20   :  { %3299 = shalt.err (%p3787_p6)  }
 0xb21   :  { %3301 = vsyncmov [#allocation7 + $0x4] }
 0xb24   :  { %s3302_s22 = vpop.sfrf %3301 }
 0xb25   :  { %p3788_p3 = scmp.ne.s32.totalorder %s3302_s22, 0 }
 0xb27   :  { %3306 = shalt.err (%p3788_p3)  }
 0xb28   :  { %3308 = vsyncmov [#allocation7 + $0x5] }
 0xb2b   :  { %s3309_s25 = vpop.sfrf %3308 }
 0xb2c   :  { %p3789_p2 = scmp.ne.s32.totalorder %s3309_s25, 0 }
 0xb2e   :  { %3313 = shalt.err (%p3789_p2)  }
 0xb2f   :  { %3315 = vsyncmov [#allocation7 + $0x6] }
 0xb32   :  { %s3316_s13 = vpop.sfrf %3315 }
 0xb33   :  { %p3790_p12 = scmp.ne.s32.totalorder %s3316_s13, 0 }
 0xb35   :  { %3320 = shalt.err (%p3790_p12)  }
 0xb36   :  { %3322 = vsyncmov [#allocation7 + $0x7] }
 0xb39   :  { %s3323_s8 = vpop.sfrf %3322 }
 0xb3a   :  { %p3791_p5 = scmp.ne.s32.totalorder %s3323_s8, 0 }
 0xb3c   :  { %3327 = shalt.err (%p3791_p5)  }

</bundles_post_ra>
